<compile_context>
chip_gen: v7x
topology: tpu7x:2x2x1
jax: 0.10.0
libtpu: 0.0.40
codegen_flags: <defaults>
</compile_context>

<pallas_src>
import jax
import jax.numpy as jnp
import numpy as np
from jax.experimental import pallas as pl
from jax.experimental.pallas import tpu as pltpu

_HIGHEST = jax.lax.Precision.HIGHEST


def make_lstm_encoder_kernel(L, T, B, H, F):
    """Builds the Pallas kernel for static sizes (layers, seq, batch, hidden, features)."""
    H3 = 3 * H

    def kernel(*refs):
        # ---- unpack refs ----------------------------------------------------
        p = 0
        x_ref = refs[p]; p += 1          # (T*B, F)  time-major rows: row = t*B + b
        w0x_ref = refs[p]; p += 1        # (F, 4H)   layer-0 input weights (gates [i,f,o,g])
        w0h_ref = refs[p]; p += 1        # (H, 4H)   layer-0 recurrent weights
        b0_ref = refs[p]; p += 1         # (1, 4H)   b_ih0 + b_hh0
        deep_refs = []
        for _ in range(L - 1):
            deep_refs.append((refs[p], refs[p + 1], refs[p + 2]))  # (H,4H),(H,4H),(1,4H)
            p += 3
        hidden_ref = refs[p]; p += 1     # (L, B, H)
        cell_ref = refs[p]; p += 1       # (L, B, H)

        # ---- load every weight once; they stay resident in vregs -------------
        w0h = w0h_ref[...]
        deep_w = [(wx[...], wh[...], b[...]) for (wx, wh, b) in deep_refs]

        # ---- hoisted layer-0 input projection (+ bias) for ALL steps ---------
        x_proj = (
            jnp.dot(x_ref[...], w0x_ref[...],
                    preferred_element_type=jnp.float32, precision=_HIGHEST)
            + b0_ref[...]
        )                                                   # (T*B, 4H)

        def lstm_cell(gates, c_prev):
            # gates packed [i | f | o | g]: one sigmoid over 3H, one tanh over H
            s = jax.nn.sigmoid(gates[:, :H3])
            g = jnp.tanh(gates[:, H3:])
            c_new = s[:, H:2 * H] * c_prev + s[:, :H] * g
            h_new = s[:, 2 * H:H3] * jnp.tanh(c_new)
            return h_new, c_new

        # nn.LSTM with no (h0, c0) starts from zeros; keep state in vregs.
        h = [jnp.zeros((B, H), jnp.float32) for _ in range(L)]
        c = [jnp.zeros((B, H), jnp.float32) for _ in range(L)]

        # ---- fully unrolled recurrence (wavefront visible to the scheduler) --
        for t in range(T):
            gates0 = x_proj[t * B:(t + 1) * B, :] + jnp.dot(
                h[0], w0h, preferred_element_type=jnp.float32, precision=_HIGHEST)
            h[0], c[0] = lstm_cell(gates0, c[0])
            inp = h[0]
            for l in range(1, L):
                wx, wh, b = deep_w[l - 1]
                gates = (
                    jnp.dot(inp, wx, preferred_element_type=jnp.float32,
                            precision=_HIGHEST)
                    + jnp.dot(h[l], wh, preferred_element_type=jnp.float32,
                              precision=_HIGHEST)
                    + b
                )
                h[l], c[l] = lstm_cell(gates, c[l])
                inp = h[l]

        # ---- epilogue ---------------------------------------------------------
        for l in range(L):
            hidden_ref[l] = h[l]
            cell_ref[l] = c[l]

    return kernel


def pack_params(params, hidden_dim):
    """One-time parameter packing (hoisted out of the per-call path):
    gate reorder [i,f,g,o] -> [i,f,o,g], transpose for (K, 4H) matmuls, b_ih + b_hh."""
    H = hidden_dim

    def reorder(a):  # reorder the 4H gate axis (axis 0)
        return jnp.concatenate([a[0:H], a[H:2 * H], a[3 * H:4 * H], a[2 * H:3 * H]],
                               axis=0)

    layers = params["layers"]
    w_ih0, w_hh0, b_ih0, b_hh0 = layers[0]
    packed = {
        "w0x_t": jnp.transpose(reorder(w_ih0)),      # (F, 4H)
        "w0h_t": jnp.transpose(reorder(w_hh0)),      # (H, 4H)
        "b0": reorder(b_ih0 + b_hh0)[None, :],       # (1, 4H)
        "deep": [],
    }
    for l in range(1, len(layers)):
        w_ih, w_hh, b_ih, b_hh = layers[l]
        packed["deep"].append((
            jnp.transpose(reorder(w_ih)),            # (H, 4H)
            jnp.transpose(reorder(w_hh)),            # (H, 4H)
            reorder(b_ih + b_hh)[None, :],           # (1, 4H)
        ))
    return packed


@jax.jit
def lstm_encoder_forward(x, packed):
    """Pallas equivalent of LSTMEncoder.forward(x) -> (hidden, cell).

    x: (B, T, F) batch_first.  Returns hidden, cell each of shape (L, B, H).
    """
    B, T, F = x.shape
    H = packed["w0h_t"].shape[0]
    L = 1 + len(packed["deep"])

    # time-major flattened rows (row = t*B + b) so the hoisted layer-0 projection is one matmul
    x_flat = jnp.transpose(x, (1, 0, 2)).reshape(T * B, F).astype(jnp.float32)

    inputs = [x_flat, packed["w0x_t"], packed["w0h_t"], packed["b0"]]
    for wx, wh, b in packed["deep"]:
        inputs += [wx, wh, b]

    vmem = pl.BlockSpec(memory_space=pltpu.MemorySpace.VMEM)
    hidden, cell = pl.pallas_call(
        make_lstm_encoder_kernel(L, T, B, H, F),
        out_shape=(jax.ShapeDtypeStruct((L, B, H), jnp.float32),
                   jax.ShapeDtypeStruct((L, B, H), jnp.float32)),
        in_specs=[vmem] * len(inputs),
        out_specs=(vmem, vmem),
    )(*inputs)
    return hidden, cell


# ------------------------- pure-numpy reference (ground truth) -------------------------
def lstm_encoder_ref_np(x, params):
    x = np.asarray(x, np.float32)
    layers = [[np.asarray(a, np.float32) for a in layer] for layer in params["layers"]]
    B, T, F = x.shape
    L = len(layers)
    H = layers[0][1].shape[1]
    h = [np.zeros((B, H), np.float32) for _ in range(L)]
    c = [np.zeros((B, H), np.float32) for _ in range(L)]

    def sigmoid(z):
        return 1.0 / (1.0 + np.exp(-z))

    for t in range(T):
        inp = x[:, t, :]
        for l in range(L):
            w_ih, w_hh, b_ih, b_hh = layers[l]
            gates = inp @ w_ih.T + b_ih + h[l] @ w_hh.T + b_hh   # PyTorch order [i,f,g,o]
            i_g = sigmoid(gates[:, :H])
            f_g = sigmoid(gates[:, H:2 * H])
            g_g = np.tanh(gates[:, 2 * H:3 * H])
            o_g = sigmoid(gates[:, 3 * H:4 * H])
            c[l] = f_g * c[l] + i_g * g_g
            h[l] = o_g * np.tanh(c[l])
            inp = h[l]
    return np.stack(h), np.stack(c)


def init_params(key, hidden_dim, layer_dim, n_features):
    """Deterministic PyTorch-style uniform(-1/sqrt(H), 1/sqrt(H)) init for nn.LSTM."""
    k = 1.0 / np.sqrt(hidden_dim)
    layers = []
    for l in range(layer_dim):
        din = n_features if l == 0 else hidden_dim
        key, k1, k2, k3, k4 = jax.random.split(key, 5)
        w_ih = jax.random.uniform(k1, (4 * hidden_dim, din), jnp.float32, -k, k)
        w_hh = jax.random.uniform(k2, (4 * hidden_dim, hidden_dim), jnp.float32, -k, k)
        b_ih = jax.random.uniform(k3, (4 * hidden_dim,), jnp.float32, -k, k)
        b_hh = jax.random.uniform(k4, (4 * hidden_dim,), jnp.float32, -k, k)
        layers.append((w_ih, w_hh, b_ih, b_hh))
    return {"layers": layers}, key


if __name__ == "__main__":
    # Shapes implied by the module: x (batch, seq, n_features), state (layer_dim, batch, hidden_dim).
    batch, seq, n_features = 2, 8, 4
    hidden_dim, layer_dim = 32, 2

    key = jax.random.PRNGKey(0)
    params, key = init_params(key, hidden_dim, layer_dim, n_features)
    packed = pack_params(params, hidden_dim)   # one-time packing, hoisted out of forward

    key, kx = jax.random.split(key)
    x = jax.random.normal(kx, (batch, seq, n_features), jnp.float32)

    hidden, cell = lstm_encoder_forward(x, packed)
    jax.block_until_ready((hidden, cell))

    # check against a full-precision numpy reference
    rh, rc = lstm_encoder_ref_np(np.asarray(x), params)
    np.testing.assert_allclose(np.asarray(hidden), rh, rtol=5e-3, atol=5e-3)
    np.testing.assert_allclose(np.asarray(cell), rc, rtol=5e-3, atol=5e-3)

    print("KERNEL_OK")
</pallas_src>

<mosaic_0001>
module attributes {stable_mosaic.version = 11 : i64} {
  func.func @kernel(%arg0: memref<16x4xf32, #tpu.memory_space<vmem>>, %arg1: memref<4x128xf32, #tpu.memory_space<vmem>>, %arg2: memref<32x128xf32, #tpu.memory_space<vmem>>, %arg3: memref<1x128xf32, #tpu.memory_space<vmem>>, %arg4: memref<32x128xf32, #tpu.memory_space<vmem>>, %arg5: memref<32x128xf32, #tpu.memory_space<vmem>>, %arg6: memref<1x128xf32, #tpu.memory_space<vmem>>, %arg7: memref<2x2x32xf32, #tpu.memory_space<vmem>>, %arg8: memref<2x2x32xf32, #tpu.memory_space<vmem>>) attributes {dimension_semantics = [], scalar_prefetch = 0 : i64, scratch_operands = 0 : i64, tpu.core_type = #tpu.core_type<tc>} {
    %c0 = arith.constant 0 : index
    %c0_0 = arith.constant 0 : index
    %0 = vector.load %arg2[%c0, %c0_0] : memref<32x128xf32, #tpu.memory_space<vmem>>, vector<32x128xf32>
    %c0_1 = arith.constant 0 : index
    %c0_2 = arith.constant 0 : index
    %1 = vector.load %arg4[%c0_1, %c0_2] : memref<32x128xf32, #tpu.memory_space<vmem>>, vector<32x128xf32>
    %c0_3 = arith.constant 0 : index
    %c0_4 = arith.constant 0 : index
    %2 = vector.load %arg5[%c0_3, %c0_4] : memref<32x128xf32, #tpu.memory_space<vmem>>, vector<32x128xf32>
    %c0_5 = arith.constant 0 : index
    %c0_6 = arith.constant 0 : index
    %3 = vector.load %arg6[%c0_5, %c0_6] : memref<1x128xf32, #tpu.memory_space<vmem>>, vector<1x128xf32>
    %c0_7 = arith.constant 0 : index
    %c0_8 = arith.constant 0 : index
    %4 = vector.load %arg0[%c0_7, %c0_8] : memref<16x4xf32, #tpu.memory_space<vmem>>, vector<16x4xf32>
    %c0_9 = arith.constant 0 : index
    %c0_10 = arith.constant 0 : index
    %5 = vector.load %arg1[%c0_9, %c0_10] : memref<4x128xf32, #tpu.memory_space<vmem>>, vector<4x128xf32>
    %cst = arith.constant dense<0.000000e+00> : vector<16x128xf32>
    %6 = tpu.matmul %4, %5, %cst {dimension_numbers = #tpu.dot_dimension_numbers<[1], [0], [0], [1], [0, 0, 1, 1], [], []>, precision = #tpu.contract_precision<fp32>} : vector<16x4xf32>, vector<4x128xf32>, vector<16x128xf32> -> vector<16x128xf32>
    %c0_11 = arith.constant 0 : index
    %c0_12 = arith.constant 0 : index
    %7 = vector.load %arg3[%c0_11, %c0_12] : memref<1x128xf32, #tpu.memory_space<vmem>>, vector<1x128xf32>
    %8 = vector.broadcast %7 : vector<1x128xf32> to vector<16x128xf32>
    %9 = arith.addf %6, %8 : vector<16x128xf32>
    %cst_13 = arith.constant 0.000000e+00 : f32
    %10 = vector.broadcast %cst_13 : f32 to vector<2x32xf32>
    %cst_14 = arith.constant 0.000000e+00 : f32
    %11 = vector.broadcast %cst_14 : f32 to vector<2x32xf32>
    %cst_15 = arith.constant 0.000000e+00 : f32
    %12 = vector.broadcast %cst_15 : f32 to vector<2x32xf32>
    %cst_16 = arith.constant 0.000000e+00 : f32
    %13 = vector.broadcast %cst_16 : f32 to vector<2x32xf32>
    %14 = vector.extract_strided_slice %9 {offsets = [0, 0], sizes = [2, 128], strides = [1, 1]} : vector<16x128xf32> to vector<2x128xf32>
    %cst_17 = arith.constant dense<0.000000e+00> : vector<2x128xf32>
    %15 = tpu.matmul %10, %0, %cst_17 {dimension_numbers = #tpu.dot_dimension_numbers<[1], [0], [0], [1], [0, 0, 1, 1], [], []>, precision = #tpu.contract_precision<fp32>} : vector<2x32xf32>, vector<32x128xf32>, vector<2x128xf32> -> vector<2x128xf32>
    %16 = arith.addf %14, %15 : vector<2x128xf32>
    %17 = vector.extract_strided_slice %16 {offsets = [0, 0], sizes = [2, 96], strides = [1, 1]} : vector<2x128xf32> to vector<2x96xf32>
    %18 = arith.negf %17 : vector<2x96xf32>
    %19 = math.exp %18 : vector<2x96xf32>
    %cst_18 = arith.constant 1.000000e+00 : f32
    %20 = vector.broadcast %cst_18 : f32 to vector<2x96xf32>
    %21 = arith.addf %20, %19 : vector<2x96xf32>
    %22 = arith.divf %20, %21 : vector<2x96xf32>
    %23 = vector.extract_strided_slice %16 {offsets = [0, 96], sizes = [2, 32], strides = [1, 1]} : vector<2x128xf32> to vector<2x32xf32>
    %24 = math.tanh %23 : vector<2x32xf32>
    %25 = vector.extract_strided_slice %22 {offsets = [0, 32], sizes = [2, 32], strides = [1, 1]} : vector<2x96xf32> to vector<2x32xf32>
    %26 = arith.mulf %25, %12 : vector<2x32xf32>
    %27 = vector.extract_strided_slice %22 {offsets = [0, 0], sizes = [2, 32], strides = [1, 1]} : vector<2x96xf32> to vector<2x32xf32>
    %28 = arith.mulf %27, %24 : vector<2x32xf32>
    %29 = arith.addf %26, %28 : vector<2x32xf32>
    %30 = vector.extract_strided_slice %22 {offsets = [0, 64], sizes = [2, 32], strides = [1, 1]} : vector<2x96xf32> to vector<2x32xf32>
    %31 = math.tanh %29 : vector<2x32xf32>
    %32 = arith.mulf %30, %31 : vector<2x32xf32>
    %cst_19 = arith.constant dense<0.000000e+00> : vector<2x128xf32>
    %33 = tpu.matmul %32, %1, %cst_19 {dimension_numbers = #tpu.dot_dimension_numbers<[1], [0], [0], [1], [0, 0, 1, 1], [], []>, precision = #tpu.contract_precision<fp32>} : vector<2x32xf32>, vector<32x128xf32>, vector<2x128xf32> -> vector<2x128xf32>
    %cst_20 = arith.constant dense<0.000000e+00> : vector<2x128xf32>
    %34 = tpu.matmul %11, %2, %cst_20 {dimension_numbers = #tpu.dot_dimension_numbers<[1], [0], [0], [1], [0, 0, 1, 1], [], []>, precision = #tpu.contract_precision<fp32>} : vector<2x32xf32>, vector<32x128xf32>, vector<2x128xf32> -> vector<2x128xf32>
    %35 = arith.addf %33, %34 : vector<2x128xf32>
    %36 = vector.broadcast %3 : vector<1x128xf32> to vector<2x128xf32>
    %37 = arith.addf %35, %36 : vector<2x128xf32>
    %38 = vector.extract_strided_slice %37 {offsets = [0, 0], sizes = [2, 96], strides = [1, 1]} : vector<2x128xf32> to vector<2x96xf32>
    %39 = arith.negf %38 : vector<2x96xf32>
    %40 = math.exp %39 : vector<2x96xf32>
    %cst_21 = arith.constant 1.000000e+00 : f32
    %41 = vector.broadcast %cst_21 : f32 to vector<2x96xf32>
    %42 = arith.addf %41, %40 : vector<2x96xf32>
    %43 = arith.divf %41, %42 : vector<2x96xf32>
    %44 = vector.extract_strided_slice %37 {offsets = [0, 96], sizes = [2, 32], strides = [1, 1]} : vector<2x128xf32> to vector<2x32xf32>
    %45 = math.tanh %44 : vector<2x32xf32>
    %46 = vector.extract_strided_slice %43 {offsets = [0, 32], sizes = [2, 32], strides = [1, 1]} : vector<2x96xf32> to vector<2x32xf32>
    %47 = arith.mulf %46, %13 : vector<2x32xf32>
    %48 = vector.extract_strided_slice %43 {offsets = [0, 0], sizes = [2, 32], strides = [1, 1]} : vector<2x96xf32> to vector<2x32xf32>
    %49 = arith.mulf %48, %45 : vector<2x32xf32>
    %50 = arith.addf %47, %49 : vector<2x32xf32>
    %51 = vector.extract_strided_slice %43 {offsets = [0, 64], sizes = [2, 32], strides = [1, 1]} : vector<2x96xf32> to vector<2x32xf32>
    %52 = math.tanh %50 : vector<2x32xf32>
    %53 = arith.mulf %51, %52 : vector<2x32xf32>
    %54 = vector.extract_strided_slice %9 {offsets = [2, 0], sizes = [2, 128], strides = [1, 1]} : vector<16x128xf32> to vector<2x128xf32>
    %cst_22 = arith.constant dense<0.000000e+00> : vector<2x128xf32>
    %55 = tpu.matmul %32, %0, %cst_22 {dimension_numbers = #tpu.dot_dimension_numbers<[1], [0], [0], [1], [0, 0, 1, 1], [], []>, precision = #tpu.contract_precision<fp32>} : vector<2x32xf32>, vector<32x128xf32>, vector<2x128xf32> -> vector<2x128xf32>
    %56 = arith.addf %54, %55 : vector<2x128xf32>
    %57 = vector.extract_strided_slice %56 {offsets = [0, 0], sizes = [2, 96], strides = [1, 1]} : vector<2x128xf32> to vector<2x96xf32>
    %58 = arith.negf %57 : vector<2x96xf32>
    %59 = math.exp %58 : vector<2x96xf32>
    %cst_23 = arith.constant 1.000000e+00 : f32
    %60 = vector.broadcast %cst_23 : f32 to vector<2x96xf32>
    %61 = arith.addf %60, %59 : vector<2x96xf32>
    %62 = arith.divf %60, %61 : vector<2x96xf32>
    %63 = vector.extract_strided_slice %56 {offsets = [0, 96], sizes = [2, 32], strides = [1, 1]} : vector<2x128xf32> to vector<2x32xf32>
    %64 = math.tanh %63 : vector<2x32xf32>
    %65 = vector.extract_strided_slice %62 {offsets = [0, 32], sizes = [2, 32], strides = [1, 1]} : vector<2x96xf32> to vector<2x32xf32>
    %66 = arith.mulf %65, %29 : vector<2x32xf32>
    %67 = vector.extract_strided_slice %62 {offsets = [0, 0], sizes = [2, 32], strides = [1, 1]} : vector<2x96xf32> to vector<2x32xf32>
    %68 = arith.mulf %67, %64 : vector<2x32xf32>
    %69 = arith.addf %66, %68 : vector<2x32xf32>
    %70 = vector.extract_strided_slice %62 {offsets = [0, 64], sizes = [2, 32], strides = [1, 1]} : vector<2x96xf32> to vector<2x32xf32>
    %71 = math.tanh %69 : vector<2x32xf32>
    %72 = arith.mulf %70, %71 : vector<2x32xf32>
    %cst_24 = arith.constant dense<0.000000e+00> : vector<2x128xf32>
    %73 = tpu.matmul %72, %1, %cst_24 {dimension_numbers = #tpu.dot_dimension_numbers<[1], [0], [0], [1], [0, 0, 1, 1], [], []>, precision = #tpu.contract_precision<fp32>} : vector<2x32xf32>, vector<32x128xf32>, vector<2x128xf32> -> vector<2x128xf32>
    %cst_25 = arith.constant dense<0.000000e+00> : vector<2x128xf32>
    %74 = tpu.matmul %53, %2, %cst_25 {dimension_numbers = #tpu.dot_dimension_numbers<[1], [0], [0], [1], [0, 0, 1, 1], [], []>, precision = #tpu.contract_precision<fp32>} : vector<2x32xf32>, vector<32x128xf32>, vector<2x128xf32> -> vector<2x128xf32>
    %75 = arith.addf %73, %74 : vector<2x128xf32>
    %76 = vector.broadcast %3 : vector<1x128xf32> to vector<2x128xf32>
    %77 = arith.addf %75, %76 : vector<2x128xf32>
    %78 = vector.extract_strided_slice %77 {offsets = [0, 0], sizes = [2, 96], strides = [1, 1]} : vector<2x128xf32> to vector<2x96xf32>
    %79 = arith.negf %78 : vector<2x96xf32>
    %80 = math.exp %79 : vector<2x96xf32>
    %cst_26 = arith.constant 1.000000e+00 : f32
    %81 = vector.broadcast %cst_26 : f32 to vector<2x96xf32>
    %82 = arith.addf %81, %80 : vector<2x96xf32>
    %83 = arith.divf %81, %82 : vector<2x96xf32>
    %84 = vector.extract_strided_slice %77 {offsets = [0, 96], sizes = [2, 32], strides = [1, 1]} : vector<2x128xf32> to vector<2x32xf32>
    %85 = math.tanh %84 : vector<2x32xf32>
    %86 = vector.extract_strided_slice %83 {offsets = [0, 32], sizes = [2, 32], strides = [1, 1]} : vector<2x96xf32> to vector<2x32xf32>
    %87 = arith.mulf %86, %50 : vector<2x32xf32>
    %88 = vector.extract_strided_slice %83 {offsets = [0, 0], sizes = [2, 32], strides = [1, 1]} : vector<2x96xf32> to vector<2x32xf32>
    %89 = arith.mulf %88, %85 : vector<2x32xf32>
    %90 = arith.addf %87, %89 : vector<2x32xf32>
    %91 = vector.extract_strided_slice %83 {offsets = [0, 64], sizes = [2, 32], strides = [1, 1]} : vector<2x96xf32> to vector<2x32xf32>
    %92 = math.tanh %90 : vector<2x32xf32>
    %93 = arith.mulf %91, %92 : vector<2x32xf32>
    %94 = vector.extract_strided_slice %9 {offsets = [4, 0], sizes = [2, 128], strides = [1, 1]} : vector<16x128xf32> to vector<2x128xf32>
    %cst_27 = arith.constant dense<0.000000e+00> : vector<2x128xf32>
    %95 = tpu.matmul %72, %0, %cst_27 {dimension_numbers = #tpu.dot_dimension_numbers<[1], [0], [0], [1], [0, 0, 1, 1], [], []>, precision = #tpu.contract_precision<fp32>} : vector<2x32xf32>, vector<32x128xf32>, vector<2x128xf32> -> vector<2x128xf32>
    %96 = arith.addf %94, %95 : vector<2x128xf32>
    %97 = vector.extract_strided_slice %96 {offsets = [0, 0], sizes = [2, 96], strides = [1, 1]} : vector<2x128xf32> to vector<2x96xf32>
    %98 = arith.negf %97 : vector<2x96xf32>
    %99 = math.exp %98 : vector<2x96xf32>
    %cst_28 = arith.constant 1.000000e+00 : f32
    %100 = vector.broadcast %cst_28 : f32 to vector<2x96xf32>
    %101 = arith.addf %100, %99 : vector<2x96xf32>
    %102 = arith.divf %100, %101 : vector<2x96xf32>
    %103 = vector.extract_strided_slice %96 {offsets = [0, 96], sizes = [2, 32], strides = [1, 1]} : vector<2x128xf32> to vector<2x32xf32>
    %104 = math.tanh %103 : vector<2x32xf32>
    %105 = vector.extract_strided_slice %102 {offsets = [0, 32], sizes = [2, 32], strides = [1, 1]} : vector<2x96xf32> to vector<2x32xf32>
    %106 = arith.mulf %105, %69 : vector<2x32xf32>
    %107 = vector.extract_strided_slice %102 {offsets = [0, 0], sizes = [2, 32], strides = [1, 1]} : vector<2x96xf32> to vector<2x32xf32>
    %108 = arith.mulf %107, %104 : vector<2x32xf32>
    %109 = arith.addf %106, %108 : vector<2x32xf32>
    %110 = vector.extract_strided_slice %102 {offsets = [0, 64], sizes = [2, 32], strides = [1, 1]} : vector<2x96xf32> to vector<2x32xf32>
    %111 = math.tanh %109 : vector<2x32xf32>
    %112 = arith.mulf %110, %111 : vector<2x32xf32>
    %cst_29 = arith.constant dense<0.000000e+00> : vector<2x128xf32>
    %113 = tpu.matmul %112, %1, %cst_29 {dimension_numbers = #tpu.dot_dimension_numbers<[1], [0], [0], [1], [0, 0, 1, 1], [], []>, precision = #tpu.contract_precision<fp32>} : vector<2x32xf32>, vector<32x128xf32>, vector<2x128xf32> -> vector<2x128xf32>
    %cst_30 = arith.constant dense<0.000000e+00> : vector<2x128xf32>
    %114 = tpu.matmul %93, %2, %cst_30 {dimension_numbers = #tpu.dot_dimension_numbers<[1], [0], [0], [1], [0, 0, 1, 1], [], []>, precision = #tpu.contract_precision<fp32>} : vector<2x32xf32>, vector<32x128xf32>, vector<2x128xf32> -> vector<2x128xf32>
    %115 = arith.addf %113, %114 : vector<2x128xf32>
    %116 = vector.broadcast %3 : vector<1x128xf32> to vector<2x128xf32>
    %117 = arith.addf %115, %116 : vector<2x128xf32>
    %118 = vector.extract_strided_slice %117 {offsets = [0, 0], sizes = [2, 96], strides = [1, 1]} : vector<2x128xf32> to vector<2x96xf32>
    %119 = arith.negf %118 : vector<2x96xf32>
    %120 = math.exp %119 : vector<2x96xf32>
    %cst_31 = arith.constant 1.000000e+00 : f32
    %121 = vector.broadcast %cst_31 : f32 to vector<2x96xf32>
    %122 = arith.addf %121, %120 : vector<2x96xf32>
    %123 = arith.divf %121, %122 : vector<2x96xf32>
    %124 = vector.extract_strided_slice %117 {offsets = [0, 96], sizes = [2, 32], strides = [1, 1]} : vector<2x128xf32> to vector<2x32xf32>
    %125 = math.tanh %124 : vector<2x32xf32>
    %126 = vector.extract_strided_slice %123 {offsets = [0, 32], sizes = [2, 32], strides = [1, 1]} : vector<2x96xf32> to vector<2x32xf32>
    %127 = arith.mulf %126, %90 : vector<2x32xf32>
    %128 = vector.extract_strided_slice %123 {offsets = [0, 0], sizes = [2, 32], strides = [1, 1]} : vector<2x96xf32> to vector<2x32xf32>
    %129 = arith.mulf %128, %125 : vector<2x32xf32>
    %130 = arith.addf %127, %129 : vector<2x32xf32>
    %131 = vector.extract_strided_slice %123 {offsets = [0, 64], sizes = [2, 32], strides = [1, 1]} : vector<2x96xf32> to vector<2x32xf32>
    %132 = math.tanh %130 : vector<2x32xf32>
    %133 = arith.mulf %131, %132 : vector<2x32xf32>
    %134 = vector.extract_strided_slice %9 {offsets = [6, 0], sizes = [2, 128], strides = [1, 1]} : vector<16x128xf32> to vector<2x128xf32>
    %cst_32 = arith.constant dense<0.000000e+00> : vector<2x128xf32>
    %135 = tpu.matmul %112, %0, %cst_32 {dimension_numbers = #tpu.dot_dimension_numbers<[1], [0], [0], [1], [0, 0, 1, 1], [], []>, precision = #tpu.contract_precision<fp32>} : vector<2x32xf32>, vector<32x128xf32>, vector<2x128xf32> -> vector<2x128xf32>
    %136 = arith.addf %134, %135 : vector<2x128xf32>
    %137 = vector.extract_strided_slice %136 {offsets = [0, 0], sizes = [2, 96], strides = [1, 1]} : vector<2x128xf32> to vector<2x96xf32>
    %138 = arith.negf %137 : vector<2x96xf32>
    %139 = math.exp %138 : vector<2x96xf32>
    %cst_33 = arith.constant 1.000000e+00 : f32
    %140 = vector.broadcast %cst_33 : f32 to vector<2x96xf32>
    %141 = arith.addf %140, %139 : vector<2x96xf32>
    %142 = arith.divf %140, %141 : vector<2x96xf32>
    %143 = vector.extract_strided_slice %136 {offsets = [0, 96], sizes = [2, 32], strides = [1, 1]} : vector<2x128xf32> to vector<2x32xf32>
    %144 = math.tanh %143 : vector<2x32xf32>
    %145 = vector.extract_strided_slice %142 {offsets = [0, 32], sizes = [2, 32], strides = [1, 1]} : vector<2x96xf32> to vector<2x32xf32>
    %146 = arith.mulf %145, %109 : vector<2x32xf32>
    %147 = vector.extract_strided_slice %142 {offsets = [0, 0], sizes = [2, 32], strides = [1, 1]} : vector<2x96xf32> to vector<2x32xf32>
    %148 = arith.mulf %147, %144 : vector<2x32xf32>
    %149 = arith.addf %146, %148 : vector<2x32xf32>
    %150 = vector.extract_strided_slice %142 {offsets = [0, 64], sizes = [2, 32], strides = [1, 1]} : vector<2x96xf32> to vector<2x32xf32>
    %151 = math.tanh %149 : vector<2x32xf32>
    %152 = arith.mulf %150, %151 : vector<2x32xf32>
    %cst_34 = arith.constant dense<0.000000e+00> : vector<2x128xf32>
    %153 = tpu.matmul %152, %1, %cst_34 {dimension_numbers = #tpu.dot_dimension_numbers<[1], [0], [0], [1], [0, 0, 1, 1], [], []>, precision = #tpu.contract_precision<fp32>} : vector<2x32xf32>, vector<32x128xf32>, vector<2x128xf32> -> vector<2x128xf32>
    %cst_35 = arith.constant dense<0.000000e+00> : vector<2x128xf32>
    %154 = tpu.matmul %133, %2, %cst_35 {dimension_numbers = #tpu.dot_dimension_numbers<[1], [0], [0], [1], [0, 0, 1, 1], [], []>, precision = #tpu.contract_precision<fp32>} : vector<2x32xf32>, vector<32x128xf32>, vector<2x128xf32> -> vector<2x128xf32>
    %155 = arith.addf %153, %154 : vector<2x128xf32>
    %156 = vector.broadcast %3 : vector<1x128xf32> to vector<2x128xf32>
    %157 = arith.addf %155, %156 : vector<2x128xf32>
    %158 = vector.extract_strided_slice %157 {offsets = [0, 0], sizes = [2, 96], strides = [1, 1]} : vector<2x128xf32> to vector<2x96xf32>
    %159 = arith.negf %158 : vector<2x96xf32>
    %160 = math.exp %159 : vector<2x96xf32>
    %cst_36 = arith.constant 1.000000e+00 : f32
    %161 = vector.broadcast %cst_36 : f32 to vector<2x96xf32>
    %162 = arith.addf %161, %160 : vector<2x96xf32>
    %163 = arith.divf %161, %162 : vector<2x96xf32>
    %164 = vector.extract_strided_slice %157 {offsets = [0, 96], sizes = [2, 32], strides = [1, 1]} : vector<2x128xf32> to vector<2x32xf32>
    %165 = math.tanh %164 : vector<2x32xf32>
    %166 = vector.extract_strided_slice %163 {offsets = [0, 32], sizes = [2, 32], strides = [1, 1]} : vector<2x96xf32> to vector<2x32xf32>
    %167 = arith.mulf %166, %130 : vector<2x32xf32>
    %168 = vector.extract_strided_slice %163 {offsets = [0, 0], sizes = [2, 32], strides = [1, 1]} : vector<2x96xf32> to vector<2x32xf32>
    %169 = arith.mulf %168, %165 : vector<2x32xf32>
    %170 = arith.addf %167, %169 : vector<2x32xf32>
    %171 = vector.extract_strided_slice %163 {offsets = [0, 64], sizes = [2, 32], strides = [1, 1]} : vector<2x96xf32> to vector<2x32xf32>
    %172 = math.tanh %170 : vector<2x32xf32>
    %173 = arith.mulf %171, %172 : vector<2x32xf32>
    %174 = vector.extract_strided_slice %9 {offsets = [8, 0], sizes = [2, 128], strides = [1, 1]} : vector<16x128xf32> to vector<2x128xf32>
    %cst_37 = arith.constant dense<0.000000e+00> : vector<2x128xf32>
    %175 = tpu.matmul %152, %0, %cst_37 {dimension_numbers = #tpu.dot_dimension_numbers<[1], [0], [0], [1], [0, 0, 1, 1], [], []>, precision = #tpu.contract_precision<fp32>} : vector<2x32xf32>, vector<32x128xf32>, vector<2x128xf32> -> vector<2x128xf32>
    %176 = arith.addf %174, %175 : vector<2x128xf32>
    %177 = vector.extract_strided_slice %176 {offsets = [0, 0], sizes = [2, 96], strides = [1, 1]} : vector<2x128xf32> to vector<2x96xf32>
    %178 = arith.negf %177 : vector<2x96xf32>
    %179 = math.exp %178 : vector<2x96xf32>
    %cst_38 = arith.constant 1.000000e+00 : f32
    %180 = vector.broadcast %cst_38 : f32 to vector<2x96xf32>
    %181 = arith.addf %180, %179 : vector<2x96xf32>
    %182 = arith.divf %180, %181 : vector<2x96xf32>
    %183 = vector.extract_strided_slice %176 {offsets = [0, 96], sizes = [2, 32], strides = [1, 1]} : vector<2x128xf32> to vector<2x32xf32>
    %184 = math.tanh %183 : vector<2x32xf32>
    %185 = vector.extract_strided_slice %182 {offsets = [0, 32], sizes = [2, 32], strides = [1, 1]} : vector<2x96xf32> to vector<2x32xf32>
    %186 = arith.mulf %185, %149 : vector<2x32xf32>
    %187 = vector.extract_strided_slice %182 {offsets = [0, 0], sizes = [2, 32], strides = [1, 1]} : vector<2x96xf32> to vector<2x32xf32>
    %188 = arith.mulf %187, %184 : vector<2x32xf32>
    %189 = arith.addf %186, %188 : vector<2x32xf32>
    %190 = vector.extract_strided_slice %182 {offsets = [0, 64], sizes = [2, 32], strides = [1, 1]} : vector<2x96xf32> to vector<2x32xf32>
    %191 = math.tanh %189 : vector<2x32xf32>
    %192 = arith.mulf %190, %191 : vector<2x32xf32>
    %cst_39 = arith.constant dense<0.000000e+00> : vector<2x128xf32>
    %193 = tpu.matmul %192, %1, %cst_39 {dimension_numbers = #tpu.dot_dimension_numbers<[1], [0], [0], [1], [0, 0, 1, 1], [], []>, precision = #tpu.contract_precision<fp32>} : vector<2x32xf32>, vector<32x128xf32>, vector<2x128xf32> -> vector<2x128xf32>
    %cst_40 = arith.constant dense<0.000000e+00> : vector<2x128xf32>
    %194 = tpu.matmul %173, %2, %cst_40 {dimension_numbers = #tpu.dot_dimension_numbers<[1], [0], [0], [1], [0, 0, 1, 1], [], []>, precision = #tpu.contract_precision<fp32>} : vector<2x32xf32>, vector<32x128xf32>, vector<2x128xf32> -> vector<2x128xf32>
    %195 = arith.addf %193, %194 : vector<2x128xf32>
    %196 = vector.broadcast %3 : vector<1x128xf32> to vector<2x128xf32>
    %197 = arith.addf %195, %196 : vector<2x128xf32>
    %198 = vector.extract_strided_slice %197 {offsets = [0, 0], sizes = [2, 96], strides = [1, 1]} : vector<2x128xf32> to vector<2x96xf32>
    %199 = arith.negf %198 : vector<2x96xf32>
    %200 = math.exp %199 : vector<2x96xf32>
    %cst_41 = arith.constant 1.000000e+00 : f32
    %201 = vector.broadcast %cst_41 : f32 to vector<2x96xf32>
    %202 = arith.addf %201, %200 : vector<2x96xf32>
    %203 = arith.divf %201, %202 : vector<2x96xf32>
    %204 = vector.extract_strided_slice %197 {offsets = [0, 96], sizes = [2, 32], strides = [1, 1]} : vector<2x128xf32> to vector<2x32xf32>
    %205 = math.tanh %204 : vector<2x32xf32>
    %206 = vector.extract_strided_slice %203 {offsets = [0, 32], sizes = [2, 32], strides = [1, 1]} : vector<2x96xf32> to vector<2x32xf32>
    %207 = arith.mulf %206, %170 : vector<2x32xf32>
    %208 = vector.extract_strided_slice %203 {offsets = [0, 0], sizes = [2, 32], strides = [1, 1]} : vector<2x96xf32> to vector<2x32xf32>
    %209 = arith.mulf %208, %205 : vector<2x32xf32>
    %210 = arith.addf %207, %209 : vector<2x32xf32>
    %211 = vector.extract_strided_slice %203 {offsets = [0, 64], sizes = [2, 32], strides = [1, 1]} : vector<2x96xf32> to vector<2x32xf32>
    %212 = math.tanh %210 : vector<2x32xf32>
    %213 = arith.mulf %211, %212 : vector<2x32xf32>
    %214 = vector.extract_strided_slice %9 {offsets = [10, 0], sizes = [2, 128], strides = [1, 1]} : vector<16x128xf32> to vector<2x128xf32>
    %cst_42 = arith.constant dense<0.000000e+00> : vector<2x128xf32>
    %215 = tpu.matmul %192, %0, %cst_42 {dimension_numbers = #tpu.dot_dimension_numbers<[1], [0], [0], [1], [0, 0, 1, 1], [], []>, precision = #tpu.contract_precision<fp32>} : vector<2x32xf32>, vector<32x128xf32>, vector<2x128xf32> -> vector<2x128xf32>
    %216 = arith.addf %214, %215 : vector<2x128xf32>
    %217 = vector.extract_strided_slice %216 {offsets = [0, 0], sizes = [2, 96], strides = [1, 1]} : vector<2x128xf32> to vector<2x96xf32>
    %218 = arith.negf %217 : vector<2x96xf32>
    %219 = math.exp %218 : vector<2x96xf32>
    %cst_43 = arith.constant 1.000000e+00 : f32
    %220 = vector.broadcast %cst_43 : f32 to vector<2x96xf32>
    %221 = arith.addf %220, %219 : vector<2x96xf32>
    %222 = arith.divf %220, %221 : vector<2x96xf32>
    %223 = vector.extract_strided_slice %216 {offsets = [0, 96], sizes = [2, 32], strides = [1, 1]} : vector<2x128xf32> to vector<2x32xf32>
    %224 = math.tanh %223 : vector<2x32xf32>
    %225 = vector.extract_strided_slice %222 {offsets = [0, 32], sizes = [2, 32], strides = [1, 1]} : vector<2x96xf32> to vector<2x32xf32>
    %226 = arith.mulf %225, %189 : vector<2x32xf32>
    %227 = vector.extract_strided_slice %222 {offsets = [0, 0], sizes = [2, 32], strides = [1, 1]} : vector<2x96xf32> to vector<2x32xf32>
    %228 = arith.mulf %227, %224 : vector<2x32xf32>
    %229 = arith.addf %226, %228 : vector<2x32xf32>
    %230 = vector.extract_strided_slice %222 {offsets = [0, 64], sizes = [2, 32], strides = [1, 1]} : vector<2x96xf32> to vector<2x32xf32>
    %231 = math.tanh %229 : vector<2x32xf32>
    %232 = arith.mulf %230, %231 : vector<2x32xf32>
    %cst_44 = arith.constant dense<0.000000e+00> : vector<2x128xf32>
    %233 = tpu.matmul %232, %1, %cst_44 {dimension_numbers = #tpu.dot_dimension_numbers<[1], [0], [0], [1], [0, 0, 1, 1], [], []>, precision = #tpu.contract_precision<fp32>} : vector<2x32xf32>, vector<32x128xf32>, vector<2x128xf32> -> vector<2x128xf32>
    %cst_45 = arith.constant dense<0.000000e+00> : vector<2x128xf32>
    %234 = tpu.matmul %213, %2, %cst_45 {dimension_numbers = #tpu.dot_dimension_numbers<[1], [0], [0], [1], [0, 0, 1, 1], [], []>, precision = #tpu.contract_precision<fp32>} : vector<2x32xf32>, vector<32x128xf32>, vector<2x128xf32> -> vector<2x128xf32>
    %235 = arith.addf %233, %234 : vector<2x128xf32>
    %236 = vector.broadcast %3 : vector<1x128xf32> to vector<2x128xf32>
    %237 = arith.addf %235, %236 : vector<2x128xf32>
    %238 = vector.extract_strided_slice %237 {offsets = [0, 0], sizes = [2, 96], strides = [1, 1]} : vector<2x128xf32> to vector<2x96xf32>
    %239 = arith.negf %238 : vector<2x96xf32>
    %240 = math.exp %239 : vector<2x96xf32>
    %cst_46 = arith.constant 1.000000e+00 : f32
    %241 = vector.broadcast %cst_46 : f32 to vector<2x96xf32>
    %242 = arith.addf %241, %240 : vector<2x96xf32>
    %243 = arith.divf %241, %242 : vector<2x96xf32>
    %244 = vector.extract_strided_slice %237 {offsets = [0, 96], sizes = [2, 32], strides = [1, 1]} : vector<2x128xf32> to vector<2x32xf32>
    %245 = math.tanh %244 : vector<2x32xf32>
    %246 = vector.extract_strided_slice %243 {offsets = [0, 32], sizes = [2, 32], strides = [1, 1]} : vector<2x96xf32> to vector<2x32xf32>
    %247 = arith.mulf %246, %210 : vector<2x32xf32>
    %248 = vector.extract_strided_slice %243 {offsets = [0, 0], sizes = [2, 32], strides = [1, 1]} : vector<2x96xf32> to vector<2x32xf32>
    %249 = arith.mulf %248, %245 : vector<2x32xf32>
    %250 = arith.addf %247, %249 : vector<2x32xf32>
    %251 = vector.extract_strided_slice %243 {offsets = [0, 64], sizes = [2, 32], strides = [1, 1]} : vector<2x96xf32> to vector<2x32xf32>
    %252 = math.tanh %250 : vector<2x32xf32>
    %253 = arith.mulf %251, %252 : vector<2x32xf32>
    %254 = vector.extract_strided_slice %9 {offsets = [12, 0], sizes = [2, 128], strides = [1, 1]} : vector<16x128xf32> to vector<2x128xf32>
    %cst_47 = arith.constant dense<0.000000e+00> : vector<2x128xf32>
    %255 = tpu.matmul %232, %0, %cst_47 {dimension_numbers = #tpu.dot_dimension_numbers<[1], [0], [0], [1], [0, 0, 1, 1], [], []>, precision = #tpu.contract_precision<fp32>} : vector<2x32xf32>, vector<32x128xf32>, vector<2x128xf32> -> vector<2x128xf32>
    %256 = arith.addf %254, %255 : vector<2x128xf32>
    %257 = vector.extract_strided_slice %256 {offsets = [0, 0], sizes = [2, 96], strides = [1, 1]} : vector<2x128xf32> to vector<2x96xf32>
    %258 = arith.negf %257 : vector<2x96xf32>
    %259 = math.exp %258 : vector<2x96xf32>
    %cst_48 = arith.constant 1.000000e+00 : f32
    %260 = vector.broadcast %cst_48 : f32 to vector<2x96xf32>
    %261 = arith.addf %260, %259 : vector<2x96xf32>
    %262 = arith.divf %260, %261 : vector<2x96xf32>
    %263 = vector.extract_strided_slice %256 {offsets = [0, 96], sizes = [2, 32], strides = [1, 1]} : vector<2x128xf32> to vector<2x32xf32>
    %264 = math.tanh %263 : vector<2x32xf32>
    %265 = vector.extract_strided_slice %262 {offsets = [0, 32], sizes = [2, 32], strides = [1, 1]} : vector<2x96xf32> to vector<2x32xf32>
    %266 = arith.mulf %265, %229 : vector<2x32xf32>
    %267 = vector.extract_strided_slice %262 {offsets = [0, 0], sizes = [2, 32], strides = [1, 1]} : vector<2x96xf32> to vector<2x32xf32>
    %268 = arith.mulf %267, %264 : vector<2x32xf32>
    %269 = arith.addf %266, %268 : vector<2x32xf32>
    %270 = vector.extract_strided_slice %262 {offsets = [0, 64], sizes = [2, 32], strides = [1, 1]} : vector<2x96xf32> to vector<2x32xf32>
    %271 = math.tanh %269 : vector<2x32xf32>
    %272 = arith.mulf %270, %271 : vector<2x32xf32>
    %cst_49 = arith.constant dense<0.000000e+00> : vector<2x128xf32>
    %273 = tpu.matmul %272, %1, %cst_49 {dimension_numbers = #tpu.dot_dimension_numbers<[1], [0], [0], [1], [0, 0, 1, 1], [], []>, precision = #tpu.contract_precision<fp32>} : vector<2x32xf32>, vector<32x128xf32>, vector<2x128xf32> -> vector<2x128xf32>
    %cst_50 = arith.constant dense<0.000000e+00> : vector<2x128xf32>
    %274 = tpu.matmul %253, %2, %cst_50 {dimension_numbers = #tpu.dot_dimension_numbers<[1], [0], [0], [1], [0, 0, 1, 1], [], []>, precision = #tpu.contract_precision<fp32>} : vector<2x32xf32>, vector<32x128xf32>, vector<2x128xf32> -> vector<2x128xf32>
    %275 = arith.addf %273, %274 : vector<2x128xf32>
    %276 = vector.broadcast %3 : vector<1x128xf32> to vector<2x128xf32>
    %277 = arith.addf %275, %276 : vector<2x128xf32>
    %278 = vector.extract_strided_slice %277 {offsets = [0, 0], sizes = [2, 96], strides = [1, 1]} : vector<2x128xf32> to vector<2x96xf32>
    %279 = arith.negf %278 : vector<2x96xf32>
    %280 = math.exp %279 : vector<2x96xf32>
    %cst_51 = arith.constant 1.000000e+00 : f32
    %281 = vector.broadcast %cst_51 : f32 to vector<2x96xf32>
    %282 = arith.addf %281, %280 : vector<2x96xf32>
    %283 = arith.divf %281, %282 : vector<2x96xf32>
    %284 = vector.extract_strided_slice %277 {offsets = [0, 96], sizes = [2, 32], strides = [1, 1]} : vector<2x128xf32> to vector<2x32xf32>
    %285 = math.tanh %284 : vector<2x32xf32>
    %286 = vector.extract_strided_slice %283 {offsets = [0, 32], sizes = [2, 32], strides = [1, 1]} : vector<2x96xf32> to vector<2x32xf32>
    %287 = arith.mulf %286, %250 : vector<2x32xf32>
    %288 = vector.extract_strided_slice %283 {offsets = [0, 0], sizes = [2, 32], strides = [1, 1]} : vector<2x96xf32> to vector<2x32xf32>
    %289 = arith.mulf %288, %285 : vector<2x32xf32>
    %290 = arith.addf %287, %289 : vector<2x32xf32>
    %291 = vector.extract_strided_slice %283 {offsets = [0, 64], sizes = [2, 32], strides = [1, 1]} : vector<2x96xf32> to vector<2x32xf32>
    %292 = math.tanh %290 : vector<2x32xf32>
    %293 = arith.mulf %291, %292 : vector<2x32xf32>
    %294 = vector.extract_strided_slice %9 {offsets = [14, 0], sizes = [2, 128], strides = [1, 1]} : vector<16x128xf32> to vector<2x128xf32>
    %cst_52 = arith.constant dense<0.000000e+00> : vector<2x128xf32>
    %295 = tpu.matmul %272, %0, %cst_52 {dimension_numbers = #tpu.dot_dimension_numbers<[1], [0], [0], [1], [0, 0, 1, 1], [], []>, precision = #tpu.contract_precision<fp32>} : vector<2x32xf32>, vector<32x128xf32>, vector<2x128xf32> -> vector<2x128xf32>
    %296 = arith.addf %294, %295 : vector<2x128xf32>
    %297 = vector.extract_strided_slice %296 {offsets = [0, 0], sizes = [2, 96], strides = [1, 1]} : vector<2x128xf32> to vector<2x96xf32>
    %298 = arith.negf %297 : vector<2x96xf32>
    %299 = math.exp %298 : vector<2x96xf32>
    %cst_53 = arith.constant 1.000000e+00 : f32
    %300 = vector.broadcast %cst_53 : f32 to vector<2x96xf32>
    %301 = arith.addf %300, %299 : vector<2x96xf32>
    %302 = arith.divf %300, %301 : vector<2x96xf32>
    %303 = vector.extract_strided_slice %296 {offsets = [0, 96], sizes = [2, 32], strides = [1, 1]} : vector<2x128xf32> to vector<2x32xf32>
    %304 = math.tanh %303 : vector<2x32xf32>
    %305 = vector.extract_strided_slice %302 {offsets = [0, 32], sizes = [2, 32], strides = [1, 1]} : vector<2x96xf32> to vector<2x32xf32>
    %306 = arith.mulf %305, %269 : vector<2x32xf32>
    %307 = vector.extract_strided_slice %302 {offsets = [0, 0], sizes = [2, 32], strides = [1, 1]} : vector<2x96xf32> to vector<2x32xf32>
    %308 = arith.mulf %307, %304 : vector<2x32xf32>
    %309 = arith.addf %306, %308 : vector<2x32xf32>
    %310 = vector.extract_strided_slice %302 {offsets = [0, 64], sizes = [2, 32], strides = [1, 1]} : vector<2x96xf32> to vector<2x32xf32>
    %311 = math.tanh %309 : vector<2x32xf32>
    %312 = arith.mulf %310, %311 : vector<2x32xf32>
    %cst_54 = arith.constant dense<0.000000e+00> : vector<2x128xf32>
    %313 = tpu.matmul %312, %1, %cst_54 {dimension_numbers = #tpu.dot_dimension_numbers<[1], [0], [0], [1], [0, 0, 1, 1], [], []>, precision = #tpu.contract_precision<fp32>} : vector<2x32xf32>, vector<32x128xf32>, vector<2x128xf32> -> vector<2x128xf32>
    %cst_55 = arith.constant dense<0.000000e+00> : vector<2x128xf32>
    %314 = tpu.matmul %293, %2, %cst_55 {dimension_numbers = #tpu.dot_dimension_numbers<[1], [0], [0], [1], [0, 0, 1, 1], [], []>, precision = #tpu.contract_precision<fp32>} : vector<2x32xf32>, vector<32x128xf32>, vector<2x128xf32> -> vector<2x128xf32>
    %315 = arith.addf %313, %314 : vector<2x128xf32>
    %316 = vector.broadcast %3 : vector<1x128xf32> to vector<2x128xf32>
    %317 = arith.addf %315, %316 : vector<2x128xf32>
    %318 = vector.extract_strided_slice %317 {offsets = [0, 0], sizes = [2, 96], strides = [1, 1]} : vector<2x128xf32> to vector<2x96xf32>
    %319 = arith.negf %318 : vector<2x96xf32>
    %320 = math.exp %319 : vector<2x96xf32>
    %cst_56 = arith.constant 1.000000e+00 : f32
    %321 = vector.broadcast %cst_56 : f32 to vector<2x96xf32>
    %322 = arith.addf %321, %320 : vector<2x96xf32>
    %323 = arith.divf %321, %322 : vector<2x96xf32>
    %324 = vector.extract_strided_slice %317 {offsets = [0, 96], sizes = [2, 32], strides = [1, 1]} : vector<2x128xf32> to vector<2x32xf32>
    %325 = math.tanh %324 : vector<2x32xf32>
    %326 = vector.extract_strided_slice %323 {offsets = [0, 32], sizes = [2, 32], strides = [1, 1]} : vector<2x96xf32> to vector<2x32xf32>
    %327 = arith.mulf %326, %290 : vector<2x32xf32>
    %328 = vector.extract_strided_slice %323 {offsets = [0, 0], sizes = [2, 32], strides = [1, 1]} : vector<2x96xf32> to vector<2x32xf32>
    %329 = arith.mulf %328, %325 : vector<2x32xf32>
    %330 = arith.addf %327, %329 : vector<2x32xf32>
    %331 = vector.extract_strided_slice %323 {offsets = [0, 64], sizes = [2, 32], strides = [1, 1]} : vector<2x96xf32> to vector<2x32xf32>
    %332 = math.tanh %330 : vector<2x32xf32>
    %333 = arith.mulf %331, %332 : vector<2x32xf32>
    %c0_57 = arith.constant 0 : index
    %c0_58 = arith.constant 0 : index
    %c0_59 = arith.constant 0 : index
    %334 = vector.load %arg7[%c0_57, %c0_58, %c0_59] : memref<2x2x32xf32, #tpu.memory_space<vmem>>, vector<1x2x32xf32>
    %335 = vector.shape_cast %334 : vector<1x2x32xf32> to vector<2x32xf32>
    %336 = vector.shape_cast %312 : vector<2x32xf32> to vector<1x2x32xf32>
    tpu.vector_store %arg7[%c0_57, %c0_58, %c0_59], %336 {strides = array<i32>} : memref<2x2x32xf32, #tpu.memory_space<vmem>>, vector<1x2x32xf32>,
    %c0_60 = arith.constant 0 : index
    %c0_61 = arith.constant 0 : index
    %c0_62 = arith.constant 0 : index
    %337 = vector.load %arg8[%c0_60, %c0_61, %c0_62] : memref<2x2x32xf32, #tpu.memory_space<vmem>>, vector<1x2x32xf32>
    %338 = vector.shape_cast %337 : vector<1x2x32xf32> to vector<2x32xf32>
    %339 = vector.shape_cast %309 : vector<2x32xf32> to vector<1x2x32xf32>
    tpu.vector_store %arg8[%c0_60, %c0_61, %c0_62], %339 {strides = array<i32>} : memref<2x2x32xf32, #tpu.memory_space<vmem>>, vector<1x2x32xf32>,
    %c1 = arith.constant 1 : index
    %c0_63 = arith.constant 0 : index
    %c0_64 = arith.constant 0 : index
    %340 = vector.load %arg7[%c1, %c0_63, %c0_64] : memref<2x2x32xf32, #tpu.memory_space<vmem>>, vector<1x2x32xf32>
    %341 = vector.shape_cast %340 : vector<1x2x32xf32> to vector<2x32xf32>
    %342 = vector.shape_cast %333 : vector<2x32xf32> to vector<1x2x32xf32>
    tpu.vector_store %arg7[%c1, %c0_63, %c0_64], %342 {strides = array<i32>} : memref<2x2x32xf32, #tpu.memory_space<vmem>>, vector<1x2x32xf32>,
    %c1_65 = arith.constant 1 : index
    %c0_66 = arith.constant 0 : index
    %c0_67 = arith.constant 0 : index
    %343 = vector.load %arg8[%c1_65, %c0_66, %c0_67] : memref<2x2x32xf32, #tpu.memory_space<vmem>>, vector<1x2x32xf32>
    %344 = vector.shape_cast %343 : vector<1x2x32xf32> to vector<2x32xf32>
    %345 = vector.shape_cast %330 : vector<2x32xf32> to vector<1x2x32xf32>
    tpu.vector_store %arg8[%c1_65, %c0_66, %c0_67], %345 {strides = array<i32>} : memref<2x2x32xf32, #tpu.memory_space<vmem>>, vector<1x2x32xf32>,
    return
  }
}

</mosaic_0001>

<bundles_post_ra>
// kernel: lstm_encoder_forward.1
= control target key start
LH: loop header
LB: loop body
LE: loop exit
PB: predicated region body
PF: predicated region fallthrough
CT: control target
= control target key end

     0   :  { %14 = vsyncpa [#allocation3], 0  ;;  %s17740_s0 = inlined_call_operand.vmem [shape: f32[16,4], index: 0, kind: input, shape index: {}]   ;;  %s17741_s1 = inlined_call_operand.vmem [shape: f32[4,128], index: 1, kind: input, shape index: {}]   ;;  %s17742_s2 = inlined_call_operand.vmem [shape: f32[32,128], index: 2, kind: input, shape index: {}]   ;;  %s17743_s3 = inlined_call_operand.vmem [shape: f32[1,128], index: 3, kind: input, shape index: {}]   ;;  %s17744_s4 = inlined_call_operand.hbm [shape: f32[32,128], index: 4, kind: input, shape index: {}]   ;;  %s17745_s5 = inlined_call_operand.hbm [shape: f32[32,128], index: 5, kind: input, shape index: {}]   ;;  %s17746_s6 = inlined_call_operand.vmem [shape: f32[1,128], index: 6, kind: input, shape index: {}]   ;;  %s17747_s7 = inlined_call_operand.hbm [shape: f32[2,2,32], index: 7, kind: output, shape index: {0}]   ;;  %s17748_s8 = inlined_call_operand.hbm [shape: f32[2,2,32], index: 8, kind: output, shape index: {1}]  }
   0x1   :  { %15 = vsyncpa [#allocation6], 0 }
   0x2   :  { %16 = vsyncpa [#allocation4], 0 }
   0x3   :  { %17 = vsyncpa [#allocation9], 0  ;;  %s16353_s27 = smov [#allocation2]   ;;  %s16257_s9 = scalar_lea.hbm %s17744_s4, 512 }
   0x4   :  { %s31_s28 = sshll.u32 %s16353_s27, 4  ;;  %p16258_p0 = scmp.ne.s32.totalorder %s17744_s4, %s16257_s9  ;;  %s32_s28 = int_to_ptr.vmem [resolvable:$true] %s31_s28 }
   0x5   :  { %p16261_p1 = scmp.lt.u32.totalorder %s16257_s9, %s17744_s4 }
   0x7   :  { %p16263_p2 = pnand %p16261_p1, %p16258_p0 }
   0x9   :  { %16266 = shalt.err (!%p16263_p2)
}
   0xa   :  { %s16267_s14 = scalar_lea.vmem %s32_s28, 512  ;;  %p16272_p4 = scmp.lt.s32.totalorder %s32_s28, %s32_s28 }
   0xb   :  { %p16268_p3 = scmp.ne.s32.totalorder %s32_s28, %s16267_s14  ;;  %p16273_p5 = scmp.lt.s32.totalorder %s16267_s14, %s16267_s14 }
   0xd   :  { %p16274_p6 = por %p16273_p5, %p16272_p4 }
   0xf   :  { %p16275_p7 = pnand %p16274_p6, %p16268_p3 }
  0x11   :  { %16278 = shalt.err (!%p16275_p7)
}
  0x12   :  { %s16354_s15 = smov 128   ;;  %s16355_s16 = smov 8  }
  0x13   :  { %37 = dma.hbm_to_vmem [thread:$0]  %s17744_s4, 512, %s32_s28, [#allocation3], %s16354_s15, %s16354_s15, %s16355_s16  }
  0x14   :  { %s16356_s19 = smov [#allocation5]   ;;  %s16279_s23 = scalar_lea.hbm %s17745_s5, 512 }
  0x15   :  { %s43_s20 = sshll.u32 %s16356_s19, 4  ;;  %p16280_p8 = scmp.ne.s32.totalorder %s17745_s5, %s16279_s23  ;;  %s44_s20 = int_to_ptr.vmem [resolvable:$true] %s43_s20 }
  0x16   :  { %p16283_p9 = scmp.lt.u32.totalorder %s16279_s23, %s17745_s5 }
  0x18   :  { %p16285_p10 = pnand %p16283_p9, %p16280_p8 }
  0x1a   :  { %16288 = shalt.err (!%p16285_p10)
}
  0x1b   :  { %s16289_s29 = scalar_lea.vmem %s44_s20, 512  ;;  %p16294_p12 = scmp.lt.s32.totalorder %s44_s20, %s44_s20 }
  0x1c   :  { %p16290_p11 = scmp.ne.s32.totalorder %s44_s20, %s16289_s29  ;;  %p16295_p13 = scmp.lt.s32.totalorder %s16289_s29, %s16289_s29 }
  0x1e   :  { %p16296_p0 = por %p16295_p13, %p16294_p12 }
  0x20   :  { %p16297_p1 = pnand %p16296_p0, %p16290_p11 }
  0x22   :  { %16300 = shalt.err (!%p16297_p1)
}
  0x23   :  { %49 = dma.hbm_to_vmem [thread:$0]  %s17745_s5, 512, %s44_s20, [#allocation6], %s16354_s15, %s16354_s15, %s16355_s16  }
  0x24   :  { %16345 = dma.done.wait [#allocation3], 512  }
  0x25   :  { %16346 = vsyncadd [#allocation3], 4294966784 }
  0x26   :  { %16347 = dma.done.wait [#allocation6], 512  }
  0x27   :  { %16348 = vsyncadd [#allocation6], 4294966784  ;;  %vm88_vm0 = vcmask 1043456   ;;  %vm81_vm1 = vcmask 31744   ;;  %v73_v0 = vld [vmem:[%s17741_s1] sm:$0xf] }
  0x28   :  { %v71_v1 = vld [vmem:[%s17740_s0] sm:$0xff]  ;;  %v72_v2 = vld [vmem:[%s17740_s0 + $0x8] sm:$0xff]  ;;  %v90_v3 = vsel %vm88_vm0, %v73_v0, 0  ;;  %v60_v8 = vld [vmem:[%s17742_s2 + $0x10] sm:$0xff]  ;;  %v16357_v24 = vmov 0.0|0.0   ;;  %vm16358_vm2 = vmmov 0  }
  0x29   :  { %v83_v4 = vsel %vm81_vm1, %v71_v1, 0  ;;  %v86_v5 = vsel %vm81_vm1, %v72_v2, 0  ;;  %v58_v6 = vld [vmem:[%s17742_s2] sm:$0xff]  ;;  %v59_v7 = vld [vmem:[%s17742_s2 + $0x8] sm:$0xff]  ;;  %v16453_v9 = vand.u32 4294901760, %v90_v3  ;;  %v61_v13 = vld [vmem:[%s17742_s2 + $0x18] sm:$0xff] }
  0x2a   :  { %v16455_v10 = vand.u32 4294901760, %v83_v4  ;;  %v16457_v11 = vand.u32 4294901760, %v86_v5  ;;  %v586_v12 = vand.u32 4294901760, %v58_v6  ;;  %v589_v14 = vand.u32 4294901760, %v59_v7  ;;  %v12808_v55 = vld [vmem:[%s17743_s3] ss:$0 sm:$0xff] }
  0x2b   :  { %v592_v15 = vand.u32 4294901760, %v60_v8  ;;  %v595_v16 = vand.u32 4294901760, %v61_v13  ;;  %13564 = vmatprep.subr.mxu1 %v16453_v9  ;;  %v180_v17 = vsub.f32 %v90_v3, %v16453_v9  ;;  %v16359_v46 = vmov 0.0   ;;  %s16360_s3 = smov 32   ;;  %s16361_s20 = smov 64  }
  0x2c   :  { %13571 = vmatprep.mubr.f32.mxu0 %v16455_v10  ;;  %v159_v18 = vsub.f32 %v83_v4, %v16455_v10  ;;  %v169_v19 = vsub.f32 %v86_v5, %v16457_v11  ;;  %13565 = vmatpush3.msra.mxu1 %v16453_v9  ;;  %v16468_v20 = vsub.f32 %v58_v6, %v586_v12  ;;  %vm581_vm3 = vcmask 261120   ;;  %s16363_s27 = smov [#allocation8]  }
  0x2d   :  { %v16470_v21 = vsub.f32 %v59_v7, %v589_v14  ;;  %v181_v22 = vand.u32 4294901760, %v180_v17  ;;  %15178 = vmatprep.subr.bf16.mxu1 %v16357_v24  ;;  %v16475_v28 = vsub.f32 %v60_v8, %v592_v15  ;;  %v16477_v29 = vsub.f32 %v61_v13, %v595_v16  ;;  %s12791_s29 = sshll.u32 %s16363_s27, 4  ;;  %s12792_s29 = int_to_ptr.vmem [resolvable:$true] %s12791_s29 }
  0x2e   :  { %v160_v23 = vand.u32 4294901760, %v159_v18  ;;  %v170_v25 = vand.u32 4294901760, %v169_v19  ;;  %v667_v26 = vand.u32 4294901760, %v16468_v20  ;;  %v16479_v36 = vpack.c.bf16 %v589_v14, %v586_v12  ;;  %s16301_s4 = scalar_lea.vmem %s12792_s29, 64  ;;  %p16306_p3 = scmp.lt.s32.totalorder %s12792_s29, %s12792_s29 }
  0x2f   :  { %v674_v27 = vand.u32 4294901760, %v16470_v21  ;;  %v182_v30 = vsub.f32 %v180_v17, %v181_v22  ;;  %v681_v39 = vand.u32 4294901760, %v16475_v28  ;;  %v688_v40 = vand.u32 4294901760, %v16477_v29  ;;  %p16302_p2 = scmp.ne.s32.totalorder %s12792_s29, %s16301_s4  ;;  %p16307_p4 = scmp.lt.s32.totalorder %s16301_s4, %s16301_s4 }
  0x30   :  { %v161_v31 = vsub.f32 %v159_v18, %v160_v23  ;;  %v171_v32 = vsub.f32 %v169_v19, %v170_v25  ;;  %v668_v37 = vsub.f32 %v16468_v20, %v667_v26  ;;  %v16486_v41 = vpack.c.bf16 %v595_v16, %v592_v15 }
  0x31   :  { %v183_v33 = vand.u32 4294901760, %v182_v30  ;;  %v675_v38 = vsub.f32 %v16470_v21, %v674_v27  ;;  %v682_v44 = vsub.f32 %v16475_v28, %v681_v39  ;;  %v689_v45 = vsub.f32 %v16477_v29, %v688_v40  ;;  %v67_v30 = vld [vmem:[#allocation5 + $0x8] sm:$0xff]  ;;  %p16308_p5 = por %p16307_p4, %p16306_p3 }
  0x32   :  { %v162_v34 = vand.u32 4294901760, %v161_v31  ;;  %v172_v35 = vand.u32 4294901760, %v171_v32  ;;  %v669_v42 = vand.u32 4294901760, %v668_v37  ;;  %v16510_v51 = vpack.c.bf16 %v16470_v21, %v16468_v20  ;;  %v68_v31 = vld [vmem:[#allocation5 + $0x10] sm:$0xff] }
  0x33   :  { %13569 = vmatprep.subr.mxu0 %v183_v33  ;;  %v676_v43 = vand.u32 4294901760, %v675_v38  ;;  %v683_v48 = vand.u32 4294901760, %v682_v44  ;;  %v690_v49 = vand.u32 4294901760, %v689_v45  ;;  %v16517_v52 = vpack.c.bf16 %v16477_v29, %v16475_v28  ;;  %v66_v29 = vld [vmem:[#allocation5] sm:$0xff]  ;;  %p16309_p6 = pnand %p16308_p5, %p16302_p2 }
  0x34   :  { %13566 = vmatprep.mubr.f32.mxu1 %v162_v34  ;;  %13570 = vmatpush3.msra.mxu0 %v183_v33  ;;  %v16526_v53 = vpack.c.bf16 %v674_v27, %v667_v26  ;;  %v16534_v54 = vpack.c.bf16 %v688_v40, %v681_v39  ;;  %v1096_v32 = vand.u32 4294901760, %v66_v29  ;;  %v1099_v33 = vand.u32 4294901760, %v67_v30  ;;  %v69_v34 = vld [vmem:[#allocation5 + $0x18] sm:$0xff] }
  0x35   :  { %13567 = vmatmul.mubr.f32.vlgmr.msra.gmra.mrb[0].mxu1 %v172_v35  ;;  %13572 = vmatmul.mubr.f32.vlgmr.msra.gmra.mrb[0].mxu0 %v16457_v11  ;;  %v16496_v47 = vpack.c.bf16 %v676_v43, %v669_v42  ;;  %v16502_v50 = vpack.c.bf16 %v690_v49, %v683_v48  ;;  %v1102_v35 = vand.u32 4294901760, %v68_v31  ;;  %v1105_v37 = vand.u32 4294901760, %v69_v34 }
  0x36   :  { %13574 = vmatprep.subr.mxu0 %v180_v17  ;;  %15180 = vmatpush3.bf16.msra.mxu1 %v16479_v36  ;;  %v16578_v38 = vpack.c.bf16 %v1099_v33, %v1096_v32  ;;  %v1176_v39 = vsub.f32 %v66_v29, %v1096_v32  ;;  %v1183_v40 = vsub.f32 %v67_v30, %v1099_v33  ;;  %vm12754_vm4 = vcmask 261126  }
  0x37   :  { %13575 = vmatpush3.msra.mxu0 %v180_v17  ;;  %15181 = vmatprep.subr.bf16.mxu1 %v16357_v24  ;;  %v1190_v42 = vsub.f32 %v68_v31, %v1102_v35  ;;  %v1197_v43 = vsub.f32 %v69_v34, %v1105_v37  ;;  %v16581_v48 = vpack.c.bf16 %v1105_v37, %v1102_v35  ;;  %vm12766_vm5 = vcmask 254976  }
  0x38   :  { %13576 = vmatprep.mubr.f32.mxu0 %v159_v18  ;;  %13579 = vmatprep.subr.mxu0 %v16453_v9  ;;  %v1177_v44 = vand.u32 4294901760, %v1176_v39  ;;  %v1184_v45 = vand.u32 4294901760, %v1183_v40 }
  0x39   :  { %13602 = vmatprep.mubr.msk.f32.mxu1 %vm16358_vm2, %v16359_v46  ;;  %v1191_v49 = vand.u32 4294901760, %v1190_v42 }
  0x3a   :  { %15183 = vmatpush3.bf16.msra.mxu1 %v16486_v41 }
  0x3b   :  { %15184 = vmatprep.subr.bf16.mxu1 %v16357_v24 }
  0x3d   :  { %13577 = vmatmul.mubr.f32.vlgmr.msra.gmra.mrb[0].mxu0 %v169_v19  ;;  %13603 = vmatmul.mubr.f32.vlgmr.msra.gmra.mrb[2].mxu1 %v16359_v46 }
  0x3e   :  { %13580 = vmatpush3.msra.mxu0 %v16453_v9  ;;  %15186 = vmatpush3.bf16.msra.mxu1 %v16496_v47 }
  0x3f   :  { %15187 = vmatprep.subr.bf16.mxu1 %v16357_v24  ;;  %13581 = vmatprep.mubr.f32.mxu0 %v160_v23 }
  0x40   :  { %13584 = vmatprep.subr.mxu0 %v181_v22  ;;  %13613 = vmatprep.mubr.msk.f32.mxu1 %vm16358_vm2, %v16359_v46 }
  0x42   :  { %15189 = vmatpush3.bf16.msra.mxu1 %v16502_v50 }
  0x43   :  { %15190 = vmatprep.subr.bf16.mxu1 %v16357_v24 }
  0x45   :  { %13582 = vmatmul.mubr.f32.vlgmr.msra.gmra.mrb[0].mxu0 %v170_v25  ;;  %13614 = vmatmul.mubr.f32.vlgmr.msra.gmra.mrb[4].mxu1 %v16359_v46 }
  0x46   :  { %13585 = vmatpush3.msra.mxu0 %v181_v22  ;;  %15192 = vmatpush3.bf16.msra.mxu1 %v16510_v51 }
  0x47   :  { %15193 = vmatprep.subr.bf16.mxu1 %v16357_v24  ;;  %13586 = vmatprep.mubr.f32.mxu0 %v16455_v10 }
  0x48   :  { %13624 = vmatprep.mubr.msk.f32.mxu1 %vm16358_vm2, %v16359_v46  ;;  %13589 = vmatprep.subr.mxu0 %v16453_v9 }
  0x4a   :  { %15195 = vmatpush3.bf16.msra.mxu1 %v16517_v52 }
  0x4b   :  { %15202 = vmatprep.subr.bf16.mxu1 %v16357_v24 }
  0x4d   :  { %13587 = vmatmul.mubr.f32.vlgmr.msra.gmra.mrb[0].mxu0 %v16457_v11  ;;  %13625 = vmatmul.mubr.f32.vlgmr.msra.gmra.mrb[6].mxu1 %v16359_v46 }
  0x4e   :  { %13590 = vmatpush3.msra.mxu0 %v16453_v9  ;;  %13591 = vmatprep.mubr.f32.mxu0 %v16455_v10 }
  0x4f   :  { %15196 = vmatprep.subr.bf16.mxu0 %v16357_v24  ;;  %15204 = vmatpush3.bf16.msra.mxu1 %v16526_v53 }
  0x50   :  { %15205 = vmatprep.subr.bf16.mxu1 %v16357_v24  ;;  %13646 = vmatprep.mubr.msk.f32.mxu1 %vm16358_vm2, %v16359_v46 }
  0x53   :  { %15207 = vmatpush3.bf16.msra.mxu1 %v16534_v54 }
  0x54   :  { %15214 = vmatprep.subr.bf16.mxu1 %v16357_v24 }
  0x55   :  { %13592 = vmatmul.mubr.f32.vlgmr.msra.gmra.mrb[0].mxu0 %v16457_v11 }
  0x56   :  { %15198 = vmatpush3.bf16.msra.mxu0 %v16479_v36  ;;  %13635 = vmatprep.mubr.msk.f32.mxu0 %vm16358_vm2, %v16359_v46 }
  0x57   :  { %15199 = vmatprep.subr.bf16.mxu0 %v16357_v24  ;;  %13647 = vmatmul.mubr.f32.vlgmr.msra.gmra.mrb[8].mxu1 %v16359_v46 }
  0x58   :  { %13668 = vmatprep.mubr.msk.f32.mxu1 %vm16358_vm2, %v16359_v46  ;;  %15216 = vmatpush3.bf16.msra.mxu1 %v16578_v38 }
  0x59   :  { %15217 = vmatprep.subr.bf16.mxu1 %v16357_v24 }
  0x5a   :  { %15201 = vmatpush3.bf16.msra.mxu0 %v16486_v41 }
  0x5b   :  { %15208 = vmatprep.subr.bf16.mxu0 %v16357_v24 }
  0x5c   :  { %15219 = vmatpush3.bf16.msra.mxu1 %v16581_v48 }
  0x5d   :  { %13636 = vmatmul.mubr.f32.vlgmr.msra.gmra.mrb[2].mxu0 %v16359_v46  ;;  %15226 = vmatprep.subr.bf16.mxu1 %v16357_v24 }
  0x5e   :  { %15210 = vmatpush3.bf16.msra.mxu0 %v16479_v36  ;;  %13657 = vmatprep.mubr.msk.f32.mxu0 %vm16358_vm2, %v16359_v46 }
  0x5f   :  { %15211 = vmatprep.subr.bf16.mxu0 %v16357_v24  ;;  %13669 = vmatmul.mubr.f32.vlgmr.msra.gmra.mrb[10].mxu1 %v16359_v46 }
  0x60   :  { %13690 = vmatprep.mubr.msk.f32.mxu1 %vm16358_vm2, %v16359_v46 }
  0x62   :  { %15213 = vmatpush3.bf16.msra.mxu0 %v16486_v41 }
  0x63   :  { %15220 = vmatprep.subr.bf16.mxu0 %v16357_v24 }
  0x65   :  { %13658 = vmatmul.mubr.f32.vlgmr.msra.gmra.mrb[4].mxu0 %v16359_v46 }
  0x66   :  { %13679 = vmatprep.mubr.msk.f32.mxu0 %vm16358_vm2, %v16359_v46 }
 0x108   :  { %v13568_v56 = vpop.f32.mrb[0].mxu1 }
 0x109   :  { %v175_v57 = vadd.f32 %v13568_v56, %v12808_v55  ;;  %v164_v58 = vpop.f32.mrb[1].mxu1  ;;  %v1178_v56 = vsub.f32 %v1176_v39, %v1177_v44 }
 0x10a   :  { %v165_v3 = vadd.f32 %v12808_v55, %v164_v58  ;;  %v1198_v55 = vand.u32 4294901760, %v1197_v43  ;;  %v1192_v58 = vsub.f32 %v1190_v42, %v1191_v49 }
 0x110   :  { %v660_v59 = vpop.f32.mrb[2].mxu1 }
 0x111   :  { %v13604_v60 = vpop.f32.mrb[3].mxu1 }
 0x112   :  { %v1179_v60 = vand.u32 4294901760, %v1178_v56 }
 0x118   :  { %v751_v61 = vpop.f32.mrb[4].mxu1 }
 0x119   :  { %v752_v62 = vadd.f32 %v751_v61, %v660_v59  ;;  %v13615_v63 = vpop.f32.mrb[5].mxu1  ;;  %v1199_v59 = vsub.f32 %v1197_v43, %v1198_v55 }
 0x11a   :  { %v16585_v63 = vpack.c.bf16 %v1183_v40, %v1176_v39 }
 0x11c   :  { %15228 = vmatpush3.bf16.msra.mxu1 %v16585_v63 }
 0x11d   :  { %15229 = vmatprep.subr.bf16.mxu1 %v16357_v24 }
 0x120   :  { %v831_v0 = vpop.f32.mrb[6].mxu1 }
 0x121   :  { %v832_v1 = vadd.f32 %v831_v0, %v752_v62  ;;  %v13626_v2 = vpop.f32.mrb[7].mxu1  ;;  %v1193_v62 = vand.u32 4294901760, %v1192_v58 }
 0x122   :  { %v62_v2 = vld [vmem:[#allocation2] sm:$0xff] }
 0x128   :  { %v13593_v4 = vpop.f32.mrb[0].mxu0 }
 0x129   :  { %v16564_v5 = vadd.f32 %v13593_v4, %v175_v57  ;;  %v571_v6 = vpop.f32.mrb[1].mxu0  ;;  %v1185_v57 = vsub.f32 %v1183_v40, %v1184_v45 }
 0x12a   :  { %v16566_v7 = vadd.f32 %v571_v6, %v165_v3  ;;  %v991_v8 = vpop.f32.mrb[8].mxu1  ;;  %v63_v3 = vld [vmem:[#allocation2 + $0x8] sm:$0xff] }
 0x12b   :  { %v13648_v9 = vpop.f32.mrb[9].mxu1  ;;  %v1186_v61 = vand.u32 4294901760, %v1185_v57 }
 0x12c   :  { %v1586_v9 = vand.u32 4294901760, %v62_v2 }
 0x12d   :  { %v16589_v4 = vpack.c.bf16 %v1186_v61, %v1179_v60 }
 0x12f   :  { %15222 = vmatpush3.bf16.msra.mxu0 %v16589_v4 }
 0x130   :  { %v908_v10 = vpop.f32.mrb[2].mxu0  ;;  %15223 = vmatprep.subr.bf16.mxu0 %v16357_v24 }
 0x131   :  { %v909_v11 = vadd.f32 %v908_v10, %v832_v1  ;;  %v13637_v12 = vpop.f32.mrb[3].mxu0  ;;  %v1200_v1 = vand.u32 4294901760, %v1199_v59  ;;  %v1589_v10 = vand.u32 4294901760, %v63_v3 }
 0x132   :  { %v65_v12 = vld [vmem:[#allocation2 + $0x18] sm:$0xff] }
 0x133   :  { %v992_v13 = vadd.f32 %v991_v8, %v909_v11  ;;  %v16593_v6 = vpack.c.bf16 %v1200_v1, %v1193_v62  ;;  %v16596_v8 = vpack.c.bf16 %v1197_v43, %v1190_v42  ;;  %v64_v11 = vld [vmem:[#allocation2 + $0x10] sm:$0xff]  ;;  %v16641_v30 = vpack.c.bf16 %v1589_v10, %v1586_v9 }
 0x135   :  { %15225 = vmatpush3.bf16.msra.mxu0 %v16593_v6  ;;  %15231 = vmatpush3.bf16.msra.mxu1 %v16596_v8 }
 0x136   :  { %15232 = vmatprep.subr.bf16.mxu0 %v16357_v24  ;;  %15238 = vmatprep.subr.bf16.mxu1 %v16357_v24 }
 0x138   :  { %v1066_v14 = vpop.f32.mrb[4].mxu0  ;;  %13680 = vmatmul.mubr.f32.vlgmr.msra.gmra.mrb[6].mxu0 %v16359_v46  ;;  %13691 = vmatmul.mubr.f32.vlgmr.msra.gmra.mrb[12].mxu1 %v16359_v46 }
 0x139   :  { %v1067_v15 = vadd.f32 %v1066_v14, %v992_v13  ;;  %v13659_v16 = vpop.f32.mrb[5].mxu0  ;;  %v16604_v13 = vsub.f32 %v62_v2, %v1586_v9  ;;  %v16606_v14 = vsub.f32 %v63_v3, %v1589_v10  ;;  %15234 = vmatpush3.bf16.msra.mxu0 %v16578_v38  ;;  %13701 = vmatprep.mubr.msk.f32.mxu0 %vm16358_vm2, %v16359_v46 }
 0x13a   :  { %v1595_v16 = vand.u32 4294901760, %v65_v12  ;;  %15235 = vmatprep.subr.bf16.mxu0 %v16357_v24  ;;  %13712 = vmatprep.mubr.msk.f32.mxu1 %vm16358_vm2, %v16359_v46 }
 0x13b   :  { %v1070_v17 = vadd.f32 %v16566_v7, %v1067_v15  ;;  %v1592_v15 = vand.u32 4294901760, %v64_v11 }
 0x13d   :  { %16127 = vtanh.f32 %v1070_v17  ;;  %v12809_v19 = vmul.f32 -1.442695, %v1070_v17  ;;  %v16610_v17 = vpack.c.bf16 %v1184_v45, %v1177_v44  ;;  %15237 = vmatpush3.bf16.msra.mxu0 %v16581_v48  ;;  %v16656_v35 = vpack.c.bf16 %v1595_v16, %v1592_v15  ;;  %v1170_v45 = vpop.f32.mrb[10].mxu1 }
 0x13e   :  { %15244 = vmatprep.subr.bf16.mxu0 %v16357_v24 }
 0x13f   :  { %16129 = vpow2.f32 %v12809_v19  ;;  %v1674_v19 = vand.u32 4294901760, %v16606_v14  ;;  %15240 = vmatpush3.bf16.msra.mxu1 %v16610_v17 }
 0x140   :  { %15241 = vmatprep.subr.bf16.mxu1 %v16357_v24  ;;  %13702 = vmatmul.mubr.f32.vlgmr.msra.gmra.mrb[8].mxu0 %v16359_v46 }
 0x141   :  { %15246 = vmatpush3.bf16.msra.mxu0 %v16578_v38  ;;  %13723 = vmatprep.mubr.msk.f32.mxu0 %vm16358_vm2, %v16359_v46 }
 0x142   :  { %15247 = vmatprep.subr.bf16.mxu0 %v16357_v24 }
 0x145   :  { %15249 = vmatpush3.bf16.msra.mxu0 %v16581_v48 }
 0x146   :  { %15256 = vmatprep.subr.bf16.mxu0 %v16357_v24 }
 0x147   :  { %v16128_v18 = vpop.eup %16127 }
 0x148   :  { %1080 = vrot.lane.b32.xlu0 %v16128_v18, %s16360_s3  ;;  %v1667_v18 = vand.u32 4294901760, %v16604_v13  ;;  %13724 = vmatmul.mubr.f32.vlgmr.msra.gmra.mrb[10].mxu0 %v16359_v46 }
 0x149   :  { %v16130_v20 = vpop.eup %16129  ;;  %13745 = vmatprep.mubr.msk.f32.mxu0 %vm16358_vm2, %v16359_v46 }
 0x14a   :  { %v1074_v21 = vadd.f32 1.0, %v16130_v20  ;;  %v16619_v20 = vsub.f32 %v64_v11, %v1592_v15 }
 0x14c   :  { %16131 = vrcp.f32 %v1074_v21  ;;  %v16621_v21 = vsub.f32 %v65_v12, %v1595_v16 }
 0x14e   :  { %v1688_v29 = vand.u32 4294901760, %v16621_v21 }
 0x150   :  { %v1689_v34 = vsub.f32 %v16621_v21, %v1688_v29 }
 0x152   :  { %v1690_v40 = vand.u32 4294901760, %v1689_v34  ;;  %v16714_v34 = vpack.c.bf16 %v1674_v19, %v1667_v18 }
 0x156   :  { %v16570_v22 = vpop.eup %16131 }
 0x157   :  { %v1078_v26 = vmul.f32 0.0, %v16570_v22 }
 0x1ba   :  { %v1081_v23 = vpop.permute.xlu0 %1080 }
 0x1bb   :  { %v1083_v25 = vmul.f32 %v16570_v22, %v1081_v23  ;;  %v16625_v23 = vpack.c.bf16 %v1198_v55, %v1191_v49  ;;  %v13670_v49 = vpop.f32.mrb[11].mxu1 }
 0x1bd   :  { %1085 = vrot.lane.b32.xlu0 %v1083_v25, %s16360_s3  ;;  %v1668_v25 = vsub.f32 %v16604_v13, %v1667_v18  ;;  %15243 = vmatpush3.bf16.msra.mxu1 %v16625_v23 }
 0x1be   :  { %15250 = vmatprep.subr.bf16.mxu1 %v16357_v24 }
 0x1bf   :  { %v1669_v31 = vand.u32 4294901760, %v1668_v25 }
 0x1c0   :  { %13713 = vmatmul.mubr.f32.vlgmr.msra.gmra.mrb[14].mxu1 %v16359_v46 }
 0x1c1   :  { %15252 = vmatpush3.bf16.msra.mxu1 %v16641_v30  ;;  %13734 = vmatprep.mubr.msk.f32.mxu1 %vm16358_vm2, %v16359_v46 }
 0x1c2   :  { %15253 = vmatprep.subr.bf16.mxu1 %v16357_v24 }
 0x1c5   :  { %15255 = vmatpush3.bf16.msra.mxu1 %v16656_v35 }
 0x1c6   :  { %15262 = vmatprep.subr.bf16.mxu1 %v16357_v24 }
 0x20b   :  { %v1261_v55 = vpop.f32.mrb[6].mxu0  ;;  %v1341_v56 = vpop.f32.mrb[12].mxu1 }
 0x20c   :  { %v1262_v57 = vadd.f32 %v1261_v55, %v1170_v45  ;;  %v13681_v58 = vpop.f32.mrb[7].mxu0  ;;  %v13692_v59 = vpop.f32.mrb[13].mxu1 }
 0x20d   :  { %v16787_v59 = vld [vmem:[%s17746_s6] ss:$0 sm:$0xff] }
 0x20e   :  { %v1342_v60 = vadd.f32 %v1341_v56, %v1262_v57 }
 0x213   :  { %v1418_v61 = vpop.f32.mrb[8].mxu0 }
 0x214   :  { %v1419_v62 = vadd.f32 %v1418_v61, %v1342_v60  ;;  %v13703_v1 = vpop.f32.mrb[9].mxu0 }
 0x21b   :  { %v1576_v12 = vpop.f32.mrb[10].mxu0 }
 0x21c   :  { %v13725_v25 = vpop.f32.mrb[11].mxu0 }
 0x22f   :  { %v1086_v27 = vpop.permute.xlu0 %1085 }
 0x230   :  { %v16575_v28 = vadd.f32 %v1086_v27, %v1078_v26  ;;  %v1675_v26 = vsub.f32 %v16606_v14, %v1674_v19  ;;  %v1681_v27 = vand.u32 4294901760, %v16619_v20 }
 0x232   :  { %16133 = vtanh.f32 %v16575_v28  ;;  %v1676_v32 = vand.u32 4294901760, %v1675_v26  ;;  %v1682_v33 = vsub.f32 %v16619_v20, %v1681_v27 }
 0x234   :  { %v16663_v37 = vpack.c.bf16 %v1676_v32, %v1669_v31  ;;  %v1683_v39 = vand.u32 4294901760, %v1682_v33  ;;  %v16693_v31 = vpack.c.bf16 %v16606_v14, %v16604_v13  ;;  %v16700_v33 = vpack.c.bf16 %v16621_v21, %v16619_v20 }
 0x236   :  { %15258 = vmatpush3.bf16.msra.mxu0 %v16663_v37  ;;  %v16670_v42 = vpack.c.bf16 %v1690_v40, %v1683_v39  ;;  %v16724_v39 = vpack.c.bf16 %v1688_v29, %v1681_v27 }
 0x237   :  { %15259 = vmatprep.subr.bf16.mxu0 %v16357_v24 }
 0x23a   :  { %15261 = vmatpush3.bf16.msra.mxu0 %v16670_v42 }
 0x23b   :  { %15268 = vmatprep.subr.bf16.mxu0 %v16357_v24 }
 0x23c   :  { %v16134_v0 = vpop.eup %16133 }
 0x23d   :  { %1091 = vrot.lane.b32.xlu1 %v16134_v0, %s16360_s3 }
 0x293   :  { %v1501_v0 = vpop.f32.mrb[14].mxu1 }
 0x294   :  { %v13714_v2 = vpop.f32.mrb[15].mxu1  ;;  %v1502_v9 = vadd.f32 %v1501_v0, %v1419_v62 }
 0x296   :  { %v16688_v16 = vadd.f32 %v1576_v12, %v1502_v9 }
 0x2af   :  { %v1092_v43 = vpop.permute.xlu1 %1091 }
 0x2b0   :  { %v1094_v44 = vmul.f32 %v16570_v22, %v1092_v43 }
 0x2b2   :  { %1581 = vrot.lane.b32.xlu1 %v1094_v44, %s16361_s20 }
 0x324   :  { %v1582_v3 = vpop.permute.xlu1 %1581 }
 0x325   :  { %v1583_v22 = vsel %vm581_vm3, %v1582_v3, 0 }
 0x326   :  { %v16680_v10 = vand.u32 4294901760, %v1583_v22 }
 0x328   :  { %v1655_v11 = vsub.f32 %v1583_v22, %v16680_v10  ;;  %13746 = vmatmul.mubr.f32.vlgmr.msra.gmra.mrb[12].mxu0 %v16680_v10 }
 0x329   :  { %15270 = vmatpush3.bf16.msra.mxu0 %v16641_v30  ;;  %13767 = vmatprep.mubr.msk.f32.mxu0 %vm16358_vm2, %v16359_v46 }
 0x32a   :  { %15271 = vmatprep.subr.bf16.mxu0 %v16357_v24  ;;  %v1656_v15 = vand.u32 4294901760, %v1655_v11 }
 0x32c   :  { %v1657_v26 = vsub.f32 %v1655_v11, %v1656_v15 }
 0x32d   :  { %15273 = vmatpush3.bf16.msra.mxu0 %v16656_v35 }
 0x32e   :  { %15280 = vmatprep.subr.bf16.mxu0 %v16357_v24  ;;  %v1658_v32 = vand.u32 4294901760, %v1657_v26 }
 0x330   :  { %13768 = vmatmul.mubr.f32.vlgmr.msra.gmra.mrb[14].mxu0 %v1656_v15  ;;  %13735 = vmatmul.mubr.f32.vlgmr.msra.gmra.mrb[16].mxu1 %v1658_v32 }
 0x331   :  { %15264 = vmatpush3.bf16.msra.mxu1 %v16693_v31  ;;  %15282 = vmatpush3.bf16.msra.mxu0 %v16641_v30 }
 0x332   :  { %15265 = vmatprep.subr.bf16.mxu1 %v16357_v24  ;;  %15283 = vmatprep.subr.bf16.mxu0 %v16357_v24 }
 0x333   :  { %13756 = vmatprep.mubr.msk.f32.mxu1 %vm16358_vm2, %v16359_v46  ;;  %13789 = vmatprep.mubr.msk.f32.mxu0 %vm16358_vm2, %v16359_v46 }
 0x335   :  { %15267 = vmatpush3.bf16.msra.mxu1 %v16700_v33  ;;  %15285 = vmatpush3.bf16.msra.mxu0 %v16656_v35 }
 0x336   :  { %15274 = vmatprep.subr.bf16.mxu1 %v16357_v24  ;;  %15322 = vmatprep.subr.bf16.mxu0 %v16357_v24 }
 0x338   :  { %13757 = vmatmul.mubr.f32.vlgmr.msra.gmra.mrb[18].mxu1 %v1655_v11  ;;  %13790 = vmatmul.mubr.f32.vlgmr.msra.gmra.mrb[16].mxu0 %v16680_v10 }
 0x339   :  { %15276 = vmatpush3.bf16.msra.mxu1 %v16714_v34  ;;  %13778 = vmatprep.mubr.msk.f32.mxu1 %vm16358_vm2, %v16359_v46 }
 0x33a   :  { %15277 = vmatprep.subr.bf16.mxu1 %v16357_v24  ;;  %15324 = vmatpush3.bf16.msra.mxu0 %v16578_v38 }
 0x33b   :  { %15325 = vmatprep.subr.bf16.mxu0 %v16357_v24  ;;  %13866 = vmatprep.mubr.msk.f32.mxu0 %vm16358_vm2, %v16359_v46 }
 0x33d   :  { %15279 = vmatpush3.bf16.msra.mxu1 %v16724_v39 }
 0x33e   :  { %15286 = vmatprep.subr.bf16.mxu1 %v16357_v24  ;;  %15327 = vmatpush3.bf16.msra.mxu0 %v16581_v48 }
 0x33f   :  { %15328 = vmatprep.subr.bf16.mxu0 %v16357_v24 }
 0x340   :  { %13779 = vmatmul.mubr.f32.vlgmr.msra.gmra.mrb[20].mxu1 %v16680_v10 }
 0x341   :  { %15288 = vmatpush3.bf16.msra.mxu1 %v16479_v36  ;;  %13800 = vmatprep.mubr.msk.f32.mxu1 %vm16358_vm2, %v16359_v46 }
 0x342   :  { %15289 = vmatprep.subr.bf16.mxu1 %v16357_v24 }
 0x345   :  { %15291 = vmatpush3.bf16.msra.mxu1 %v16486_v41 }
 0x346   :  { %15292 = vmatprep.subr.bf16.mxu1 %v16357_v24 }
 0x348   :  { %13801 = vmatmul.mubr.f32.vlgmr.msra.gmra.mrb[22].mxu1 %v1658_v32 }
 0x349   :  { %15294 = vmatpush3.bf16.msra.mxu1 %v16496_v47  ;;  %13811 = vmatprep.mubr.msk.f32.mxu1 %vm16358_vm2, %v16359_v46 }
 0x34a   :  { %15295 = vmatprep.subr.bf16.mxu1 %v16357_v24 }
 0x34d   :  { %15297 = vmatpush3.bf16.msra.mxu1 %v16502_v50 }
 0x34e   :  { %15298 = vmatprep.subr.bf16.mxu1 %v16357_v24 }
 0x350   :  { %13812 = vmatmul.mubr.f32.vlgmr.msra.gmra.mrb[22].mxu1 %v16680_v10 }
 0x351   :  { %15300 = vmatpush3.bf16.msra.mxu1 %v16510_v51  ;;  %13822 = vmatprep.mubr.msk.f32.mxu1 %vm16358_vm2, %v16359_v46 }
 0x352   :  { %15301 = vmatprep.subr.bf16.mxu1 %v16357_v24 }
 0x355   :  { %15303 = vmatpush3.bf16.msra.mxu1 %v16517_v52 }
 0x356   :  { %15304 = vmatprep.subr.bf16.mxu1 %v16357_v24 }
 0x358   :  { %13823 = vmatmul.mubr.f32.vlgmr.msra.gmra.mrb[22].mxu1 %v1655_v11 }
 0x359   :  { %15306 = vmatpush3.bf16.msra.mxu1 %v16479_v36  ;;  %13833 = vmatprep.mubr.msk.f32.mxu1 %vm16358_vm2, %v16359_v46 }
 0x35a   :  { %15307 = vmatprep.subr.bf16.mxu1 %v16357_v24 }
 0x35d   :  { %15309 = vmatpush3.bf16.msra.mxu1 %v16486_v41 }
 0x35e   :  { %15310 = vmatprep.subr.bf16.mxu1 %v16357_v24 }
 0x360   :  { %13834 = vmatmul.mubr.f32.vlgmr.msra.gmra.mrb[22].mxu1 %v1656_v15 }
 0x361   :  { %15312 = vmatpush3.bf16.msra.mxu1 %v16526_v53  ;;  %13844 = vmatprep.mubr.msk.f32.mxu1 %vm16358_vm2, %v16359_v46 }
 0x362   :  { %15313 = vmatprep.subr.bf16.mxu1 %v16357_v24 }
 0x365   :  { %15315 = vmatpush3.bf16.msra.mxu1 %v16534_v54 }
 0x366   :  { %15316 = vmatprep.subr.bf16.mxu1 %v16357_v24 }
 0x368   :  { %13845 = vmatmul.mubr.f32.vlgmr.msra.gmra.mrb[22].mxu1 %v16680_v10 }
 0x369   :  { %15318 = vmatpush3.bf16.msra.mxu1 %v16479_v36  ;;  %13855 = vmatprep.mubr.msk.f32.mxu1 %vm16358_vm2, %v16359_v46 }
 0x36a   :  { %15319 = vmatprep.subr.bf16.mxu1 %v16357_v24 }
 0x36d   :  { %15321 = vmatpush3.bf16.msra.mxu1 %v16486_v41 }
 0x36e   :  { %15358 = vmatprep.subr.bf16.mxu1 %v16357_v24 }
 0x370   :  { %13856 = vmatmul.mubr.f32.vlgmr.msra.gmra.mrb[22].mxu1 %v16680_v10 }
 0x371   :  { %15360 = vmatpush3.bf16.msra.mxu1 %v16641_v30  ;;  %13932 = vmatprep.mubr.msk.f32.mxu1 %vm16358_vm2, %v16359_v46 }
 0x372   :  { %15361 = vmatprep.subr.bf16.mxu1 %v16357_v24 }
 0x375   :  { %15363 = vmatpush3.bf16.msra.mxu1 %v16656_v35 }
 0x376   :  { %15370 = vmatprep.subr.bf16.mxu1 %v16357_v24 }
 0x3fb   :  { %v1751_v13 = vpop.f32.mrb[12].mxu0 }
 0x3fc   :  { %v13747_v14 = vpop.f32.mrb[13].mxu0 }
 0x403   :  { %v1908_v18 = vpop.f32.mrb[14].mxu0  ;;  %v1660_v19 = vpop.f32.mrb[16].mxu1 }
 0x404   :  { %v1661_v20 = vadd.f32 %v1660_v19, %v16688_v16  ;;  %v13769_v21 = vpop.f32.mrb[15].mxu0  ;;  %v13736_v27 = vpop.f32.mrb[17].mxu1 }
 0x406   :  { %v1752_v29 = vadd.f32 %v1751_v13, %v1661_v20 }
 0x40b   :  { %v1831_v40 = vpop.f32.mrb[18].mxu1  ;;  %v2066_v43 = vpop.f32.mrb[16].mxu0 }
 0x40c   :  { %v1832_v44 = vadd.f32 %v1831_v40, %v1752_v29  ;;  %v13758_v45 = vpop.f32.mrb[19].mxu1  ;;  %v13791_v49 = vpop.f32.mrb[17].mxu0  ;;  %v2598_v29 = vrot.slane %v16575_v28, 6 }
 0x40e   :  { %v1909_v55 = vadd.f32 %v1908_v18, %v1832_v44 }
 0x413   :  { %v1991_v56 = vpop.f32.mrb[20].mxu1 }
 0x414   :  { %v1992_v57 = vadd.f32 %v1991_v56, %v1909_v55  ;;  %v13780_v58 = vpop.f32.mrb[21].mxu1 }
 0x416   :  { %v2067_v60 = vadd.f32 %v2066_v43, %v1992_v57 }
 0x418   :  { %v2076_v61 = vadd.f32 %v16787_v59, %v2067_v60 }
 0x41a   :  { %16135 = vtanh.f32 %v2076_v61  ;;  %v12811_v22 = vmul.f32 -1.442695, %v2076_v61 }
 0x424   :  { %v16136_v62 = vpop.eup %16135 }
 0x425   :  { %2086 = vrot.lane.b32.xlu0 %v16136_v62, %s16360_s3 }
 0x443   :  { %v2582_v0 = vpop.f32.mrb[22].mxu1 }
 0x444   :  { %v2587_v1 = vrot.slane %v2582_v0, 6  ;;  %v13857_v2 = vpop.f32.mrb[23].mxu1 }
 0x446   :  { %v2589_v3 = vadd.f32 %v16566_v7, %v2587_v1 }
 0x448   :  { %16137 = vtanh.f32 %v2589_v3  ;;  %v12812_v25 = vmul.f32 -1.442695, %v2589_v3 }
 0x449   :  { %16139 = vpow2.f32 %v12811_v22 }
 0x452   :  { %v16138_v9 = vpop.eup %16137 }
 0x453   :  { %2602 = vrot.lane.b32.xlu1 %v16138_v9, %s16360_s3  ;;  %v16140_v10 = vpop.eup %16139 }
 0x454   :  { %v2080_v11 = vadd.f32 1.0, %v16140_v10 }
 0x456   :  { %16141 = vrcp.f32 %v2080_v11 }
 0x457   :  { %16143 = vpow2.f32 %v12812_v25 }
 0x460   :  { %v16142_v12 = vpop.eup %16141 }
 0x461   :  { %v16144_v26 = vpop.eup %16143  ;;  %v2084_v19 = vmul.f32 0.0, %v16142_v12 }
 0x462   :  { %v2593_v32 = vadd.f32 1.0, %v16144_v26 }
 0x464   :  { %16145 = vrcp.f32 %v2593_v32 }
 0x46e   :  { %v16146_v13 = vpop.eup %16145 }
 0x46f   :  { %v2600_v40 = vmul.f32 %v16146_v13, %v2598_v29 }
 0x497   :  { %v2087_v15 = vpop.permute.xlu0 %2086 }
 0x498   :  { %v2089_v16 = vmul.f32 %v16142_v12, %v2087_v15 }
 0x49a   :  { %2091 = vrot.lane.b32.xlu0 %v2089_v16, %s16360_s3 }
 0x4c5   :  { %v2603_v14 = vpop.permute.xlu1 %2602 }
 0x4c6   :  { %v2605_v18 = vmul.f32 %v16146_v13, %v2603_v14 }
 0x4c8   :  { %2607 = vrot.lane.b32.xlu1 %v2605_v18, %s16360_s3 }
 0x50c   :  { %v2092_v20 = vpop.permute.xlu0 %2091 }
 0x50d   :  { %v16795_v21 = vadd.f32 %v2092_v20, %v2084_v19 }
 0x50f   :  { %16147 = vtanh.f32 %v16795_v21 }
 0x519   :  { %v16148_v27 = vpop.eup %16147 }
 0x51a   :  { %2097 = vrot.lane.b32.xlu0 %v16148_v27, %s16360_s3 }
 0x53a   :  { %v2608_v43 = vpop.permute.xlu1 %2607 }
 0x53b   :  { %v16800_v44 = vadd.f32 %v2608_v43, %v2600_v40 }
 0x53d   :  { %16149 = vtanh.f32 %v16800_v44 }
 0x547   :  { %v16150_v45 = vpop.eup %16149 }
 0x548   :  { %2613 = vrot.lane.b32.xlu1 %v16150_v45, %s16360_s3 }
 0x58c   :  { %v2098_v49 = vpop.permute.xlu0 %2097 }
 0x58d   :  { %v2100_v55 = vmul.f32 %v16142_v12, %v2098_v49 }
 0x58f   :  { %2618 = vrot.lane.b32.xlu0 %v2100_v55, %s16361_s20 }
 0x5ba   :  { %v2614_v56 = vpop.permute.xlu1 %2613 }
 0x5bb   :  { %v2616_v57 = vmul.f32 %v16146_v13, %v2614_v56 }
 0x5bd   :  { %v3108_v58 = vrot.slane %v2616_v57, 2 }
 0x5bf   :  { %3109 = vrot.lane.b32.xlu1 %v3108_v58, %s16361_s20 }
 0x601   :  { %v2619_v60 = vpop.permute.xlu0 %2618 }
 0x602   :  { %v2620_v28 = vsel %vm581_vm3, %v2619_v60, 0 }
 0x603   :  { %v2691_v61 = vand.u32 4294901760, %v2620_v28 }
 0x605   :  { %v2692_v62 = vsub.f32 %v2620_v28, %v2691_v61 }
 0x607   :  { %v2693_v0 = vand.u32 4294901760, %v2692_v62 }
 0x609   :  { %v2694_v1 = vsub.f32 %v2692_v62, %v2693_v0 }
 0x60b   :  { %v2695_v2 = vand.u32 4294901760, %v2694_v1 }
 0x60d   :  { %13867 = vmatmul.mubr.f32.vlgmr.msra.gmra.mrb[18].mxu0 %v2695_v2 }
 0x60e   :  { %15330 = vmatpush3.bf16.msra.mxu0 %v16589_v4  ;;  %13877 = vmatprep.mubr.msk.f32.mxu0 %vm16358_vm2, %v16359_v46 }
 0x60f   :  { %15331 = vmatprep.subr.bf16.mxu0 %v16357_v24 }
 0x612   :  { %15333 = vmatpush3.bf16.msra.mxu0 %v16593_v6 }
 0x613   :  { %15334 = vmatprep.subr.bf16.mxu0 %v16357_v24 }
 0x615   :  { %13878 = vmatmul.mubr.f32.vlgmr.msra.gmra.mrb[20].mxu0 %v2691_v61 }
 0x616   :  { %15336 = vmatpush3.bf16.msra.mxu0 %v16585_v63  ;;  %13888 = vmatprep.mubr.msk.f32.mxu0 %vm16358_vm2, %v16359_v46 }
 0x617   :  { %15337 = vmatprep.subr.bf16.mxu0 %v16357_v24 }
 0x61a   :  { %15339 = vmatpush3.bf16.msra.mxu0 %v16596_v8 }
 0x61b   :  { %15340 = vmatprep.subr.bf16.mxu0 %v16357_v24 }
 0x61d   :  { %13889 = vmatmul.mubr.f32.vlgmr.msra.gmra.mrb[22].mxu0 %v2692_v62 }
 0x61e   :  { %15342 = vmatpush3.bf16.msra.mxu0 %v16578_v38  ;;  %13899 = vmatprep.mubr.msk.f32.mxu0 %vm16358_vm2, %v16359_v46 }
 0x61f   :  { %15343 = vmatprep.subr.bf16.mxu0 %v16357_v24 }
 0x622   :  { %15345 = vmatpush3.bf16.msra.mxu0 %v16581_v48 }
 0x623   :  { %15346 = vmatprep.subr.bf16.mxu0 %v16357_v24 }
 0x625   :  { %13900 = vmatmul.mubr.f32.vlgmr.msra.gmra.mrb[24].mxu0 %v2693_v0 }
 0x626   :  { %15348 = vmatpush3.bf16.msra.mxu0 %v16610_v17  ;;  %13910 = vmatprep.mubr.msk.f32.mxu0 %vm16358_vm2, %v16359_v46 }
 0x627   :  { %15349 = vmatprep.subr.bf16.mxu0 %v16357_v24 }
 0x62a   :  { %15351 = vmatpush3.bf16.msra.mxu0 %v16625_v23 }
 0x62b   :  { %15352 = vmatprep.subr.bf16.mxu0 %v16357_v24 }
 0x62d   :  { %13911 = vmatmul.mubr.f32.vlgmr.msra.gmra.mrb[26].mxu0 %v2691_v61 }
 0x62e   :  { %15354 = vmatpush3.bf16.msra.mxu0 %v16578_v38  ;;  %13921 = vmatprep.mubr.msk.f32.mxu0 %vm16358_vm2, %v16359_v46 }
 0x62f   :  { %15355 = vmatprep.subr.bf16.mxu0 %v16357_v24 }
 0x631   :  { %v3110_v3 = vpop.permute.xlu1 %3109 }
 0x632   :  { %15357 = vmatpush3.bf16.msra.mxu0 %v16581_v48  ;;  %v3111_v9 = vsel %vm581_vm3, %v3110_v3, 0 }
 0x633   :  { %v16837_v22 = vand.u32 4294901760, %v3111_v9  ;;  %15364 = vmatprep.subr.bf16.mxu0 %v16357_v24 }
 0x635   :  { %v3183_v10 = vsub.f32 %v3111_v9, %v16837_v22  ;;  %13922 = vmatmul.mubr.f32.vlgmr.msra.gmra.mrb[28].mxu0 %v2691_v61 }
 0x636   :  { %15366 = vmatpush3.bf16.msra.mxu0 %v16663_v37  ;;  %13943 = vmatprep.mubr.msk.f32.mxu0 %vm16358_vm2, %v16359_v46 }
 0x637   :  { %v3184_v11 = vand.u32 4294901760, %v3183_v10  ;;  %15367 = vmatprep.subr.bf16.mxu0 %v16357_v24 }
 0x639   :  { %v3185_v12 = vsub.f32 %v3183_v10, %v3184_v11 }
 0x63a   :  { %15369 = vmatpush3.bf16.msra.mxu0 %v16670_v42 }
 0x63b   :  { %15376 = vmatprep.subr.bf16.mxu0 %v16357_v24  ;;  %v3186_v15 = vand.u32 4294901760, %v3185_v12 }
 0x63d   :  { %13944 = vmatmul.mubr.f32.vlgmr.msra.gmra.mrb[30].mxu0 %v16837_v22  ;;  %13933 = vmatmul.mubr.f32.vlgmr.msra.gmra.mrb[24].mxu1 %v3186_v15 }
 0x63e   :  { %15372 = vmatpush3.bf16.msra.mxu1 %v16693_v31  ;;  %15378 = vmatpush3.bf16.msra.mxu0 %v16641_v30 }
 0x63f   :  { %15373 = vmatprep.subr.bf16.mxu1 %v16357_v24  ;;  %15379 = vmatprep.subr.bf16.mxu0 %v16357_v24 }
 0x640   :  { %13954 = vmatprep.mubr.msk.f32.mxu1 %vm16358_vm2, %v16359_v46  ;;  %13965 = vmatprep.mubr.msk.f32.mxu0 %vm16358_vm2, %v16359_v46 }
 0x642   :  { %15375 = vmatpush3.bf16.msra.mxu1 %v16700_v33  ;;  %15381 = vmatpush3.bf16.msra.mxu0 %v16656_v35 }
 0x643   :  { %15382 = vmatprep.subr.bf16.mxu1 %v16357_v24  ;;  %15388 = vmatprep.subr.bf16.mxu0 %v16357_v24 }
 0x645   :  { %13955 = vmatmul.mubr.f32.vlgmr.msra.gmra.mrb[26].mxu1 %v3183_v10  ;;  %13966 = vmatmul.mubr.f32.vlgmr.msra.gmra.mrb[32].mxu0 %v3184_v11 }
 0x646   :  { %15384 = vmatpush3.bf16.msra.mxu1 %v16714_v34  ;;  %15390 = vmatpush3.bf16.msra.mxu0 %v16641_v30 }
 0x647   :  { %15385 = vmatprep.subr.bf16.mxu1 %v16357_v24  ;;  %15391 = vmatprep.subr.bf16.mxu0 %v16357_v24 }
 0x648   :  { %13976 = vmatprep.mubr.msk.f32.mxu1 %vm16358_vm2, %v16359_v46  ;;  %13987 = vmatprep.mubr.msk.f32.mxu0 %vm16358_vm2, %v16359_v46 }
 0x64a   :  { %15387 = vmatpush3.bf16.msra.mxu1 %v16724_v39  ;;  %15393 = vmatpush3.bf16.msra.mxu0 %v16656_v35 }
 0x64b   :  { %15394 = vmatprep.subr.bf16.mxu1 %v16357_v24  ;;  %15430 = vmatprep.subr.bf16.mxu0 %v16357_v24 }
 0x64d   :  { %13977 = vmatmul.mubr.f32.vlgmr.msra.gmra.mrb[28].mxu1 %v16837_v22  ;;  %13988 = vmatmul.mubr.f32.vlgmr.msra.gmra.mrb[34].mxu0 %v16837_v22 }
 0x64e   :  { %15396 = vmatpush3.bf16.msra.mxu1 %v16479_v36  ;;  %13998 = vmatprep.mubr.msk.f32.mxu1 %vm16358_vm2, %v16359_v46 }
 0x64f   :  { %15397 = vmatprep.subr.bf16.mxu1 %v16357_v24  ;;  %15432 = vmatpush3.bf16.msra.mxu0 %v16578_v38 }
 0x650   :  { %15433 = vmatprep.subr.bf16.mxu0 %v16357_v24  ;;  %14064 = vmatprep.mubr.msk.f32.mxu0 %vm16358_vm2, %v16359_v46 }
 0x652   :  { %15399 = vmatpush3.bf16.msra.mxu1 %v16486_v41 }
 0x653   :  { %15400 = vmatprep.subr.bf16.mxu1 %v16357_v24  ;;  %15435 = vmatpush3.bf16.msra.mxu0 %v16581_v48 }
 0x654   :  { %15436 = vmatprep.subr.bf16.mxu0 %v16357_v24 }
 0x655   :  { %13999 = vmatmul.mubr.f32.vlgmr.msra.gmra.mrb[30].mxu1 %v3186_v15 }
 0x656   :  { %15402 = vmatpush3.bf16.msra.mxu1 %v16496_v47  ;;  %14009 = vmatprep.mubr.msk.f32.mxu1 %vm16358_vm2, %v16359_v46 }
 0x657   :  { %15403 = vmatprep.subr.bf16.mxu1 %v16357_v24 }
 0x65a   :  { %15405 = vmatpush3.bf16.msra.mxu1 %v16502_v50 }
 0x65b   :  { %15406 = vmatprep.subr.bf16.mxu1 %v16357_v24 }
 0x65d   :  { %14010 = vmatmul.mubr.f32.vlgmr.msra.gmra.mrb[30].mxu1 %v16837_v22 }
 0x65e   :  { %15408 = vmatpush3.bf16.msra.mxu1 %v16510_v51  ;;  %14020 = vmatprep.mubr.msk.f32.mxu1 %vm16358_vm2, %v16359_v46 }
 0x65f   :  { %15409 = vmatprep.subr.bf16.mxu1 %v16357_v24 }
 0x662   :  { %15411 = vmatpush3.bf16.msra.mxu1 %v16517_v52 }
 0x663   :  { %15412 = vmatprep.subr.bf16.mxu1 %v16357_v24 }
 0x665   :  { %14021 = vmatmul.mubr.f32.vlgmr.msra.gmra.mrb[30].mxu1 %v3183_v10 }
 0x666   :  { %15414 = vmatpush3.bf16.msra.mxu1 %v16479_v36  ;;  %14031 = vmatprep.mubr.msk.f32.mxu1 %vm16358_vm2, %v16359_v46 }
 0x667   :  { %15415 = vmatprep.subr.bf16.mxu1 %v16357_v24 }
 0x66a   :  { %15417 = vmatpush3.bf16.msra.mxu1 %v16486_v41 }
 0x66b   :  { %15418 = vmatprep.subr.bf16.mxu1 %v16357_v24 }
 0x66d   :  { %14032 = vmatmul.mubr.f32.vlgmr.msra.gmra.mrb[30].mxu1 %v3184_v11 }
 0x66e   :  { %15420 = vmatpush3.bf16.msra.mxu1 %v16526_v53  ;;  %14042 = vmatprep.mubr.msk.f32.mxu1 %vm16358_vm2, %v16359_v46 }
 0x66f   :  { %15421 = vmatprep.subr.bf16.mxu1 %v16357_v24 }
 0x672   :  { %15423 = vmatpush3.bf16.msra.mxu1 %v16534_v54 }
 0x673   :  { %15424 = vmatprep.subr.bf16.mxu1 %v16357_v24 }
 0x675   :  { %14043 = vmatmul.mubr.f32.vlgmr.msra.gmra.mrb[30].mxu1 %v16837_v22 }
 0x676   :  { %15426 = vmatpush3.bf16.msra.mxu1 %v16479_v36  ;;  %14053 = vmatprep.mubr.msk.f32.mxu1 %vm16358_vm2, %v16359_v46 }
 0x677   :  { %15427 = vmatprep.subr.bf16.mxu1 %v16357_v24 }
 0x67a   :  { %15429 = vmatpush3.bf16.msra.mxu1 %v16486_v41 }
 0x67b   :  { %15466 = vmatprep.subr.bf16.mxu1 %v16357_v24 }
 0x67d   :  { %14054 = vmatmul.mubr.f32.vlgmr.msra.gmra.mrb[30].mxu1 %v16837_v22 }
 0x67e   :  { %15468 = vmatpush3.bf16.msra.mxu1 %v16641_v30  ;;  %14130 = vmatprep.mubr.msk.f32.mxu1 %vm16358_vm2, %v16359_v46 }
 0x67f   :  { %15469 = vmatprep.subr.bf16.mxu1 %v16357_v24 }
 0x682   :  { %15471 = vmatpush3.bf16.msra.mxu1 %v16656_v35 }
 0x683   :  { %15478 = vmatprep.subr.bf16.mxu1 %v16357_v24 }
 0x6e0   :  { %v2697_v16 = vpop.f32.mrb[18].mxu0 }
 0x6e1   :  { %v13868_v25 = vpop.f32.mrb[19].mxu0 }
 0x6e8   :  { %v2788_v26 = vpop.f32.mrb[20].mxu0 }
 0x6e9   :  { %v2789_v32 = vadd.f32 %v2788_v26, %v2697_v16  ;;  %v13879_v13 = vpop.f32.mrb[21].mxu0 }
 0x6f0   :  { %v2868_v14 = vpop.f32.mrb[22].mxu0 }
 0x6f1   :  { %v2869_v18 = vadd.f32 %v2868_v14, %v2789_v32  ;;  %v13890_v19 = vpop.f32.mrb[23].mxu0 }
 0x6f8   :  { %v2945_v20 = vpop.f32.mrb[24].mxu0 }
 0x6f9   :  { %v2946_v27 = vadd.f32 %v2945_v20, %v2869_v18  ;;  %v13901_v29 = vpop.f32.mrb[25].mxu0 }
 0x700   :  { %v3028_v40 = vpop.f32.mrb[26].mxu0 }
 0x701   :  { %v3029_v43 = vadd.f32 %v3028_v40, %v2946_v27  ;;  %v13912_v45 = vpop.f32.mrb[27].mxu0 }
 0x708   :  { %v3103_v49 = vpop.f32.mrb[28].mxu0 }
 0x709   :  { %v3104_v55 = vadd.f32 %v3103_v49, %v3029_v43  ;;  %v13923_v56 = vpop.f32.mrb[29].mxu0 }
 0x710   :  { %v3279_v57 = vpop.f32.mrb[30].mxu0  ;;  %v3188_v58 = vpop.f32.mrb[24].mxu1 }
 0x711   :  { %v3189_v60 = vadd.f32 %v3188_v58, %v3104_v55  ;;  %v13945_v28 = vpop.f32.mrb[31].mxu0  ;;  %v13934_v61 = vpop.f32.mrb[25].mxu1 }
 0x713   :  { %v3280_v62 = vadd.f32 %v3279_v57, %v3189_v60 }
 0x718   :  { %v3359_v0 = vpop.f32.mrb[26].mxu1  ;;  %v3436_v1 = vpop.f32.mrb[32].mxu0 }
 0x719   :  { %v3360_v2 = vadd.f32 %v3359_v0, %v3280_v62  ;;  %v13956_v3 = vpop.f32.mrb[27].mxu1  ;;  %v13967_v9 = vpop.f32.mrb[33].mxu0 }
 0x71b   :  { %v3437_v22 = vadd.f32 %v3436_v1, %v3360_v2  ;;  %v4120_v2 = vrot.slane %v16800_v44, 6 }
 0x720   :  { %v3519_v10 = vpop.f32.mrb[28].mxu1  ;;  %v3594_v11 = vpop.f32.mrb[34].mxu0 }
 0x721   :  { %v3520_v12 = vadd.f32 %v3519_v10, %v3437_v22  ;;  %v13978_v15 = vpop.f32.mrb[29].mxu1  ;;  %v13989_v16 = vpop.f32.mrb[35].mxu0 }
 0x723   :  { %v3595_v25 = vadd.f32 %v3594_v11, %v3520_v12 }
 0x725   :  { %v3598_v26 = vadd.f32 %v16787_v59, %v3595_v25 }
 0x727   :  { %16151 = vtanh.f32 %v3598_v26  ;;  %v12813_v27 = vmul.f32 -1.442695, %v3598_v26 }
 0x731   :  { %v16152_v32 = vpop.eup %16151 }
 0x732   :  { %3608 = vrot.lane.b32.xlu0 %v16152_v32, %s16360_s3 }
 0x750   :  { %v4104_v13 = vpop.f32.mrb[30].mxu1 }
 0x751   :  { %v4109_v14 = vrot.slane %v4104_v13, 4  ;;  %v14055_v18 = vpop.f32.mrb[31].mxu1 }
 0x753   :  { %v4111_v19 = vadd.f32 %v16566_v7, %v4109_v14 }
 0x755   :  { %16153 = vtanh.f32 %v4111_v19  ;;  %v12814_v55 = vmul.f32 -1.442695, %v4111_v19 }
 0x756   :  { %16155 = vpow2.f32 %v12813_v27 }
 0x75f   :  { %v16154_v20 = vpop.eup %16153 }
 0x760   :  { %4124 = vrot.lane.b32.xlu1 %v16154_v20, %s16360_s3  ;;  %v16156_v29 = vpop.eup %16155 }
 0x761   :  { %v3602_v40 = vadd.f32 1.0, %v16156_v29 }
 0x763   :  { %16157 = vrcp.f32 %v3602_v40 }
 0x764   :  { %16159 = vpow2.f32 %v12814_v55 }
 0x76d   :  { %v16158_v43 = vpop.eup %16157 }
 0x76e   :  { %v16160_v56 = vpop.eup %16159  ;;  %v3606_v61 = vmul.f32 %v16158_v43, %v16795_v21 }
 0x76f   :  { %v4115_v57 = vadd.f32 1.0, %v16160_v56 }
 0x771   :  { %16161 = vrcp.f32 %v4115_v57 }
 0x77b   :  { %v16162_v58 = vpop.eup %16161 }
 0x77c   :  { %v4122_v3 = vmul.f32 %v16162_v58, %v4120_v2 }
 0x7a4   :  { %v3609_v45 = vpop.permute.xlu0 %3608 }
 0x7a5   :  { %v3611_v49 = vmul.f32 %v16158_v43, %v3609_v45 }
 0x7a7   :  { %3613 = vrot.lane.b32.xlu0 %v3611_v49, %s16360_s3 }
 0x7d2   :  { %v4125_v60 = vpop.permute.xlu1 %4124 }
 0x7d3   :  { %v4127_v28 = vmul.f32 %v16162_v58, %v4125_v60 }
 0x7d5   :  { %4129 = vrot.lane.b32.xlu1 %v4127_v28, %s16360_s3 }
 0x819   :  { %v3614_v62 = vpop.permute.xlu0 %3613 }
 0x81a   :  { %v16932_v0 = vadd.f32 %v3614_v62, %v3606_v61 }
 0x81c   :  { %16163 = vtanh.f32 %v16932_v0 }
 0x826   :  { %v16164_v1 = vpop.eup %16163 }
 0x827   :  { %3619 = vrot.lane.b32.xlu0 %v16164_v1, %s16360_s3 }
 0x847   :  { %v4130_v9 = vpop.permute.xlu1 %4129 }
 0x848   :  { %v16937_v22 = vadd.f32 %v4130_v9, %v4122_v3 }
 0x84a   :  { %16165 = vtanh.f32 %v16937_v22 }
 0x854   :  { %v16166_v10 = vpop.eup %16165 }
 0x855   :  { %4135 = vrot.lane.b32.xlu1 %v16166_v10, %s16360_s3 }
 0x899   :  { %v3620_v21 = vpop.permute.xlu0 %3619 }
 0x89a   :  { %v3622_v11 = vmul.f32 %v16158_v43, %v3620_v21 }
 0x89c   :  { %4140 = vrot.lane.b32.xlu0 %v3622_v11, %s16361_s20 }
 0x8c7   :  { %v4136_v12 = vpop.permute.xlu1 %4135 }
 0x8c8   :  { %v4138_v15 = vmul.f32 %v16162_v58, %v4136_v12 }
 0x8ca   :  { %v4630_v16 = vrot.slane %v4138_v15, 4 }
 0x8cc   :  { %4631 = vrot.lane.b32.xlu1 %v4630_v16, %s16361_s20 }
 0x90e   :  { %v4141_v25 = vpop.permute.xlu0 %4140 }
 0x90f   :  { %v4142_v44 = vsel %vm581_vm3, %v4141_v25, 0 }
 0x910   :  { %v4213_v26 = vand.u32 4294901760, %v4142_v44 }
 0x912   :  { %v4214_v32 = vsub.f32 %v4142_v44, %v4213_v26 }
 0x914   :  { %v4215_v13 = vand.u32 4294901760, %v4214_v32 }
 0x916   :  { %v4216_v14 = vsub.f32 %v4214_v32, %v4215_v13 }
 0x918   :  { %v4217_v18 = vand.u32 4294901760, %v4216_v14 }
 0x91a   :  { %14065 = vmatmul.mubr.f32.vlgmr.msra.gmra.mrb[36].mxu0 %v4217_v18 }
 0x91b   :  { %15438 = vmatpush3.bf16.msra.mxu0 %v16589_v4  ;;  %14075 = vmatprep.mubr.msk.f32.mxu0 %vm16358_vm2, %v16359_v46 }
 0x91c   :  { %15439 = vmatprep.subr.bf16.mxu0 %v16357_v24 }
 0x91f   :  { %15441 = vmatpush3.bf16.msra.mxu0 %v16593_v6 }
 0x920   :  { %15442 = vmatprep.subr.bf16.mxu0 %v16357_v24 }
 0x922   :  { %14076 = vmatmul.mubr.f32.vlgmr.msra.gmra.mrb[38].mxu0 %v4213_v26 }
 0x923   :  { %15444 = vmatpush3.bf16.msra.mxu0 %v16585_v63  ;;  %14086 = vmatprep.mubr.msk.f32.mxu0 %vm16358_vm2, %v16359_v46 }
 0x924   :  { %15445 = vmatprep.subr.bf16.mxu0 %v16357_v24 }
 0x927   :  { %15447 = vmatpush3.bf16.msra.mxu0 %v16596_v8 }
 0x928   :  { %15448 = vmatprep.subr.bf16.mxu0 %v16357_v24 }
 0x92a   :  { %14087 = vmatmul.mubr.f32.vlgmr.msra.gmra.mrb[40].mxu0 %v4214_v32 }
 0x92b   :  { %15450 = vmatpush3.bf16.msra.mxu0 %v16578_v38  ;;  %14097 = vmatprep.mubr.msk.f32.mxu0 %vm16358_vm2, %v16359_v46 }
 0x92c   :  { %15451 = vmatprep.subr.bf16.mxu0 %v16357_v24 }
 0x92f   :  { %15453 = vmatpush3.bf16.msra.mxu0 %v16581_v48 }
 0x930   :  { %15454 = vmatprep.subr.bf16.mxu0 %v16357_v24 }
 0x932   :  { %14098 = vmatmul.mubr.f32.vlgmr.msra.gmra.mrb[42].mxu0 %v4215_v13 }
 0x933   :  { %15456 = vmatpush3.bf16.msra.mxu0 %v16610_v17  ;;  %14108 = vmatprep.mubr.msk.f32.mxu0 %vm16358_vm2, %v16359_v46 }
 0x934   :  { %15457 = vmatprep.subr.bf16.mxu0 %v16357_v24 }
 0x937   :  { %15459 = vmatpush3.bf16.msra.mxu0 %v16625_v23 }
 0x938   :  { %15460 = vmatprep.subr.bf16.mxu0 %v16357_v24 }
 0x93a   :  { %14109 = vmatmul.mubr.f32.vlgmr.msra.gmra.mrb[44].mxu0 %v4213_v26 }
 0x93b   :  { %15462 = vmatpush3.bf16.msra.mxu0 %v16578_v38  ;;  %14119 = vmatprep.mubr.msk.f32.mxu0 %vm16358_vm2, %v16359_v46 }
 0x93c   :  { %15463 = vmatprep.subr.bf16.mxu0 %v16357_v24 }
 0x93e   :  { %v4632_v19 = vpop.permute.xlu1 %4631 }
 0x93f   :  { %15465 = vmatpush3.bf16.msra.mxu0 %v16581_v48  ;;  %v4633_v20 = vsel %vm581_vm3, %v4632_v19, 0 }
 0x940   :  { %v16974_v27 = vand.u32 4294901760, %v4633_v20  ;;  %15472 = vmatprep.subr.bf16.mxu0 %v16357_v24 }
 0x942   :  { %v4705_v29 = vsub.f32 %v4633_v20, %v16974_v27  ;;  %14120 = vmatmul.mubr.f32.vlgmr.msra.gmra.mrb[46].mxu0 %v4213_v26 }
 0x943   :  { %15474 = vmatpush3.bf16.msra.mxu0 %v16663_v37  ;;  %14141 = vmatprep.mubr.msk.f32.mxu0 %vm16358_vm2, %v16359_v46 }
 0x944   :  { %v4706_v40 = vand.u32 4294901760, %v4705_v29  ;;  %15475 = vmatprep.subr.bf16.mxu0 %v16357_v24 }
 0x946   :  { %v4707_v43 = vsub.f32 %v4705_v29, %v4706_v40 }
 0x947   :  { %15477 = vmatpush3.bf16.msra.mxu0 %v16670_v42 }
 0x948   :  { %15484 = vmatprep.subr.bf16.mxu0 %v16357_v24  ;;  %v4708_v45 = vand.u32 4294901760, %v4707_v43 }
 0x94a   :  { %14142 = vmatmul.mubr.f32.vlgmr.msra.gmra.mrb[48].mxu0 %v16974_v27  ;;  %14131 = vmatmul.mubr.f32.vlgmr.msra.gmra.mrb[32].mxu1 %v4708_v45 }
 0x94b   :  { %15480 = vmatpush3.bf16.msra.mxu1 %v16693_v31  ;;  %15486 = vmatpush3.bf16.msra.mxu0 %v16641_v30 }
 0x94c   :  { %15481 = vmatprep.subr.bf16.mxu1 %v16357_v24  ;;  %15487 = vmatprep.subr.bf16.mxu0 %v16357_v24 }
 0x94d   :  { %14152 = vmatprep.mubr.msk.f32.mxu1 %vm16358_vm2, %v16359_v46  ;;  %14163 = vmatprep.mubr.msk.f32.mxu0 %vm16358_vm2, %v16359_v46 }
 0x94f   :  { %15483 = vmatpush3.bf16.msra.mxu1 %v16700_v33  ;;  %15489 = vmatpush3.bf16.msra.mxu0 %v16656_v35 }
 0x950   :  { %15490 = vmatprep.subr.bf16.mxu1 %v16357_v24  ;;  %15496 = vmatprep.subr.bf16.mxu0 %v16357_v24 }
 0x952   :  { %14153 = vmatmul.mubr.f32.vlgmr.msra.gmra.mrb[34].mxu1 %v4705_v29  ;;  %14164 = vmatmul.mubr.f32.vlgmr.msra.gmra.mrb[50].mxu0 %v4706_v40 }
 0x953   :  { %15492 = vmatpush3.bf16.msra.mxu1 %v16714_v34  ;;  %15498 = vmatpush3.bf16.msra.mxu0 %v16641_v30 }
 0x954   :  { %15493 = vmatprep.subr.bf16.mxu1 %v16357_v24  ;;  %15499 = vmatprep.subr.bf16.mxu0 %v16357_v24 }
 0x955   :  { %14174 = vmatprep.mubr.msk.f32.mxu1 %vm16358_vm2, %v16359_v46  ;;  %14185 = vmatprep.mubr.msk.f32.mxu0 %vm16358_vm2, %v16359_v46 }
 0x957   :  { %15495 = vmatpush3.bf16.msra.mxu1 %v16724_v39  ;;  %15501 = vmatpush3.bf16.msra.mxu0 %v16656_v35 }
 0x958   :  { %15502 = vmatprep.subr.bf16.mxu1 %v16357_v24  ;;  %15538 = vmatprep.subr.bf16.mxu0 %v16357_v24 }
 0x95a   :  { %14175 = vmatmul.mubr.f32.vlgmr.msra.gmra.mrb[36].mxu1 %v16974_v27  ;;  %14186 = vmatmul.mubr.f32.vlgmr.msra.gmra.mrb[52].mxu0 %v16974_v27 }
 0x95b   :  { %15504 = vmatpush3.bf16.msra.mxu1 %v16479_v36  ;;  %14196 = vmatprep.mubr.msk.f32.mxu1 %vm16358_vm2, %v16359_v46 }
 0x95c   :  { %15505 = vmatprep.subr.bf16.mxu1 %v16357_v24  ;;  %15540 = vmatpush3.bf16.msra.mxu0 %v16578_v38 }
 0x95d   :  { %15541 = vmatprep.subr.bf16.mxu0 %v16357_v24  ;;  %14262 = vmatprep.mubr.msk.f32.mxu0 %vm16358_vm2, %v16359_v46 }
 0x95f   :  { %15507 = vmatpush3.bf16.msra.mxu1 %v16486_v41 }
 0x960   :  { %15508 = vmatprep.subr.bf16.mxu1 %v16357_v24  ;;  %15543 = vmatpush3.bf16.msra.mxu0 %v16581_v48 }
 0x961   :  { %15544 = vmatprep.subr.bf16.mxu0 %v16357_v24 }
 0x962   :  { %14197 = vmatmul.mubr.f32.vlgmr.msra.gmra.mrb[38].mxu1 %v4708_v45 }
 0x963   :  { %15510 = vmatpush3.bf16.msra.mxu1 %v16496_v47  ;;  %14207 = vmatprep.mubr.msk.f32.mxu1 %vm16358_vm2, %v16359_v46 }
 0x964   :  { %15511 = vmatprep.subr.bf16.mxu1 %v16357_v24 }
 0x967   :  { %15513 = vmatpush3.bf16.msra.mxu1 %v16502_v50 }
 0x968   :  { %15514 = vmatprep.subr.bf16.mxu1 %v16357_v24 }
 0x96a   :  { %14208 = vmatmul.mubr.f32.vlgmr.msra.gmra.mrb[38].mxu1 %v16974_v27 }
 0x96b   :  { %15516 = vmatpush3.bf16.msra.mxu1 %v16510_v51  ;;  %14218 = vmatprep.mubr.msk.f32.mxu1 %vm16358_vm2, %v16359_v46 }
 0x96c   :  { %15517 = vmatprep.subr.bf16.mxu1 %v16357_v24 }
 0x96f   :  { %15519 = vmatpush3.bf16.msra.mxu1 %v16517_v52 }
 0x970   :  { %15520 = vmatprep.subr.bf16.mxu1 %v16357_v24 }
 0x972   :  { %14219 = vmatmul.mubr.f32.vlgmr.msra.gmra.mrb[38].mxu1 %v4705_v29 }
 0x973   :  { %15522 = vmatpush3.bf16.msra.mxu1 %v16479_v36  ;;  %14229 = vmatprep.mubr.msk.f32.mxu1 %vm16358_vm2, %v16359_v46 }
 0x974   :  { %15523 = vmatprep.subr.bf16.mxu1 %v16357_v24 }
 0x977   :  { %15525 = vmatpush3.bf16.msra.mxu1 %v16486_v41 }
 0x978   :  { %15526 = vmatprep.subr.bf16.mxu1 %v16357_v24 }
 0x97a   :  { %14230 = vmatmul.mubr.f32.vlgmr.msra.gmra.mrb[38].mxu1 %v4706_v40 }
 0x97b   :  { %15528 = vmatpush3.bf16.msra.mxu1 %v16526_v53  ;;  %14240 = vmatprep.mubr.msk.f32.mxu1 %vm16358_vm2, %v16359_v46 }
 0x97c   :  { %15529 = vmatprep.subr.bf16.mxu1 %v16357_v24 }
 0x97f   :  { %15531 = vmatpush3.bf16.msra.mxu1 %v16534_v54 }
 0x980   :  { %15532 = vmatprep.subr.bf16.mxu1 %v16357_v24 }
 0x982   :  { %14241 = vmatmul.mubr.f32.vlgmr.msra.gmra.mrb[38].mxu1 %v16974_v27 }
 0x983   :  { %15534 = vmatpush3.bf16.msra.mxu1 %v16479_v36  ;;  %14251 = vmatprep.mubr.msk.f32.mxu1 %vm16358_vm2, %v16359_v46 }
 0x984   :  { %15535 = vmatprep.subr.bf16.mxu1 %v16357_v24 }
 0x987   :  { %15537 = vmatpush3.bf16.msra.mxu1 %v16486_v41 }
 0x988   :  { %15574 = vmatprep.subr.bf16.mxu1 %v16357_v24 }
 0x98a   :  { %14252 = vmatmul.mubr.f32.vlgmr.msra.gmra.mrb[38].mxu1 %v16974_v27 }
 0x98b   :  { %15576 = vmatpush3.bf16.msra.mxu1 %v16641_v30  ;;  %14328 = vmatprep.mubr.msk.f32.mxu1 %vm16358_vm2, %v16359_v46 }
 0x98c   :  { %15577 = vmatprep.subr.bf16.mxu1 %v16357_v24 }
 0x98f   :  { %15579 = vmatpush3.bf16.msra.mxu1 %v16656_v35 }
 0x990   :  { %15586 = vmatprep.subr.bf16.mxu1 %v16357_v24 }
 0x9ed   :  { %v4219_v49 = vpop.f32.mrb[36].mxu0 }
 0x9ee   :  { %v14066_v55 = vpop.f32.mrb[37].mxu0 }
 0x9f5   :  { %v4310_v56 = vpop.f32.mrb[38].mxu0 }
 0x9f6   :  { %v4311_v57 = vadd.f32 %v4310_v56, %v4219_v49  ;;  %v14077_v58 = vpop.f32.mrb[39].mxu0 }
 0x9fd   :  { %v4390_v60 = vpop.f32.mrb[40].mxu0 }
 0x9fe   :  { %v4391_v28 = vadd.f32 %v4390_v60, %v4311_v57  ;;  %v14088_v61 = vpop.f32.mrb[41].mxu0 }
 0xa05   :  { %v4467_v62 = vpop.f32.mrb[42].mxu0 }
 0xa06   :  { %v4468_v1 = vadd.f32 %v4467_v62, %v4391_v28  ;;  %v14099_v2 = vpop.f32.mrb[43].mxu0 }
 0xa0d   :  { %v4550_v3 = vpop.f32.mrb[44].mxu0 }
 0xa0e   :  { %v4551_v9 = vadd.f32 %v4550_v3, %v4468_v1  ;;  %v14110_v10 = vpop.f32.mrb[45].mxu0 }
 0xa15   :  { %v4625_v21 = vpop.f32.mrb[46].mxu0 }
 0xa16   :  { %v4626_v11 = vadd.f32 %v4625_v21, %v4551_v9  ;;  %v14121_v12 = vpop.f32.mrb[47].mxu0 }
 0xa1d   :  { %v4801_v15 = vpop.f32.mrb[48].mxu0  ;;  %v4710_v16 = vpop.f32.mrb[32].mxu1 }
 0xa1e   :  { %v4711_v25 = vadd.f32 %v4710_v16, %v4626_v11  ;;  %v14143_v44 = vpop.f32.mrb[49].mxu0  ;;  %v14132_v26 = vpop.f32.mrb[33].mxu1 }
 0xa20   :  { %v4802_v32 = vadd.f32 %v4801_v15, %v4711_v25 }
 0xa25   :  { %v4881_v13 = vpop.f32.mrb[34].mxu1  ;;  %v4958_v14 = vpop.f32.mrb[50].mxu0 }
 0xa26   :  { %v4882_v18 = vadd.f32 %v4881_v13, %v4802_v32  ;;  %v14154_v19 = vpop.f32.mrb[35].mxu1  ;;  %v14165_v20 = vpop.f32.mrb[51].mxu0  ;;  %v5642_v13 = vrot.slane %v16937_v22, 6 }
 0xa28   :  { %v4959_v27 = vadd.f32 %v4958_v14, %v4882_v18 }
 0xa2d   :  { %v5041_v29 = vpop.f32.mrb[36].mxu1  ;;  %v5116_v40 = vpop.f32.mrb[52].mxu0 }
 0xa2e   :  { %v5042_v43 = vadd.f32 %v5041_v29, %v4959_v27  ;;  %v14176_v45 = vpop.f32.mrb[37].mxu1  ;;  %v14187_v49 = vpop.f32.mrb[53].mxu0 }
 0xa30   :  { %v5117_v55 = vadd.f32 %v5116_v40, %v5042_v43 }
 0xa32   :  { %v5120_v56 = vadd.f32 %v16787_v59, %v5117_v55 }
 0xa34   :  { %16167 = vtanh.f32 %v5120_v56  ;;  %v12815_v1 = vmul.f32 -1.442695, %v5120_v56 }
 0xa3e   :  { %v16168_v57 = vpop.eup %16167 }
 0xa3f   :  { %5130 = vrot.lane.b32.xlu0 %v16168_v57, %s16360_s3 }
 0xa5d   :  { %v5626_v58 = vpop.f32.mrb[38].mxu1 }
 0xa5e   :  { %v5631_v60 = vrot.slane %v5626_v58, 2  ;;  %v14253_v28 = vpop.f32.mrb[39].mxu1 }
 0xa60   :  { %v5633_v61 = vadd.f32 %v16566_v7, %v5631_v60 }
 0xa62   :  { %16169 = vtanh.f32 %v5633_v61  ;;  %v12816_v21 = vmul.f32 -1.442695, %v5633_v61 }
 0xa63   :  { %16171 = vpow2.f32 %v12815_v1 }
 0xa6c   :  { %v16170_v62 = vpop.eup %16169 }
 0xa6d   :  { %5646 = vrot.lane.b32.xlu1 %v16170_v62, %s16360_s3  ;;  %v16172_v2 = vpop.eup %16171 }
 0xa6e   :  { %v5124_v3 = vadd.f32 1.0, %v16172_v2 }
 0xa70   :  { %16173 = vrcp.f32 %v5124_v3 }
 0xa71   :  { %16175 = vpow2.f32 %v12816_v21 }
 0xa7a   :  { %v16174_v9 = vpop.eup %16173 }
 0xa7b   :  { %v16176_v11 = vpop.eup %16175  ;;  %v5128_v25 = vmul.f32 %v16174_v9, %v16932_v0 }
 0xa7c   :  { %v5637_v12 = vadd.f32 1.0, %v16176_v11 }
 0xa7e   :  { %16177 = vrcp.f32 %v5637_v12 }
 0xa88   :  { %v16178_v7 = vpop.eup %16177 }
 0xa89   :  { %v5644_v14 = vmul.f32 %v16178_v7, %v5642_v13 }
 0xab1   :  { %v5131_v59 = vpop.permute.xlu0 %5130 }
 0xab2   :  { %v5133_v10 = vmul.f32 %v16174_v9, %v5131_v59 }
 0xab4   :  { %5135 = vrot.lane.b32.xlu0 %v5133_v10, %s16360_s3 }
 0xadf   :  { %v5647_v15 = vpop.permute.xlu1 %5646 }
 0xae0   :  { %v5649_v16 = vmul.f32 %v16178_v7, %v5647_v15 }
 0xae2   :  { %5651 = vrot.lane.b32.xlu1 %v5649_v16, %s16360_s3 }
 0xb26   :  { %v5136_v44 = vpop.permute.xlu0 %5135 }
 0xb27   :  { %v17069_v26 = vadd.f32 %v5136_v44, %v5128_v25 }
 0xb29   :  { %16179 = vtanh.f32 %v17069_v26 }
 0xb33   :  { %v16180_v32 = vpop.eup %16179 }
 0xb34   :  { %5141 = vrot.lane.b32.xlu0 %v16180_v32, %s16360_s3 }
 0xb54   :  { %v5652_v18 = vpop.permute.xlu1 %5651 }
 0xb55   :  { %v17074_v19 = vadd.f32 %v5652_v18, %v5644_v14 }
 0xb57   :  { %16181 = vtanh.f32 %v17074_v19 }
 0xb61   :  { %v16182_v20 = vpop.eup %16181 }
 0xb62   :  { %5657 = vrot.lane.b32.xlu1 %v16182_v20, %s16360_s3 }
 0xba6   :  { %v5142_v0 = vpop.permute.xlu0 %5141 }
 0xba7   :  { %v5144_v27 = vmul.f32 %v16174_v9, %v5142_v0 }
 0xba9   :  { %5662 = vrot.lane.b32.xlu0 %v5144_v27, %s16361_s20 }
 0xbd4   :  { %v5658_v29 = vpop.permute.xlu1 %5657 }
 0xbd5   :  { %v5660_v40 = vmul.f32 %v16178_v7, %v5658_v29 }
 0xbd7   :  { %v6152_v43 = vrot.slane %v5660_v40, 6 }
 0xbd9   :  { %6153 = vrot.lane.b32.xlu1 %v6152_v43, %s16361_s20 }
 0xc1b   :  { %v5663_v45 = vpop.permute.xlu0 %5662 }
 0xc1c   :  { %v5664_v22 = vsel %vm581_vm3, %v5663_v45, 0 }
 0xc1d   :  { %v5735_v49 = vand.u32 4294901760, %v5664_v22 }
 0xc1f   :  { %v5736_v55 = vsub.f32 %v5664_v22, %v5735_v49 }
 0xc21   :  { %v5737_v56 = vand.u32 4294901760, %v5736_v55 }
 0xc23   :  { %v5738_v57 = vsub.f32 %v5736_v55, %v5737_v56 }
 0xc25   :  { %v5739_v58 = vand.u32 4294901760, %v5738_v57 }
 0xc27   :  { %14263 = vmatmul.mubr.f32.vlgmr.msra.gmra.mrb[54].mxu0 %v5739_v58 }
 0xc28   :  { %15546 = vmatpush3.bf16.msra.mxu0 %v16589_v4  ;;  %14273 = vmatprep.mubr.msk.f32.mxu0 %vm16358_vm2, %v16359_v46 }
 0xc29   :  { %15547 = vmatprep.subr.bf16.mxu0 %v16357_v24 }
 0xc2c   :  { %15549 = vmatpush3.bf16.msra.mxu0 %v16593_v6 }
 0xc2d   :  { %15550 = vmatprep.subr.bf16.mxu0 %v16357_v24 }
 0xc2f   :  { %14274 = vmatmul.mubr.f32.vlgmr.msra.gmra.mrb[56].mxu0 %v5735_v49 }
 0xc30   :  { %15552 = vmatpush3.bf16.msra.mxu0 %v16585_v63  ;;  %14284 = vmatprep.mubr.msk.f32.mxu0 %vm16358_vm2, %v16359_v46 }
 0xc31   :  { %15553 = vmatprep.subr.bf16.mxu0 %v16357_v24 }
 0xc34   :  { %15555 = vmatpush3.bf16.msra.mxu0 %v16596_v8 }
 0xc35   :  { %15556 = vmatprep.subr.bf16.mxu0 %v16357_v24 }
 0xc37   :  { %14285 = vmatmul.mubr.f32.vlgmr.msra.gmra.mrb[58].mxu0 %v5736_v55 }
 0xc38   :  { %15558 = vmatpush3.bf16.msra.mxu0 %v16578_v38  ;;  %14295 = vmatprep.mubr.msk.f32.mxu0 %vm16358_vm2, %v16359_v46 }
 0xc39   :  { %15559 = vmatprep.subr.bf16.mxu0 %v16357_v24 }
 0xc3c   :  { %15561 = vmatpush3.bf16.msra.mxu0 %v16581_v48 }
 0xc3d   :  { %15562 = vmatprep.subr.bf16.mxu0 %v16357_v24 }
 0xc3f   :  { %14296 = vmatmul.mubr.f32.vlgmr.msra.gmra.mrb[60].mxu0 %v5737_v56 }
 0xc40   :  { %15564 = vmatpush3.bf16.msra.mxu0 %v16610_v17  ;;  %14306 = vmatprep.mubr.msk.f32.mxu0 %vm16358_vm2, %v16359_v46 }
 0xc41   :  { %15565 = vmatprep.subr.bf16.mxu0 %v16357_v24 }
 0xc44   :  { %15567 = vmatpush3.bf16.msra.mxu0 %v16625_v23 }
 0xc45   :  { %15568 = vmatprep.subr.bf16.mxu0 %v16357_v24 }
 0xc47   :  { %14307 = vmatmul.mubr.f32.vlgmr.msra.gmra.mrb[62].mxu0 %v5735_v49 }
 0xc48   :  { %15570 = vmatpush3.bf16.msra.mxu0 %v16578_v38  ;;  %14317 = vmatprep.mubr.msk.f32.mxu0 %vm16358_vm2, %v16359_v46 }
 0xc49   :  { %15571 = vmatprep.subr.bf16.mxu0 %v16357_v24 }
 0xc4b   :  { %v6154_v60 = vpop.permute.xlu1 %6153 }
 0xc4c   :  { %15573 = vmatpush3.bf16.msra.mxu0 %v16581_v48  ;;  %v6155_v28 = vsel %vm581_vm3, %v6154_v60, 0 }
 0xc4d   :  { %v17111_v61 = vand.u32 4294901760, %v6155_v28  ;;  %15580 = vmatprep.subr.bf16.mxu0 %v16357_v24 }
 0xc4f   :  { %v6227_v62 = vsub.f32 %v6155_v28, %v17111_v61  ;;  %14318 = vmatmul.mubr.f32.vlgmr.msra.gmra.mrb[64].mxu0 %v5735_v49 }
 0xc50   :  { %15582 = vmatpush3.bf16.msra.mxu0 %v16663_v37  ;;  %14339 = vmatprep.mubr.msk.f32.mxu0 %vm16358_vm2, %v16359_v46 }
 0xc51   :  { %v6228_v1 = vand.u32 4294901760, %v6227_v62  ;;  %15583 = vmatprep.subr.bf16.mxu0 %v16357_v24 }
 0xc53   :  { %v6229_v2 = vsub.f32 %v6227_v62, %v6228_v1 }
 0xc54   :  { %15585 = vmatpush3.bf16.msra.mxu0 %v16670_v42 }
 0xc55   :  { %15592 = vmatprep.subr.bf16.mxu0 %v16357_v24  ;;  %v6230_v3 = vand.u32 4294901760, %v6229_v2 }
 0xc57   :  { %14340 = vmatmul.mubr.f32.vlgmr.msra.gmra.mrb[66].mxu0 %v17111_v61  ;;  %14329 = vmatmul.mubr.f32.vlgmr.msra.gmra.mrb[40].mxu1 %v6230_v3 }
 0xc58   :  { %15588 = vmatpush3.bf16.msra.mxu1 %v16693_v31  ;;  %15594 = vmatpush3.bf16.msra.mxu0 %v16641_v30 }
 0xc59   :  { %15589 = vmatprep.subr.bf16.mxu1 %v16357_v24  ;;  %15595 = vmatprep.subr.bf16.mxu0 %v16357_v24 }
 0xc5a   :  { %14350 = vmatprep.mubr.msk.f32.mxu1 %vm16358_vm2, %v16359_v46  ;;  %14361 = vmatprep.mubr.msk.f32.mxu0 %vm16358_vm2, %v16359_v46 }
 0xc5c   :  { %15591 = vmatpush3.bf16.msra.mxu1 %v16700_v33  ;;  %15597 = vmatpush3.bf16.msra.mxu0 %v16656_v35 }
 0xc5d   :  { %15598 = vmatprep.subr.bf16.mxu1 %v16357_v24  ;;  %15604 = vmatprep.subr.bf16.mxu0 %v16357_v24 }
 0xc5f   :  { %14351 = vmatmul.mubr.f32.vlgmr.msra.gmra.mrb[42].mxu1 %v6227_v62  ;;  %14362 = vmatmul.mubr.f32.vlgmr.msra.gmra.mrb[68].mxu0 %v6228_v1 }
 0xc60   :  { %15600 = vmatpush3.bf16.msra.mxu1 %v16714_v34  ;;  %15606 = vmatpush3.bf16.msra.mxu0 %v16641_v30 }
 0xc61   :  { %15601 = vmatprep.subr.bf16.mxu1 %v16357_v24  ;;  %15607 = vmatprep.subr.bf16.mxu0 %v16357_v24 }
 0xc62   :  { %14372 = vmatprep.mubr.msk.f32.mxu1 %vm16358_vm2, %v16359_v46  ;;  %14383 = vmatprep.mubr.msk.f32.mxu0 %vm16358_vm2, %v16359_v46 }
 0xc64   :  { %15603 = vmatpush3.bf16.msra.mxu1 %v16724_v39  ;;  %15609 = vmatpush3.bf16.msra.mxu0 %v16656_v35 }
 0xc65   :  { %15610 = vmatprep.subr.bf16.mxu1 %v16357_v24  ;;  %15616 = vmatprep.subr.bf16.mxu0 %v16357_v24 }
 0xc67   :  { %14373 = vmatmul.mubr.f32.vlgmr.msra.gmra.mrb[44].mxu1 %v17111_v61  ;;  %14384 = vmatmul.mubr.f32.vlgmr.msra.gmra.mrb[70].mxu0 %v17111_v61 }
 0xc68   :  { %15612 = vmatpush3.bf16.msra.mxu1 %v16479_v36  ;;  %15618 = vmatpush3.bf16.msra.mxu0 %v16496_v47 }
 0xc69   :  { %15613 = vmatprep.subr.bf16.mxu1 %v16357_v24  ;;  %15619 = vmatprep.subr.bf16.mxu0 %v16357_v24 }
 0xc6a   :  { %14394 = vmatprep.mubr.msk.f32.mxu1 %vm16358_vm2, %v16359_v46  ;;  %14405 = vmatprep.mubr.msk.f32.mxu0 %vm16358_vm2, %v16359_v46 }
 0xc6c   :  { %15615 = vmatpush3.bf16.msra.mxu1 %v16486_v41  ;;  %15621 = vmatpush3.bf16.msra.mxu0 %v16502_v50 }
 0xc6d   :  { %15622 = vmatprep.subr.bf16.mxu1 %v16357_v24  ;;  %15628 = vmatprep.subr.bf16.mxu0 %v16357_v24 }
 0xc6f   :  { %14395 = vmatmul.mubr.f32.vlgmr.msra.gmra.mrb[46].mxu1 %v6230_v3  ;;  %14406 = vmatmul.mubr.f32.vlgmr.msra.gmra.mrb[72].mxu0 %v17111_v61 }
 0xc70   :  { %15624 = vmatpush3.bf16.msra.mxu1 %v16510_v51  ;;  %15630 = vmatpush3.bf16.msra.mxu0 %v16479_v36 }
 0xc71   :  { %15625 = vmatprep.subr.bf16.mxu1 %v16357_v24  ;;  %15631 = vmatprep.subr.bf16.mxu0 %v16357_v24 }
 0xc72   :  { %14416 = vmatprep.mubr.msk.f32.mxu1 %vm16358_vm2, %v16359_v46  ;;  %14427 = vmatprep.mubr.msk.f32.mxu0 %vm16358_vm2, %v16359_v46 }
 0xc74   :  { %15627 = vmatpush3.bf16.msra.mxu1 %v16517_v52  ;;  %15633 = vmatpush3.bf16.msra.mxu0 %v16486_v41 }
 0xc75   :  { %15634 = vmatprep.subr.bf16.mxu1 %v16357_v24  ;;  %15640 = vmatprep.subr.bf16.mxu0 %v16357_v24 }
 0xc77   :  { %14417 = vmatmul.mubr.f32.vlgmr.msra.gmra.mrb[48].mxu1 %v6227_v62  ;;  %14428 = vmatmul.mubr.f32.vlgmr.msra.gmra.mrb[74].mxu0 %v6228_v1 }
 0xc78   :  { %15636 = vmatpush3.bf16.msra.mxu1 %v16526_v53  ;;  %15642 = vmatpush3.bf16.msra.mxu0 %v16479_v36 }
 0xc79   :  { %15637 = vmatprep.subr.bf16.mxu1 %v16357_v24  ;;  %15643 = vmatprep.subr.bf16.mxu0 %v16357_v24 }
 0xc7a   :  { %14438 = vmatprep.mubr.msk.f32.mxu1 %vm16358_vm2, %v16359_v46  ;;  %14449 = vmatprep.mubr.msk.f32.mxu0 %vm16358_vm2, %v16359_v46 }
 0xc7c   :  { %15639 = vmatpush3.bf16.msra.mxu1 %v16534_v54  ;;  %15645 = vmatpush3.bf16.msra.mxu0 %v16486_v41 }
 0xc7d   :  { %15652 = vmatprep.subr.bf16.mxu0 %v16357_v24  ;;  %15646 = vmatprep.subr.bf16.mxu1 %v16357_v24 }
 0xc7f   :  { %14439 = vmatmul.mubr.f32.vlgmr.msra.gmra.mrb[50].mxu1 %v17111_v61  ;;  %14450 = vmatmul.mubr.f32.vlgmr.msra.gmra.mrb[76].mxu0 %v17111_v61 }
 0xc80   :  { %15654 = vmatpush3.bf16.msra.mxu0 %v16589_v4  ;;  %14471 = vmatprep.mubr.msk.f32.mxu0 %vm16358_vm2, %v16359_v46 }
 0xc81   :  { %15655 = vmatprep.subr.bf16.mxu0 %v16357_v24  ;;  %15648 = vmatpush3.bf16.msra.mxu1 %v16578_v38 }
 0xc82   :  { %15649 = vmatprep.subr.bf16.mxu1 %v16357_v24  ;;  %14460 = vmatprep.mubr.msk.f32.mxu1 %vm16358_vm2, %v16359_v46 }
 0xc84   :  { %15657 = vmatpush3.bf16.msra.mxu0 %v16593_v6 }
 0xc85   :  { %15664 = vmatprep.subr.bf16.mxu0 %v16357_v24  ;;  %15651 = vmatpush3.bf16.msra.mxu1 %v16581_v48 }
 0xc86   :  { %15658 = vmatprep.subr.bf16.mxu1 %v16357_v24 }
 0xcfa   :  { %v5741_v9 = vpop.f32.mrb[54].mxu0 }
 0xcfb   :  { %v14264_v59 = vpop.f32.mrb[55].mxu0 }
 0xd02   :  { %v5832_v10 = vpop.f32.mrb[56].mxu0 }
 0xd03   :  { %v5833_v21 = vadd.f32 %v5832_v10, %v5741_v9  ;;  %v14275_v11 = vpop.f32.mrb[57].mxu0  ;;  %v17202_v9 = vld [vmem:[%s17746_s6] ss:$0 sm:$0xff] }
 0xd0a   :  { %v5912_v12 = vpop.f32.mrb[58].mxu0 }
 0xd0b   :  { %v5913_v7 = vadd.f32 %v5912_v12, %v5833_v21  ;;  %v14286_v15 = vpop.f32.mrb[59].mxu0 }
 0xd12   :  { %v5989_v16 = vpop.f32.mrb[60].mxu0 }
 0xd13   :  { %v5990_v25 = vadd.f32 %v5989_v16, %v5913_v7  ;;  %v14297_v44 = vpop.f32.mrb[61].mxu0 }
 0xd1a   :  { %v6072_v32 = vpop.f32.mrb[62].mxu0 }
 0xd1b   :  { %v6073_v13 = vadd.f32 %v6072_v32, %v5990_v25  ;;  %v14308_v14 = vpop.f32.mrb[63].mxu0 }
 0xd22   :  { %v6147_v18 = vpop.f32.mrb[64].mxu0 }
 0xd23   :  { %v6148_v20 = vadd.f32 %v6147_v18, %v6073_v13  ;;  %v14319_v0 = vpop.f32.mrb[65].mxu0 }
 0xd2a   :  { %v6323_v27 = vpop.f32.mrb[66].mxu0  ;;  %v6232_v29 = vpop.f32.mrb[40].mxu1 }
 0xd2b   :  { %v6233_v40 = vadd.f32 %v6232_v29, %v6148_v20  ;;  %v14341_v43 = vpop.f32.mrb[67].mxu0  ;;  %v14330_v45 = vpop.f32.mrb[41].mxu1 }
 0xd2d   :  { %v6324_v22 = vadd.f32 %v6323_v27, %v6233_v40 }
 0xd32   :  { %v6403_v49 = vpop.f32.mrb[42].mxu1  ;;  %v6480_v55 = vpop.f32.mrb[68].mxu0 }
 0xd33   :  { %v6404_v56 = vadd.f32 %v6403_v49, %v6324_v22  ;;  %v14352_v57 = vpop.f32.mrb[43].mxu1  ;;  %v14363_v58 = vpop.f32.mrb[69].mxu0 }
 0xd35   :  { %v6481_v60 = vadd.f32 %v6480_v55, %v6404_v56 }
 0xd3a   :  { %v6563_v28 = vpop.f32.mrb[44].mxu1  ;;  %v6638_v61 = vpop.f32.mrb[70].mxu0 }
 0xd3b   :  { %v6564_v62 = vadd.f32 %v6563_v28, %v6481_v60  ;;  %v14374_v1 = vpop.f32.mrb[45].mxu1  ;;  %v14385_v2 = vpop.f32.mrb[71].mxu0 }
 0xd3d   :  { %v6639_v3 = vadd.f32 %v6638_v61, %v6564_v62 }
 0xd3f   :  { %v6642_v59 = vadd.f32 %v17202_v9, %v6639_v3 }
 0xd41   :  { %16183 = vtanh.f32 %v6642_v59  ;;  %v12817_v22 = vmul.f32 -1.442695, %v6642_v59 }
 0xd42   :  { %v6742_v10 = vpop.f32.mrb[46].mxu1  ;;  %v6833_v21 = vpop.f32.mrb[72].mxu0 }
 0xd43   :  { %v6834_v11 = vadd.f32 %v6833_v21, %v6742_v10  ;;  %v14396_v12 = vpop.f32.mrb[47].mxu1  ;;  %v14407_v7 = vpop.f32.mrb[73].mxu0 }
 0xd4a   :  { %v6913_v15 = vpop.f32.mrb[48].mxu1  ;;  %v6990_v16 = vpop.f32.mrb[74].mxu0 }
 0xd4b   :  { %v16184_v25 = vpop.eup %16183  ;;  %v6914_v44 = vadd.f32 %v6913_v15, %v6834_v11  ;;  %v14418_v32 = vpop.f32.mrb[49].mxu1  ;;  %v7161_v11 = vrot.slane %v17074_v19, 6 }
 0xd4c   :  { %v14429_v13 = vpop.f32.mrb[75].mxu0  ;;  %6652 = vrot.lane.b32.xlu0 %v16184_v25, %s16360_s3 }
 0xd4d   :  { %v6991_v14 = vadd.f32 %v6990_v16, %v6914_v44 }
 0xd52   :  { %v7073_v18 = vpop.f32.mrb[50].mxu1  ;;  %v7148_v20 = vpop.f32.mrb[76].mxu0 }
 0xd53   :  { %v7074_v0 = vadd.f32 %v7073_v18, %v6991_v14  ;;  %v14440_v27 = vpop.f32.mrb[51].mxu1  ;;  %v14451_v29 = vpop.f32.mrb[77].mxu0 }
 0xd55   :  { %v7149_v40 = vadd.f32 %v7148_v20, %v7074_v0 }
 0xd57   :  { %v7152_v43 = vadd.f32 %v16564_v5, %v7149_v40 }
 0xd59   :  { %16185 = vtanh.f32 %v7152_v43  ;;  %v12818_v56 = vmul.f32 -1.442695, %v7152_v43 }
 0xd5a   :  { %16187 = vpow2.f32 %v12817_v22 }
 0xd63   :  { %v16186_v45 = vpop.eup %16185 }
 0xd64   :  { %7165 = vrot.lane.b32.xlu1 %v16186_v45, %s16360_s3  ;;  %v16188_v49 = vpop.eup %16187 }
 0xd65   :  { %v6646_v55 = vadd.f32 1.0, %v16188_v49 }
 0xd67   :  { %16189 = vrcp.f32 %v6646_v55 }
 0xd68   :  { %16191 = vpow2.f32 %v12818_v56 }
 0xd71   :  { %v16190_v57 = vpop.eup %16189 }
 0xd72   :  { %v16192_v28 = vpop.eup %16191  ;;  %v6650_v3 = vmul.f32 %v16190_v57, %v17069_v26 }
 0xd73   :  { %v7156_v61 = vadd.f32 1.0, %v16192_v28 }
 0xd75   :  { %16193 = vrcp.f32 %v7156_v61 }
 0xd7f   :  { %v16194_v62 = vpop.eup %16193 }
 0xd80   :  { %v7163_v12 = vmul.f32 %v16194_v62, %v7161_v11 }
 0xdbe   :  { %v6653_v58 = vpop.permute.xlu0 %6652 }
 0xdbf   :  { %v6655_v60 = vmul.f32 %v16190_v57, %v6653_v58 }
 0xdc1   :  { %6657 = vrot.lane.b32.xlu0 %v6655_v60, %s16360_s3 }
 0xdd6   :  { %v7166_v1 = vpop.permute.xlu1 %7165 }
 0xdd7   :  { %v7168_v2 = vmul.f32 %v16194_v62, %v7166_v1 }
 0xdd9   :  { %7170 = vrot.lane.b32.xlu1 %v7168_v2, %s16360_s3 }
 0xe33   :  { %v6658_v59 = vpop.permute.xlu0 %6657 }
 0xe34   :  { %v17211_v10 = vadd.f32 %v6658_v59, %v6650_v3 }
 0xe36   :  { %16195 = vtanh.f32 %v17211_v10 }
 0xe40   :  { %v16196_v21 = vpop.eup %16195 }
 0xe41   :  { %6663 = vrot.lane.b32.xlu0 %v16196_v21, %s16360_s3 }
 0xe4b   :  { %v7171_v7 = vpop.permute.xlu1 %7170 }
 0xe4c   :  { %v17216_v15 = vadd.f32 %v7171_v7, %v7163_v12 }
 0xe4e   :  { %16197 = vtanh.f32 %v17216_v15 }
 0xe58   :  { %v16198_v16 = vpop.eup %16197 }
 0xe59   :  { %7176 = vrot.lane.b32.xlu1 %v16198_v16, %s16360_s3 }
 0xeb3   :  { %v6664_v26 = vpop.permute.xlu0 %6663 }
 0xeb4   :  { %v6666_v25 = vmul.f32 %v16190_v57, %v6664_v26 }
 0xeb6   :  { %7181 = vrot.lane.b32.xlu0 %v6666_v25, %s16361_s20 }
 0xecb   :  { %v7177_v44 = vpop.permute.xlu1 %7176 }
 0xecc   :  { %v7179_v32 = vmul.f32 %v16194_v62, %v7177_v44 }
 0xece   :  { %7671 = vrot.lane.b32.xlu1 %v7179_v32, %s16361_s20 }
 0xf28   :  { %v7182_v13 = vpop.permute.xlu0 %7181 }
 0xf29   :  { %v7183_v19 = vsel %vm581_vm3, %v7182_v13, 0 }
 0xf2a   :  { %v7254_v14 = vand.u32 4294901760, %v7183_v19 }
 0xf2c   :  { %v7255_v18 = vsub.f32 %v7183_v19, %v7254_v14  ;;  %14472 = vmatmul.mubr.f32.vlgmr.msra.gmra.mrb[78].mxu0 %v7254_v14 }
 0xf2d   :  { %15666 = vmatpush3.bf16.msra.mxu0 %v16578_v38  ;;  %14493 = vmatprep.mubr.msk.f32.mxu0 %vm16358_vm2, %v16359_v46 }
 0xf2e   :  { %v7256_v20 = vand.u32 4294901760, %v7255_v18  ;;  %15667 = vmatprep.subr.bf16.mxu0 %v16357_v24 }
 0xf30   :  { %v7257_v0 = vsub.f32 %v7255_v18, %v7256_v20 }
 0xf31   :  { %15669 = vmatpush3.bf16.msra.mxu0 %v16581_v48 }
 0xf32   :  { %v7258_v27 = vand.u32 4294901760, %v7257_v0  ;;  %15676 = vmatprep.subr.bf16.mxu0 %v16357_v24 }
 0xf34   :  { %14494 = vmatmul.mubr.f32.vlgmr.msra.gmra.mrb[80].mxu0 %v7256_v20  ;;  %14461 = vmatmul.mubr.f32.vlgmr.msra.gmra.mrb[52].mxu1 %v7258_v27 }
 0xf35   :  { %15660 = vmatpush3.bf16.msra.mxu1 %v16585_v63  ;;  %15678 = vmatpush3.bf16.msra.mxu0 %v16578_v38 }
 0xf36   :  { %15661 = vmatprep.subr.bf16.mxu1 %v16357_v24  ;;  %15679 = vmatprep.subr.bf16.mxu0 %v16357_v24 }
 0xf37   :  { %14482 = vmatprep.mubr.msk.f32.mxu1 %vm16358_vm2, %v16359_v46  ;;  %14515 = vmatprep.mubr.msk.f32.mxu0 %vm16358_vm2, %v16359_v46 }
 0xf39   :  { %15663 = vmatpush3.bf16.msra.mxu1 %v16596_v8  ;;  %15681 = vmatpush3.bf16.msra.mxu0 %v16581_v48 }
 0xf3a   :  { %15670 = vmatprep.subr.bf16.mxu1 %v16357_v24  ;;  %15688 = vmatprep.subr.bf16.mxu0 %v16357_v24 }
 0xf3c   :  { %14483 = vmatmul.mubr.f32.vlgmr.msra.gmra.mrb[54].mxu1 %v7255_v18  ;;  %14516 = vmatmul.mubr.f32.vlgmr.msra.gmra.mrb[82].mxu0 %v7254_v14 }
 0xf3d   :  { %15672 = vmatpush3.bf16.msra.mxu1 %v16610_v17  ;;  %15690 = vmatpush3.bf16.msra.mxu0 %v16663_v37 }
 0xf3e   :  { %15673 = vmatprep.subr.bf16.mxu1 %v16357_v24  ;;  %15691 = vmatprep.subr.bf16.mxu0 %v16357_v24 }
 0xf3f   :  { %14504 = vmatprep.mubr.msk.f32.mxu1 %vm16358_vm2, %v16359_v46  ;;  %14537 = vmatprep.mubr.msk.f32.mxu0 %vm16358_vm2, %v16359_v46 }
 0xf40   :  { %v7672_v29 = vpop.permute.xlu1 %7671 }
 0xf41   :  { %15675 = vmatpush3.bf16.msra.mxu1 %v16625_v23  ;;  %15693 = vmatpush3.bf16.msra.mxu0 %v16670_v42  ;;  %v7673_v40 = vsel %vm581_vm3, %v7672_v29, 0 }
 0xf42   :  { %v17252_v43 = vand.u32 4294901760, %v7673_v40  ;;  %15682 = vmatprep.subr.bf16.mxu1 %v16357_v24  ;;  %15700 = vmatprep.subr.bf16.mxu0 %v16357_v24 }
 0xf44   :  { %v7745_v45 = vsub.f32 %v7673_v40, %v17252_v43  ;;  %14505 = vmatmul.mubr.f32.vlgmr.msra.gmra.mrb[56].mxu1 %v7254_v14  ;;  %14538 = vmatmul.mubr.f32.vlgmr.msra.gmra.mrb[84].mxu0 %v17252_v43 }
 0xf45   :  { %15684 = vmatpush3.bf16.msra.mxu1 %v16641_v30  ;;  %15702 = vmatpush3.bf16.msra.mxu0 %v16641_v30 }
 0xf46   :  { %15685 = vmatprep.subr.bf16.mxu1 %v16357_v24  ;;  %15703 = vmatprep.subr.bf16.mxu0 %v16357_v24  ;;  %v7746_v22 = vand.u32 4294901760, %v7745_v45 }
 0xf47   :  { %14559 = vmatprep.mubr.msk.f32.mxu0 %vm16358_vm2, %v16359_v46  ;;  %14526 = vmatprep.mubr.msk.f32.mxu1 %vm16358_vm2, %v16359_v46 }
 0xf48   :  { %v7747_v49 = vsub.f32 %v7745_v45, %v7746_v22 }
 0xf49   :  { %15687 = vmatpush3.bf16.msra.mxu1 %v16656_v35  ;;  %15705 = vmatpush3.bf16.msra.mxu0 %v16656_v35 }
 0xf4a   :  { %15694 = vmatprep.subr.bf16.mxu1 %v16357_v24  ;;  %15712 = vmatprep.subr.bf16.mxu0 %v16357_v24  ;;  %v7748_v55 = vand.u32 4294901760, %v7747_v49 }
 0xf4c   :  { %14560 = vmatmul.mubr.f32.vlgmr.msra.gmra.mrb[86].mxu0 %v7746_v22  ;;  %14527 = vmatmul.mubr.f32.vlgmr.msra.gmra.mrb[58].mxu1 %v7748_v55 }
 0xf4d   :  { %15696 = vmatpush3.bf16.msra.mxu1 %v16693_v31  ;;  %15714 = vmatpush3.bf16.msra.mxu0 %v16641_v30 }
 0xf4e   :  { %15697 = vmatprep.subr.bf16.mxu1 %v16357_v24  ;;  %15715 = vmatprep.subr.bf16.mxu0 %v16357_v24 }
 0xf4f   :  { %14548 = vmatprep.mubr.msk.f32.mxu1 %vm16358_vm2, %v16359_v46  ;;  %14581 = vmatprep.mubr.msk.f32.mxu0 %vm16358_vm2, %v16359_v46 }
 0xf51   :  { %15699 = vmatpush3.bf16.msra.mxu1 %v16700_v33  ;;  %15717 = vmatpush3.bf16.msra.mxu0 %v16656_v35 }
 0xf52   :  { %15706 = vmatprep.subr.bf16.mxu1 %v16357_v24  ;;  %15754 = vmatprep.subr.bf16.mxu0 %v16357_v24 }
 0xf54   :  { %14549 = vmatmul.mubr.f32.vlgmr.msra.gmra.mrb[60].mxu1 %v7745_v45  ;;  %14582 = vmatmul.mubr.f32.vlgmr.msra.gmra.mrb[88].mxu0 %v17252_v43 }
 0xf55   :  { %15708 = vmatpush3.bf16.msra.mxu1 %v16714_v34  ;;  %14570 = vmatprep.mubr.msk.f32.mxu1 %vm16358_vm2, %v16359_v46 }
 0xf56   :  { %15709 = vmatprep.subr.bf16.mxu1 %v16357_v24  ;;  %15756 = vmatpush3.bf16.msra.mxu0 %v16578_v38 }
 0xf57   :  { %15757 = vmatprep.subr.bf16.mxu0 %v16357_v24  ;;  %14658 = vmatprep.mubr.msk.f32.mxu0 %vm16358_vm2, %v16359_v46 }
 0xf59   :  { %15711 = vmatpush3.bf16.msra.mxu1 %v16724_v39 }
 0xf5a   :  { %15718 = vmatprep.subr.bf16.mxu1 %v16357_v24  ;;  %15759 = vmatpush3.bf16.msra.mxu0 %v16581_v48 }
 0xf5b   :  { %15760 = vmatprep.subr.bf16.mxu0 %v16357_v24 }
 0xf5c   :  { %14571 = vmatmul.mubr.f32.vlgmr.msra.gmra.mrb[62].mxu1 %v17252_v43 }
 0xf5d   :  { %15720 = vmatpush3.bf16.msra.mxu1 %v16479_v36  ;;  %14592 = vmatprep.mubr.msk.f32.mxu1 %vm16358_vm2, %v16359_v46 }
 0xf5e   :  { %15721 = vmatprep.subr.bf16.mxu1 %v16357_v24 }
 0xf61   :  { %15723 = vmatpush3.bf16.msra.mxu1 %v16486_v41 }
 0xf62   :  { %15724 = vmatprep.subr.bf16.mxu1 %v16357_v24 }
 0xf64   :  { %14593 = vmatmul.mubr.f32.vlgmr.msra.gmra.mrb[64].mxu1 %v7748_v55 }
 0xf65   :  { %15726 = vmatpush3.bf16.msra.mxu1 %v16496_v47  ;;  %14603 = vmatprep.mubr.msk.f32.mxu1 %vm16358_vm2, %v16359_v46 }
 0xf66   :  { %15727 = vmatprep.subr.bf16.mxu1 %v16357_v24 }
 0xf69   :  { %15729 = vmatpush3.bf16.msra.mxu1 %v16502_v50 }
 0xf6a   :  { %15730 = vmatprep.subr.bf16.mxu1 %v16357_v24 }
 0xf6c   :  { %14604 = vmatmul.mubr.f32.vlgmr.msra.gmra.mrb[64].mxu1 %v17252_v43 }
 0xf6d   :  { %15732 = vmatpush3.bf16.msra.mxu1 %v16510_v51  ;;  %14614 = vmatprep.mubr.msk.f32.mxu1 %vm16358_vm2, %v16359_v46 }
 0xf6e   :  { %15733 = vmatprep.subr.bf16.mxu1 %v16357_v24 }
 0xf71   :  { %15735 = vmatpush3.bf16.msra.mxu1 %v16517_v52 }
 0xf72   :  { %15736 = vmatprep.subr.bf16.mxu1 %v16357_v24 }
 0xf74   :  { %14615 = vmatmul.mubr.f32.vlgmr.msra.gmra.mrb[64].mxu1 %v7745_v45 }
 0xf75   :  { %15738 = vmatpush3.bf16.msra.mxu1 %v16479_v36  ;;  %14625 = vmatprep.mubr.msk.f32.mxu1 %vm16358_vm2, %v16359_v46 }
 0xf76   :  { %15739 = vmatprep.subr.bf16.mxu1 %v16357_v24 }
 0xf79   :  { %15741 = vmatpush3.bf16.msra.mxu1 %v16486_v41 }
 0xf7a   :  { %15742 = vmatprep.subr.bf16.mxu1 %v16357_v24 }
 0xf7c   :  { %14626 = vmatmul.mubr.f32.vlgmr.msra.gmra.mrb[64].mxu1 %v7746_v22 }
 0xf7d   :  { %15744 = vmatpush3.bf16.msra.mxu1 %v16526_v53  ;;  %14636 = vmatprep.mubr.msk.f32.mxu1 %vm16358_vm2, %v16359_v46 }
 0xf7e   :  { %15745 = vmatprep.subr.bf16.mxu1 %v16357_v24 }
 0xf81   :  { %15747 = vmatpush3.bf16.msra.mxu1 %v16534_v54 }
 0xf82   :  { %15748 = vmatprep.subr.bf16.mxu1 %v16357_v24 }
 0xf84   :  { %14637 = vmatmul.mubr.f32.vlgmr.msra.gmra.mrb[64].mxu1 %v17252_v43 }
 0xf85   :  { %15750 = vmatpush3.bf16.msra.mxu1 %v16479_v36  ;;  %14647 = vmatprep.mubr.msk.f32.mxu1 %vm16358_vm2, %v16359_v46 }
 0xf86   :  { %15751 = vmatprep.subr.bf16.mxu1 %v16357_v24 }
 0xf89   :  { %15753 = vmatpush3.bf16.msra.mxu1 %v16486_v41 }
 0xf8a   :  { %15790 = vmatprep.subr.bf16.mxu1 %v16357_v24 }
 0xf8c   :  { %14648 = vmatmul.mubr.f32.vlgmr.msra.gmra.mrb[64].mxu1 %v17252_v43 }
 0xf8d   :  { %15792 = vmatpush3.bf16.msra.mxu1 %v16641_v30  ;;  %14724 = vmatprep.mubr.msk.f32.mxu1 %vm16358_vm2, %v16359_v46 }
 0xf8e   :  { %15793 = vmatprep.subr.bf16.mxu1 %v16357_v24 }
 0xf91   :  { %15795 = vmatpush3.bf16.msra.mxu1 %v16656_v35 }
 0xf92   :  { %15802 = vmatprep.subr.bf16.mxu1 %v16357_v24 }
 0xfff   :  { %v7351_v56 = vpop.f32.mrb[78].mxu0 }
0x1000   :  { %v14473_v57 = vpop.f32.mrb[79].mxu0 }
0x1007   :  { %v7508_v58 = vpop.f32.mrb[80].mxu0  ;;  %v7260_v60 = vpop.f32.mrb[52].mxu1 }
0x1008   :  { %v7352_v28 = vadd.f32 %v7351_v56, %v7260_v60  ;;  %v14495_v61 = vpop.f32.mrb[81].mxu0  ;;  %v14462_v62 = vpop.f32.mrb[53].mxu1 }
0x100f   :  { %v7431_v1 = vpop.f32.mrb[54].mxu1  ;;  %v7666_v2 = vpop.f32.mrb[82].mxu0 }
0x1010   :  { %v7432_v3 = vadd.f32 %v7431_v1, %v7352_v28  ;;  %v14484_v59 = vpop.f32.mrb[55].mxu1  ;;  %v14517_v21 = vpop.f32.mrb[83].mxu0 }
0x1012   :  { %v7509_v11 = vadd.f32 %v7508_v58, %v7432_v3 }
0x1017   :  { %v7591_v12 = vpop.f32.mrb[56].mxu1  ;;  %v7841_v7 = vpop.f32.mrb[84].mxu0 }
0x1018   :  { %v7592_v16 = vadd.f32 %v7591_v12, %v7509_v11  ;;  %v14506_v26 = vpop.f32.mrb[57].mxu1  ;;  %v14539_v25 = vpop.f32.mrb[85].mxu0 }
0x101a   :  { %v7667_v44 = vadd.f32 %v7666_v2, %v7592_v16 }
0x101f   :  { %v7998_v32 = vpop.f32.mrb[86].mxu0  ;;  %v7750_v13 = vpop.f32.mrb[58].mxu1 }
0x1020   :  { %v7751_v19 = vadd.f32 %v7750_v13, %v7667_v44  ;;  %v14561_v14 = vpop.f32.mrb[87].mxu0  ;;  %v14528_v18 = vpop.f32.mrb[59].mxu1 }
0x1022   :  { %v7842_v20 = vadd.f32 %v7841_v7, %v7751_v19 }
0x1027   :  { %v7921_v0 = vpop.f32.mrb[60].mxu1  ;;  %v8156_v27 = vpop.f32.mrb[88].mxu0 }
0x1028   :  { %v7922_v29 = vadd.f32 %v7921_v0, %v7842_v20  ;;  %v14550_v40 = vpop.f32.mrb[61].mxu1  ;;  %v14583_v43 = vpop.f32.mrb[89].mxu0  ;;  %v8682_v20 = vrot.slane %v17216_v15, 6 }
0x102a   :  { %v7999_v45 = vadd.f32 %v7998_v32, %v7922_v29 }
0x102f   :  { %v8081_v22 = vpop.f32.mrb[62].mxu1 }
0x1030   :  { %v8082_v49 = vadd.f32 %v8081_v22, %v7999_v45  ;;  %v14572_v55 = vpop.f32.mrb[63].mxu1 }
0x1032   :  { %v8157_v56 = vadd.f32 %v8156_v27, %v8082_v49 }
0x1034   :  { %v8160_v57 = vadd.f32 %v17202_v9, %v8157_v56 }
0x1036   :  { %16199 = vtanh.f32 %v8160_v57  ;;  %v12819_v2 = vmul.f32 -1.442695, %v8160_v57 }
0x1040   :  { %v16200_v58 = vpop.eup %16199 }
0x1041   :  { %8170 = vrot.lane.b32.xlu0 %v16200_v58, %s16360_s3 }
0x105f   :  { %v8666_v60 = vpop.f32.mrb[64].mxu1 }
0x1060   :  { %v8671_v28 = vrot.slane %v8666_v60, 6  ;;  %v14649_v61 = vpop.f32.mrb[65].mxu1 }
0x1062   :  { %v8673_v62 = vadd.f32 %v16564_v5, %v8671_v28 }
0x1064   :  { %16201 = vtanh.f32 %v8673_v62  ;;  %v12820_v7 = vmul.f32 -1.442695, %v8673_v62 }
0x1065   :  { %16203 = vpow2.f32 %v12819_v2 }
0x106e   :  { %v16202_v1 = vpop.eup %16201 }
0x106f   :  { %8686 = vrot.lane.b32.xlu1 %v16202_v1, %s16360_s3  ;;  %v16204_v3 = vpop.eup %16203 }
0x1070   :  { %v8164_v59 = vadd.f32 1.0, %v16204_v3 }
0x1072   :  { %16205 = vrcp.f32 %v8164_v59 }
0x1073   :  { %16207 = vpow2.f32 %v12820_v7 }
0x107c   :  { %v16206_v21 = vpop.eup %16205 }
0x107d   :  { %v16208_v16 = vpop.eup %16207  ;;  %v8168_v13 = vmul.f32 %v16206_v21, %v17211_v10 }
0x107e   :  { %v8677_v26 = vadd.f32 1.0, %v16208_v16 }
0x1080   :  { %16209 = vrcp.f32 %v8677_v26 }
0x108a   :  { %v16210_v25 = vpop.eup %16209 }
0x108b   :  { %v8684_v0 = vmul.f32 %v16210_v25, %v8682_v20 }
0x10b3   :  { %v8171_v11 = vpop.permute.xlu0 %8170 }
0x10b4   :  { %v8173_v12 = vmul.f32 %v16206_v21, %v8171_v11 }
0x10b6   :  { %8175 = vrot.lane.b32.xlu0 %v8173_v12, %s16360_s3 }
0x10e1   :  { %v8687_v44 = vpop.permute.xlu1 %8686 }
0x10e2   :  { %v8689_v32 = vmul.f32 %v16210_v25, %v8687_v44 }
0x10e4   :  { %8691 = vrot.lane.b32.xlu1 %v8689_v32, %s16360_s3 }
0x1128   :  { %v8176_v19 = vpop.permute.xlu0 %8175 }
0x1129   :  { %v17348_v14 = vadd.f32 %v8176_v19, %v8168_v13 }
0x112b   :  { %16211 = vtanh.f32 %v17348_v14 }
0x1135   :  { %v16212_v18 = vpop.eup %16211 }
0x1136   :  { %8181 = vrot.lane.b32.xlu0 %v16212_v18, %s16360_s3 }
0x1156   :  { %v8692_v27 = vpop.permute.xlu1 %8691 }
0x1157   :  { %v17353_v29 = vadd.f32 %v8692_v27, %v8684_v0 }
0x1159   :  { %16213 = vtanh.f32 %v17353_v29 }
0x1163   :  { %v16214_v40 = vpop.eup %16213 }
0x1164   :  { %8697 = vrot.lane.b32.xlu1 %v16214_v40, %s16360_s3 }
0x11a8   :  { %v8182_v10 = vpop.permute.xlu0 %8181 }
0x11a9   :  { %v8184_v43 = vmul.f32 %v16206_v21, %v8182_v10 }
0x11ab   :  { %8702 = vrot.lane.b32.xlu0 %v8184_v43, %s16361_s20 }
0x11d6   :  { %v8698_v45 = vpop.permute.xlu1 %8697 }
0x11d7   :  { %v8700_v22 = vmul.f32 %v16210_v25, %v8698_v45 }
0x11d9   :  { %v9192_v49 = vrot.slane %v8700_v22, 2 }
0x11db   :  { %9193 = vrot.lane.b32.xlu1 %v9192_v49, %s16361_s20 }
0x121d   :  { %v8703_v55 = vpop.permute.xlu0 %8702 }
0x121e   :  { %v8704_v15 = vsel %vm581_vm3, %v8703_v55, 0 }
0x121f   :  { %v8775_v56 = vand.u32 4294901760, %v8704_v15 }
0x1221   :  { %v8776_v57 = vsub.f32 %v8704_v15, %v8775_v56 }
0x1223   :  { %v8777_v58 = vand.u32 4294901760, %v8776_v57 }
0x1225   :  { %v8778_v60 = vsub.f32 %v8776_v57, %v8777_v58 }
0x1227   :  { %v8779_v28 = vand.u32 4294901760, %v8778_v60 }
0x1229   :  { %14659 = vmatmul.mubr.f32.vlgmr.msra.gmra.mrb[90].mxu0 %v8779_v28 }
0x122a   :  { %15762 = vmatpush3.bf16.msra.mxu0 %v16589_v4  ;;  %14669 = vmatprep.mubr.msk.f32.mxu0 %vm16358_vm2, %v16359_v46 }
0x122b   :  { %15763 = vmatprep.subr.bf16.mxu0 %v16357_v24 }
0x122e   :  { %15765 = vmatpush3.bf16.msra.mxu0 %v16593_v6 }
0x122f   :  { %15766 = vmatprep.subr.bf16.mxu0 %v16357_v24 }
0x1231   :  { %14670 = vmatmul.mubr.f32.vlgmr.msra.gmra.mrb[92].mxu0 %v8775_v56 }
0x1232   :  { %15768 = vmatpush3.bf16.msra.mxu0 %v16585_v63  ;;  %14680 = vmatprep.mubr.msk.f32.mxu0 %vm16358_vm2, %v16359_v46 }
0x1233   :  { %15769 = vmatprep.subr.bf16.mxu0 %v16357_v24 }
0x1236   :  { %15771 = vmatpush3.bf16.msra.mxu0 %v16596_v8 }
0x1237   :  { %15772 = vmatprep.subr.bf16.mxu0 %v16357_v24 }
0x1239   :  { %14681 = vmatmul.mubr.f32.vlgmr.msra.gmra.mrb[94].mxu0 %v8776_v57 }
0x123a   :  { %15774 = vmatpush3.bf16.msra.mxu0 %v16578_v38  ;;  %14691 = vmatprep.mubr.msk.f32.mxu0 %vm16358_vm2, %v16359_v46 }
0x123b   :  { %15775 = vmatprep.subr.bf16.mxu0 %v16357_v24 }
0x123e   :  { %15777 = vmatpush3.bf16.msra.mxu0 %v16581_v48 }
0x123f   :  { %15778 = vmatprep.subr.bf16.mxu0 %v16357_v24 }
0x1241   :  { %14692 = vmatmul.mubr.f32.vlgmr.msra.gmra.mrb[96].mxu0 %v8777_v58 }
0x1242   :  { %15780 = vmatpush3.bf16.msra.mxu0 %v16610_v17  ;;  %14702 = vmatprep.mubr.msk.f32.mxu0 %vm16358_vm2, %v16359_v46 }
0x1243   :  { %15781 = vmatprep.subr.bf16.mxu0 %v16357_v24 }
0x1246   :  { %15783 = vmatpush3.bf16.msra.mxu0 %v16625_v23 }
0x1247   :  { %15784 = vmatprep.subr.bf16.mxu0 %v16357_v24 }
0x1249   :  { %14703 = vmatmul.mubr.f32.vlgmr.msra.gmra.mrb[98].mxu0 %v8775_v56 }
0x124a   :  { %15786 = vmatpush3.bf16.msra.mxu0 %v16578_v38  ;;  %14713 = vmatprep.mubr.msk.f32.mxu0 %vm16358_vm2, %v16359_v46 }
0x124b   :  { %15787 = vmatprep.subr.bf16.mxu0 %v16357_v24 }
0x124d   :  { %v9194_v61 = vpop.permute.xlu1 %9193 }
0x124e   :  { %15789 = vmatpush3.bf16.msra.mxu0 %v16581_v48  ;;  %v9195_v62 = vsel %vm581_vm3, %v9194_v61, 0 }
0x124f   :  { %v17390_v1 = vand.u32 4294901760, %v9195_v62  ;;  %15796 = vmatprep.subr.bf16.mxu0 %v16357_v24 }
0x1251   :  { %v9267_v2 = vsub.f32 %v9195_v62, %v17390_v1  ;;  %14714 = vmatmul.mubr.f32.vlgmr.msra.gmra.mrb[100].mxu0 %v8775_v56 }
0x1252   :  { %15798 = vmatpush3.bf16.msra.mxu0 %v16663_v37  ;;  %14735 = vmatprep.mubr.msk.f32.mxu0 %vm16358_vm2, %v16359_v46 }
0x1253   :  { %v9268_v3 = vand.u32 4294901760, %v9267_v2  ;;  %15799 = vmatprep.subr.bf16.mxu0 %v16357_v24 }
0x1255   :  { %v9269_v59 = vsub.f32 %v9267_v2, %v9268_v3 }
0x1256   :  { %15801 = vmatpush3.bf16.msra.mxu0 %v16670_v42 }
0x1257   :  { %15808 = vmatprep.subr.bf16.mxu0 %v16357_v24  ;;  %v9270_v21 = vand.u32 4294901760, %v9269_v59 }
0x1259   :  { %14736 = vmatmul.mubr.f32.vlgmr.msra.gmra.mrb[102].mxu0 %v17390_v1  ;;  %14725 = vmatmul.mubr.f32.vlgmr.msra.gmra.mrb[66].mxu1 %v9270_v21 }
0x125a   :  { %15804 = vmatpush3.bf16.msra.mxu1 %v16693_v31  ;;  %15810 = vmatpush3.bf16.msra.mxu0 %v16641_v30 }
0x125b   :  { %15805 = vmatprep.subr.bf16.mxu1 %v16357_v24  ;;  %15811 = vmatprep.subr.bf16.mxu0 %v16357_v24 }
0x125c   :  { %14746 = vmatprep.mubr.msk.f32.mxu1 %vm16358_vm2, %v16359_v46  ;;  %14757 = vmatprep.mubr.msk.f32.mxu0 %vm16358_vm2, %v16359_v46 }
0x125e   :  { %15807 = vmatpush3.bf16.msra.mxu1 %v16700_v33  ;;  %15813 = vmatpush3.bf16.msra.mxu0 %v16656_v35 }
0x125f   :  { %15814 = vmatprep.subr.bf16.mxu1 %v16357_v24  ;;  %15820 = vmatprep.subr.bf16.mxu0 %v16357_v24 }
0x1261   :  { %14747 = vmatmul.mubr.f32.vlgmr.msra.gmra.mrb[68].mxu1 %v9267_v2  ;;  %14758 = vmatmul.mubr.f32.vlgmr.msra.gmra.mrb[104].mxu0 %v9268_v3 }
0x1262   :  { %15816 = vmatpush3.bf16.msra.mxu1 %v16714_v34  ;;  %15822 = vmatpush3.bf16.msra.mxu0 %v16641_v30 }
0x1263   :  { %15817 = vmatprep.subr.bf16.mxu1 %v16357_v24  ;;  %15823 = vmatprep.subr.bf16.mxu0 %v16357_v24 }
0x1264   :  { %14768 = vmatprep.mubr.msk.f32.mxu1 %vm16358_vm2, %v16359_v46  ;;  %14779 = vmatprep.mubr.msk.f32.mxu0 %vm16358_vm2, %v16359_v46 }
0x1266   :  { %15819 = vmatpush3.bf16.msra.mxu1 %v16724_v39  ;;  %15825 = vmatpush3.bf16.msra.mxu0 %v16656_v35 }
0x1267   :  { %15826 = vmatprep.subr.bf16.mxu1 %v16357_v24  ;;  %15862 = vmatprep.subr.bf16.mxu0 %v16357_v24 }
0x1269   :  { %14769 = vmatmul.mubr.f32.vlgmr.msra.gmra.mrb[70].mxu1 %v17390_v1  ;;  %14780 = vmatmul.mubr.f32.vlgmr.msra.gmra.mrb[106].mxu0 %v17390_v1 }
0x126a   :  { %15828 = vmatpush3.bf16.msra.mxu1 %v16479_v36  ;;  %14790 = vmatprep.mubr.msk.f32.mxu1 %vm16358_vm2, %v16359_v46 }
0x126b   :  { %15829 = vmatprep.subr.bf16.mxu1 %v16357_v24  ;;  %15864 = vmatpush3.bf16.msra.mxu0 %v16578_v38 }
0x126c   :  { %15865 = vmatprep.subr.bf16.mxu0 %v16357_v24  ;;  %14856 = vmatprep.mubr.msk.f32.mxu0 %vm16358_vm2, %v16359_v46 }
0x126e   :  { %15831 = vmatpush3.bf16.msra.mxu1 %v16486_v41 }
0x126f   :  { %15832 = vmatprep.subr.bf16.mxu1 %v16357_v24  ;;  %15867 = vmatpush3.bf16.msra.mxu0 %v16581_v48 }
0x1270   :  { %15868 = vmatprep.subr.bf16.mxu0 %v16357_v24 }
0x1271   :  { %14791 = vmatmul.mubr.f32.vlgmr.msra.gmra.mrb[72].mxu1 %v9270_v21 }
0x1272   :  { %15834 = vmatpush3.bf16.msra.mxu1 %v16496_v47  ;;  %14801 = vmatprep.mubr.msk.f32.mxu1 %vm16358_vm2, %v16359_v46 }
0x1273   :  { %15835 = vmatprep.subr.bf16.mxu1 %v16357_v24 }
0x1276   :  { %15837 = vmatpush3.bf16.msra.mxu1 %v16502_v50 }
0x1277   :  { %15838 = vmatprep.subr.bf16.mxu1 %v16357_v24 }
0x1279   :  { %14802 = vmatmul.mubr.f32.vlgmr.msra.gmra.mrb[72].mxu1 %v17390_v1 }
0x127a   :  { %15840 = vmatpush3.bf16.msra.mxu1 %v16510_v51  ;;  %14812 = vmatprep.mubr.msk.f32.mxu1 %vm16358_vm2, %v16359_v46 }
0x127b   :  { %15841 = vmatprep.subr.bf16.mxu1 %v16357_v24 }
0x127e   :  { %15843 = vmatpush3.bf16.msra.mxu1 %v16517_v52 }
0x127f   :  { %15844 = vmatprep.subr.bf16.mxu1 %v16357_v24 }
0x1281   :  { %14813 = vmatmul.mubr.f32.vlgmr.msra.gmra.mrb[72].mxu1 %v9267_v2 }
0x1282   :  { %15846 = vmatpush3.bf16.msra.mxu1 %v16479_v36  ;;  %14823 = vmatprep.mubr.msk.f32.mxu1 %vm16358_vm2, %v16359_v46 }
0x1283   :  { %15847 = vmatprep.subr.bf16.mxu1 %v16357_v24 }
0x1286   :  { %15849 = vmatpush3.bf16.msra.mxu1 %v16486_v41 }
0x1287   :  { %15850 = vmatprep.subr.bf16.mxu1 %v16357_v24 }
0x1289   :  { %14824 = vmatmul.mubr.f32.vlgmr.msra.gmra.mrb[72].mxu1 %v9268_v3 }
0x128a   :  { %15852 = vmatpush3.bf16.msra.mxu1 %v16526_v53  ;;  %14834 = vmatprep.mubr.msk.f32.mxu1 %vm16358_vm2, %v16359_v46 }
0x128b   :  { %15853 = vmatprep.subr.bf16.mxu1 %v16357_v24 }
0x128e   :  { %15855 = vmatpush3.bf16.msra.mxu1 %v16534_v54 }
0x128f   :  { %15856 = vmatprep.subr.bf16.mxu1 %v16357_v24 }
0x1291   :  { %14835 = vmatmul.mubr.f32.vlgmr.msra.gmra.mrb[72].mxu1 %v17390_v1 }
0x1292   :  { %15858 = vmatpush3.bf16.msra.mxu1 %v16479_v36  ;;  %14845 = vmatprep.mubr.msk.f32.mxu1 %vm16358_vm2, %v16359_v46 }
0x1293   :  { %15859 = vmatprep.subr.bf16.mxu1 %v16357_v24 }
0x1296   :  { %15861 = vmatpush3.bf16.msra.mxu1 %v16486_v41 }
0x1297   :  { %15898 = vmatprep.subr.bf16.mxu1 %v16357_v24 }
0x1299   :  { %14846 = vmatmul.mubr.f32.vlgmr.msra.gmra.mrb[72].mxu1 %v17390_v1 }
0x129a   :  { %15900 = vmatpush3.bf16.msra.mxu1 %v16641_v30  ;;  %14922 = vmatprep.mubr.msk.f32.mxu1 %vm16358_vm2, %v16359_v46 }
0x129b   :  { %15901 = vmatprep.subr.bf16.mxu1 %v16357_v24 }
0x129e   :  { %15903 = vmatpush3.bf16.msra.mxu1 %v16656_v35 }
0x129f   :  { %15910 = vmatprep.subr.bf16.mxu1 %v16357_v24 }
0x12fc   :  { %v8781_v11 = vpop.f32.mrb[90].mxu0 }
0x12fd   :  { %v14660_v12 = vpop.f32.mrb[91].mxu0 }
0x1304   :  { %v8872_v7 = vpop.f32.mrb[92].mxu0 }
0x1305   :  { %v8873_v16 = vadd.f32 %v8872_v7, %v8781_v11  ;;  %v14671_v26 = vpop.f32.mrb[93].mxu0 }
0x130c   :  { %v8952_v25 = vpop.f32.mrb[94].mxu0 }
0x130d   :  { %v8953_v44 = vadd.f32 %v8952_v25, %v8873_v16  ;;  %v14682_v32 = vpop.f32.mrb[95].mxu0 }
0x1314   :  { %v9029_v13 = vpop.f32.mrb[96].mxu0 }
0x1315   :  { %v9030_v19 = vadd.f32 %v9029_v13, %v8953_v44  ;;  %v14693_v18 = vpop.f32.mrb[97].mxu0 }
0x131c   :  { %v9112_v20 = vpop.f32.mrb[98].mxu0 }
0x131d   :  { %v9113_v0 = vadd.f32 %v9112_v20, %v9030_v19  ;;  %v14704_v27 = vpop.f32.mrb[99].mxu0 }
0x1324   :  { %v9187_v40 = vpop.f32.mrb[100].mxu0 }
0x1325   :  { %v9188_v10 = vadd.f32 %v9187_v40, %v9113_v0  ;;  %v14715_v43 = vpop.f32.mrb[101].mxu0 }
0x132c   :  { %v9363_v45 = vpop.f32.mrb[102].mxu0  ;;  %v9272_v22 = vpop.f32.mrb[66].mxu1 }
0x132d   :  { %v9273_v49 = vadd.f32 %v9272_v22, %v9188_v10  ;;  %v14737_v55 = vpop.f32.mrb[103].mxu0  ;;  %v14726_v15 = vpop.f32.mrb[67].mxu1 }
0x132f   :  { %v9364_v56 = vadd.f32 %v9363_v45, %v9273_v49 }
0x1334   :  { %v9443_v57 = vpop.f32.mrb[68].mxu1  ;;  %v9520_v58 = vpop.f32.mrb[104].mxu0 }
0x1335   :  { %v9444_v60 = vadd.f32 %v9443_v57, %v9364_v56  ;;  %v14748_v28 = vpop.f32.mrb[69].mxu1  ;;  %v14759_v61 = vpop.f32.mrb[105].mxu0  ;;  %v10204_v57 = vrot.slane %v17353_v29, 6 }
0x1337   :  { %v9521_v62 = vadd.f32 %v9520_v58, %v9444_v60 }
0x133c   :  { %v9603_v1 = vpop.f32.mrb[70].mxu1  ;;  %v9678_v2 = vpop.f32.mrb[106].mxu0 }
0x133d   :  { %v9604_v3 = vadd.f32 %v9603_v1, %v9521_v62  ;;  %v14770_v59 = vpop.f32.mrb[71].mxu1  ;;  %v14781_v21 = vpop.f32.mrb[107].mxu0 }
0x133f   :  { %v9679_v11 = vadd.f32 %v9678_v2, %v9604_v3 }
0x1341   :  { %v9682_v12 = vadd.f32 %v17202_v9, %v9679_v11 }
0x1343   :  { %16215 = vtanh.f32 %v9682_v12  ;;  %v12821_v13 = vmul.f32 -1.442695, %v9682_v12 }
0x134d   :  { %v16216_v7 = vpop.eup %16215 }
0x134e   :  { %9692 = vrot.lane.b32.xlu0 %v16216_v7, %s16360_s3 }
0x136c   :  { %v10188_v16 = vpop.f32.mrb[72].mxu1 }
0x136d   :  { %v10193_v26 = vrot.slane %v10188_v16, 4  ;;  %v14847_v25 = vpop.f32.mrb[73].mxu1 }
0x136f   :  { %v10195_v44 = vadd.f32 %v16564_v5, %v10193_v26 }
0x1371   :  { %16217 = vtanh.f32 %v10195_v44  ;;  %v12822_v27 = vmul.f32 -1.442695, %v10195_v44 }
0x1372   :  { %16219 = vpow2.f32 %v12821_v13 }
0x137b   :  { %v16218_v32 = vpop.eup %16217 }
0x137c   :  { %10208 = vrot.lane.b32.xlu1 %v16218_v32, %s16360_s3  ;;  %v16220_v19 = vpop.eup %16219 }
0x137d   :  { %v9686_v18 = vadd.f32 1.0, %v16220_v19 }
0x137f   :  { %16221 = vrcp.f32 %v9686_v18 }
0x1380   :  { %16223 = vpow2.f32 %v12822_v27 }
0x1389   :  { %v16222_v20 = vpop.eup %16221 }
0x138a   :  { %v16224_v40 = vpop.eup %16223  ;;  %v9690_v49 = vmul.f32 %v16222_v20, %v17348_v14 }
0x138b   :  { %v10199_v10 = vadd.f32 1.0, %v16224_v40 }
0x138d   :  { %16225 = vrcp.f32 %v10199_v10 }
0x1397   :  { %v16226_v43 = vpop.eup %16225 }
0x1398   :  { %v10206_v58 = vmul.f32 %v16226_v43, %v10204_v57 }
0x13c0   :  { %v9693_v9 = vpop.permute.xlu0 %9692 }
0x13c1   :  { %v9695_v0 = vmul.f32 %v16222_v20, %v9693_v9 }
0x13c3   :  { %9697 = vrot.lane.b32.xlu0 %v9695_v0, %s16360_s3 }
0x13ee   :  { %v10209_v45 = vpop.permute.xlu1 %10208 }
0x13ef   :  { %v10211_v22 = vmul.f32 %v16226_v43, %v10209_v45 }
0x13f1   :  { %10213 = vrot.lane.b32.xlu1 %v10211_v22, %s16360_s3 }
0x1435   :  { %v9698_v55 = vpop.permute.xlu0 %9697 }
0x1436   :  { %v17485_v15 = vadd.f32 %v9698_v55, %v9690_v49 }
0x1438   :  { %16227 = vtanh.f32 %v17485_v15 }
0x1442   :  { %v16228_v56 = vpop.eup %16227 }
0x1443   :  { %9703 = vrot.lane.b32.xlu0 %v16228_v56, %s16360_s3 }
0x1463   :  { %v10214_v60 = vpop.permute.xlu1 %10213 }
0x1464   :  { %v17490_v28 = vadd.f32 %v10214_v60, %v10206_v58 }
0x1466   :  { %16229 = vtanh.f32 %v17490_v28 }
0x1470   :  { %v16230_v61 = vpop.eup %16229 }
0x1471   :  { %10219 = vrot.lane.b32.xlu1 %v16230_v61, %s16360_s3 }
0x14b5   :  { %v9704_v14 = vpop.permute.xlu0 %9703 }
0x14b6   :  { %v9706_v62 = vmul.f32 %v16222_v20, %v9704_v14 }
0x14b8   :  { %10224 = vrot.lane.b32.xlu0 %v9706_v62, %s16361_s20 }
0x14e3   :  { %v10220_v1 = vpop.permute.xlu1 %10219 }
0x14e4   :  { %v10222_v2 = vmul.f32 %v16226_v43, %v10220_v1 }
0x14e6   :  { %v10714_v3 = vrot.slane %v10222_v2, 4 }
0x14e8   :  { %10715 = vrot.lane.b32.xlu1 %v10714_v3, %s16361_s20 }
0x152a   :  { %v10225_v59 = vpop.permute.xlu0 %10224 }
0x152b   :  { %v10226_v29 = vsel %vm581_vm3, %v10225_v59, 0 }
0x152c   :  { %v10297_v21 = vand.u32 4294901760, %v10226_v29 }
0x152e   :  { %v10298_v11 = vsub.f32 %v10226_v29, %v10297_v21 }
0x1530   :  { %v10299_v12 = vand.u32 4294901760, %v10298_v11 }
0x1532   :  { %v10300_v7 = vsub.f32 %v10298_v11, %v10299_v12 }
0x1534   :  { %v10301_v16 = vand.u32 4294901760, %v10300_v7 }
0x1536   :  { %14857 = vmatmul.mubr.f32.vlgmr.msra.gmra.mrb[108].mxu0 %v10301_v16  ;;  %v17618_v16 = vld [vmem:[%s17746_s6] ss:$0 sm:$0xff]  ;;  %s16362_s6 = smov 96  }
0x1537   :  { %15870 = vmatpush3.bf16.msra.mxu0 %v16589_v4  ;;  %14867 = vmatprep.mubr.msk.f32.mxu0 %vm16358_vm2, %v16359_v46 }
0x1538   :  { %15871 = vmatprep.subr.bf16.mxu0 %v16357_v24 }
0x153b   :  { %15873 = vmatpush3.bf16.msra.mxu0 %v16593_v6 }
0x153c   :  { %15874 = vmatprep.subr.bf16.mxu0 %v16357_v24 }
0x153e   :  { %14868 = vmatmul.mubr.f32.vlgmr.msra.gmra.mrb[110].mxu0 %v10297_v21 }
0x153f   :  { %15876 = vmatpush3.bf16.msra.mxu0 %v16585_v63  ;;  %14878 = vmatprep.mubr.msk.f32.mxu0 %vm16358_vm2, %v16359_v46 }
0x1540   :  { %15877 = vmatprep.subr.bf16.mxu0 %v16357_v24 }
0x1543   :  { %15879 = vmatpush3.bf16.msra.mxu0 %v16596_v8 }
0x1544   :  { %15880 = vmatprep.subr.bf16.mxu0 %v16357_v24 }
0x1546   :  { %14879 = vmatmul.mubr.f32.vlgmr.msra.gmra.mrb[112].mxu0 %v10298_v11 }
0x1547   :  { %15882 = vmatpush3.bf16.msra.mxu0 %v16578_v38  ;;  %14889 = vmatprep.mubr.msk.f32.mxu0 %vm16358_vm2, %v16359_v46 }
0x1548   :  { %15883 = vmatprep.subr.bf16.mxu0 %v16357_v24 }
0x154b   :  { %15885 = vmatpush3.bf16.msra.mxu0 %v16581_v48 }
0x154c   :  { %15886 = vmatprep.subr.bf16.mxu0 %v16357_v24 }
0x154e   :  { %14890 = vmatmul.mubr.f32.vlgmr.msra.gmra.mrb[114].mxu0 %v10299_v12 }
0x154f   :  { %15888 = vmatpush3.bf16.msra.mxu0 %v16610_v17  ;;  %14900 = vmatprep.mubr.msk.f32.mxu0 %vm16358_vm2, %v16359_v46 }
0x1550   :  { %15889 = vmatprep.subr.bf16.mxu0 %v16357_v24 }
0x1553   :  { %15891 = vmatpush3.bf16.msra.mxu0 %v16625_v23 }
0x1554   :  { %15892 = vmatprep.subr.bf16.mxu0 %v16357_v24 }
0x1556   :  { %14901 = vmatmul.mubr.f32.vlgmr.msra.gmra.mrb[116].mxu0 %v10297_v21 }
0x1557   :  { %15894 = vmatpush3.bf16.msra.mxu0 %v16578_v38  ;;  %14911 = vmatprep.mubr.msk.f32.mxu0 %vm16358_vm2, %v16359_v46 }
0x1558   :  { %15895 = vmatprep.subr.bf16.mxu0 %v16357_v24 }
0x155a   :  { %v10716_v26 = vpop.permute.xlu1 %10715 }
0x155b   :  { %15897 = vmatpush3.bf16.msra.mxu0 %v16581_v48  ;;  %v10717_v25 = vsel %vm581_vm3, %v10716_v26, 0 }
0x155c   :  { %v17527_v44 = vand.u32 4294901760, %v10717_v25  ;;  %15904 = vmatprep.subr.bf16.mxu0 %v16357_v24 }
0x155e   :  { %v10789_v32 = vsub.f32 %v10717_v25, %v17527_v44  ;;  %14912 = vmatmul.mubr.f32.vlgmr.msra.gmra.mrb[118].mxu0 %v10297_v21 }
0x155f   :  { %15906 = vmatpush3.bf16.msra.mxu0 %v16663_v37  ;;  %14933 = vmatprep.mubr.msk.f32.mxu0 %vm16358_vm2, %v16359_v46 }
0x1560   :  { %v10790_v13 = vand.u32 4294901760, %v10789_v32  ;;  %15907 = vmatprep.subr.bf16.mxu0 %v16357_v24 }
0x1562   :  { %v10791_v19 = vsub.f32 %v10789_v32, %v10790_v13 }
0x1563   :  { %15909 = vmatpush3.bf16.msra.mxu0 %v16670_v42 }
0x1564   :  { %15916 = vmatprep.subr.bf16.mxu0 %v16357_v24  ;;  %v10792_v18 = vand.u32 4294901760, %v10791_v19 }
0x1566   :  { %14934 = vmatmul.mubr.f32.vlgmr.msra.gmra.mrb[120].mxu0 %v17527_v44  ;;  %14923 = vmatmul.mubr.f32.vlgmr.msra.gmra.mrb[74].mxu1 %v10792_v18 }
0x1567   :  { %15912 = vmatpush3.bf16.msra.mxu1 %v16693_v31  ;;  %15918 = vmatpush3.bf16.msra.mxu0 %v16641_v30 }
0x1568   :  { %15913 = vmatprep.subr.bf16.mxu1 %v16357_v24  ;;  %15919 = vmatprep.subr.bf16.mxu0 %v16357_v24 }
0x1569   :  { %14944 = vmatprep.mubr.msk.f32.mxu1 %vm16358_vm2, %v16359_v46  ;;  %14955 = vmatprep.mubr.msk.f32.mxu0 %vm16358_vm2, %v16359_v46 }
0x156b   :  { %15915 = vmatpush3.bf16.msra.mxu1 %v16700_v33  ;;  %15921 = vmatpush3.bf16.msra.mxu0 %v16656_v35 }
0x156c   :  { %15922 = vmatprep.subr.bf16.mxu1 %v16357_v24  ;;  %15928 = vmatprep.subr.bf16.mxu0 %v16357_v24 }
0x156e   :  { %14945 = vmatmul.mubr.f32.vlgmr.msra.gmra.mrb[76].mxu1 %v10789_v32  ;;  %14956 = vmatmul.mubr.f32.vlgmr.msra.gmra.mrb[122].mxu0 %v10790_v13 }
0x156f   :  { %15924 = vmatpush3.bf16.msra.mxu1 %v16714_v34  ;;  %15930 = vmatpush3.bf16.msra.mxu0 %v16641_v30 }
0x1570   :  { %15925 = vmatprep.subr.bf16.mxu1 %v16357_v24  ;;  %15931 = vmatprep.subr.bf16.mxu0 %v16357_v24 }
0x1571   :  { %14966 = vmatprep.mubr.msk.f32.mxu1 %vm16358_vm2, %v16359_v46  ;;  %14977 = vmatprep.mubr.msk.f32.mxu0 %vm16358_vm2, %v16359_v46 }
0x1573   :  { %15927 = vmatpush3.bf16.msra.mxu1 %v16724_v39  ;;  %15933 = vmatpush3.bf16.msra.mxu0 %v16656_v35 }
0x1574   :  { %15934 = vmatprep.subr.bf16.mxu1 %v16357_v24  ;;  %15970 = vmatprep.subr.bf16.mxu0 %v16357_v24 }
0x1576   :  { %14967 = vmatmul.mubr.f32.vlgmr.msra.gmra.mrb[78].mxu1 %v17527_v44  ;;  %14978 = vmatmul.mubr.f32.vlgmr.msra.gmra.mrb[124].mxu0 %v17527_v44 }
0x1577   :  { %15936 = vmatpush3.bf16.msra.mxu1 %v16479_v36  ;;  %14988 = vmatprep.mubr.msk.f32.mxu1 %vm16358_vm2, %v16359_v46 }
0x1578   :  { %15937 = vmatprep.subr.bf16.mxu1 %v16357_v24  ;;  %15972 = vmatpush3.bf16.msra.mxu0 %v16578_v38 }
0x1579   :  { %15973 = vmatprep.subr.bf16.mxu0 %v16357_v24  ;;  %15054 = vmatprep.mubr.msk.f32.mxu0 %vm16358_vm2, %v16359_v46 }
0x157b   :  { %15939 = vmatpush3.bf16.msra.mxu1 %v16486_v41 }
0x157c   :  { %15940 = vmatprep.subr.bf16.mxu1 %v16357_v24  ;;  %15975 = vmatpush3.bf16.msra.mxu0 %v16581_v48 }
0x157d   :  { %15976 = vmatprep.subr.bf16.mxu0 %v16357_v24 }
0x157e   :  { %14989 = vmatmul.mubr.f32.vlgmr.msra.gmra.mrb[80].mxu1 %v10792_v18 }
0x157f   :  { %15942 = vmatpush3.bf16.msra.mxu1 %v16496_v47  ;;  %14999 = vmatprep.mubr.msk.f32.mxu1 %vm16358_vm2, %v16359_v46 }
0x1580   :  { %15943 = vmatprep.subr.bf16.mxu1 %v16357_v24 }
0x1583   :  { %15945 = vmatpush3.bf16.msra.mxu1 %v16502_v50 }
0x1584   :  { %15946 = vmatprep.subr.bf16.mxu1 %v16357_v24 }
0x1586   :  { %15000 = vmatmul.mubr.f32.vlgmr.msra.gmra.mrb[80].mxu1 %v17527_v44 }
0x1587   :  { %15948 = vmatpush3.bf16.msra.mxu1 %v16510_v51  ;;  %15010 = vmatprep.mubr.msk.f32.mxu1 %vm16358_vm2, %v16359_v46 }
0x1588   :  { %15949 = vmatprep.subr.bf16.mxu1 %v16357_v24 }
0x158b   :  { %15951 = vmatpush3.bf16.msra.mxu1 %v16517_v52 }
0x158c   :  { %15952 = vmatprep.subr.bf16.mxu1 %v16357_v24 }
0x158e   :  { %15011 = vmatmul.mubr.f32.vlgmr.msra.gmra.mrb[80].mxu1 %v10789_v32 }
0x158f   :  { %15954 = vmatpush3.bf16.msra.mxu1 %v16479_v36  ;;  %15021 = vmatprep.mubr.msk.f32.mxu1 %vm16358_vm2, %v16359_v46 }
0x1590   :  { %15955 = vmatprep.subr.bf16.mxu1 %v16357_v24 }
0x1593   :  { %15957 = vmatpush3.bf16.msra.mxu1 %v16486_v41 }
0x1594   :  { %15958 = vmatprep.subr.bf16.mxu1 %v16357_v24 }
0x1596   :  { %15022 = vmatmul.mubr.f32.vlgmr.msra.gmra.mrb[80].mxu1 %v10790_v13 }
0x1597   :  { %15960 = vmatpush3.bf16.msra.mxu1 %v16526_v53  ;;  %15032 = vmatprep.mubr.msk.f32.mxu1 %vm16358_vm2, %v16359_v46 }
0x1598   :  { %15961 = vmatprep.subr.bf16.mxu1 %v16357_v24 }
0x159b   :  { %15963 = vmatpush3.bf16.msra.mxu1 %v16534_v54 }
0x159c   :  { %15964 = vmatprep.subr.bf16.mxu1 %v16357_v24 }
0x159e   :  { %15033 = vmatmul.mubr.f32.vlgmr.msra.gmra.mrb[80].mxu1 %v17527_v44 }
0x159f   :  { %15966 = vmatpush3.bf16.msra.mxu1 %v16479_v36  ;;  %15043 = vmatprep.mubr.msk.f32.mxu1 %vm16358_vm2, %v16359_v46 }
0x15a0   :  { %15967 = vmatprep.subr.bf16.mxu1 %v16357_v24 }
0x15a3   :  { %15969 = vmatpush3.bf16.msra.mxu1 %v16486_v41 }
0x15a4   :  { %16006 = vmatprep.subr.bf16.mxu1 %v16357_v24 }
0x15a6   :  { %15044 = vmatmul.mubr.f32.vlgmr.msra.gmra.mrb[80].mxu1 %v17527_v44 }
0x15a7   :  { %16008 = vmatpush3.bf16.msra.mxu1 %v16641_v30  ;;  %15120 = vmatprep.mubr.msk.f32.mxu1 %vm16358_vm2, %v16359_v46 }
0x15a8   :  { %16009 = vmatprep.subr.bf16.mxu1 %v16357_v24 }
0x15ab   :  { %16011 = vmatpush3.bf16.msra.mxu1 %v16656_v35 }
0x15ac   :  { %16018 = vmatprep.subr.bf16.mxu1 %v16357_v24 }
0x1609   :  { %v10303_v36 = vpop.f32.mrb[108].mxu0 }
0x160a   :  { %v14858_v47 = vpop.f32.mrb[109].mxu0 }
0x1611   :  { %v10394_v50 = vpop.f32.mrb[110].mxu0 }
0x1612   :  { %v10395_v51 = vadd.f32 %v10394_v50, %v10303_v36  ;;  %v14869_v41 = vpop.f32.mrb[111].mxu0 }
0x1619   :  { %v10474_v52 = vpop.f32.mrb[112].mxu0 }
0x161a   :  { %v10475_v53 = vadd.f32 %v10474_v52, %v10395_v51  ;;  %v14880_v54 = vpop.f32.mrb[113].mxu0 }
0x1621   :  { %v10551_v20 = vpop.f32.mrb[114].mxu0 }
0x1622   :  { %v10552_v9 = vadd.f32 %v10551_v20, %v10475_v53  ;;  %v14891_v0 = vpop.f32.mrb[115].mxu0 }
0x1629   :  { %v10634_v27 = vpop.f32.mrb[116].mxu0 }
0x162a   :  { %v10635_v40 = vadd.f32 %v10634_v27, %v10552_v9  ;;  %v14902_v10 = vpop.f32.mrb[117].mxu0 }
0x1631   :  { %v10709_v43 = vpop.f32.mrb[118].mxu0 }
0x1632   :  { %v10710_v45 = vadd.f32 %v10709_v43, %v10635_v40  ;;  %v14913_v22 = vpop.f32.mrb[119].mxu0 }
0x1639   :  { %v10885_v49 = vpop.f32.mrb[120].mxu0  ;;  %v10794_v55 = vpop.f32.mrb[74].mxu1 }
0x163a   :  { %v10795_v56 = vadd.f32 %v10794_v55, %v10710_v45  ;;  %v14935_v57 = vpop.f32.mrb[121].mxu0  ;;  %v14924_v58 = vpop.f32.mrb[75].mxu1  ;;  %v11726_v45 = vrot.slane %v17490_v28, 6 }
0x163c   :  { %v10886_v60 = vadd.f32 %v10885_v49, %v10795_v56 }
0x1641   :  { %v10965_v61 = vpop.f32.mrb[76].mxu1  ;;  %v11042_v14 = vpop.f32.mrb[122].mxu0 }
0x1642   :  { %v10966_v62 = vadd.f32 %v10965_v61, %v10886_v60  ;;  %v14946_v1 = vpop.f32.mrb[77].mxu1  ;;  %v14957_v2 = vpop.f32.mrb[123].mxu0 }
0x1644   :  { %v11043_v3 = vadd.f32 %v11042_v14, %v10966_v62 }
0x1649   :  { %v11125_v59 = vpop.f32.mrb[78].mxu1  ;;  %v11200_v29 = vpop.f32.mrb[124].mxu0 }
0x164a   :  { %v11126_v21 = vadd.f32 %v11125_v59, %v11043_v3  ;;  %v14968_v11 = vpop.f32.mrb[79].mxu1  ;;  %v14979_v12 = vpop.f32.mrb[125].mxu0 }
0x164c   :  { %v11201_v7 = vadd.f32 %v11200_v29, %v11126_v21 }
0x164e   :  { %v11204_v26 = vadd.f32 %v17618_v16, %v11201_v7 }
0x1650   :  { %16231 = vtanh.f32 %v11204_v26  ;;  %v12823_v36 = vmul.f32 -1.442695, %v11204_v26 }
0x165a   :  { %v16232_v25 = vpop.eup %16231 }
0x165b   :  { %11214 = vrot.lane.b32.xlu0 %v16232_v25, %s16360_s3 }
0x1679   :  { %v11710_v44 = vpop.f32.mrb[80].mxu1 }
0x167a   :  { %v11715_v32 = vrot.slane %v11710_v44, 2  ;;  %v15045_v13 = vpop.f32.mrb[81].mxu1 }
0x167c   :  { %v11717_v19 = vadd.f32 %v16564_v5, %v11715_v32 }
0x167e   :  { %16233 = vtanh.f32 %v11717_v19  ;;  %v12824_v53 = vmul.f32 -1.442695, %v11717_v19 }
0x167f   :  { %16235 = vpow2.f32 %v12823_v36 }
0x1688   :  { %v16234_v18 = vpop.eup %16233 }
0x1689   :  { %11730 = vrot.lane.b32.xlu1 %v16234_v18, %s16360_s3  ;;  %v16236_v47 = vpop.eup %16235 }
0x168a   :  { %v11208_v50 = vadd.f32 1.0, %v16236_v47 }
0x168c   :  { %16237 = vrcp.f32 %v11208_v50 }
0x168d   :  { %16239 = vpow2.f32 %v12824_v53 }
0x1696   :  { %v16238_v51 = vpop.eup %16237 }
0x1697   :  { %v16240_v54 = vpop.eup %16239  ;;  %v11212_v27 = vmul.f32 %v16238_v51, %v17485_v15 }
0x1698   :  { %v11721_v20 = vadd.f32 1.0, %v16240_v54 }
0x169a   :  { %16241 = vrcp.f32 %v11721_v20 }
0x16a4   :  { %v16242_v5 = vpop.eup %16241 }
0x16a5   :  { %v11728_v22 = vmul.f32 %v16242_v5, %v11726_v45 }
0x16cd   :  { %v11215_v41 = vpop.permute.xlu0 %11214 }
0x16ce   :  { %v11217_v52 = vmul.f32 %v16238_v51, %v11215_v41 }
0x16d0   :  { %11219 = vrot.lane.b32.xlu0 %v11217_v52, %s16360_s3 }
0x16fb   :  { %v11731_v9 = vpop.permute.xlu1 %11730 }
0x16fc   :  { %v11733_v0 = vmul.f32 %v16242_v5, %v11731_v9 }
0x16fe   :  { %11735 = vrot.lane.b32.xlu1 %v11733_v0, %s16360_s3 }
0x1742   :  { %v11220_v40 = vpop.permute.xlu0 %11219 }
0x1743   :  { %v17627_v10 = vadd.f32 %v11220_v40, %v11212_v27 }
0x1745   :  { %16243 = vtanh.f32 %v17627_v10 }
0x174f   :  { %v16244_v43 = vpop.eup %16243 }
0x1750   :  { %11225 = vrot.lane.b32.xlu0 %v16244_v43, %s16360_s3 }
0x1770   :  { %v11736_v49 = vpop.permute.xlu1 %11735 }
0x1771   :  { %v17632_v55 = vadd.f32 %v11736_v49, %v11728_v22 }
0x1773   :  { %16245 = vtanh.f32 %v17632_v55 }
0x177d   :  { %v16246_v56 = vpop.eup %16245 }
0x177e   :  { %11741 = vrot.lane.b32.xlu1 %v16246_v56, %s16360_s3 }
0x17c2   :  { %v11226_v15 = vpop.permute.xlu0 %11225 }
0x17c3   :  { %v11228_v57 = vmul.f32 %v16238_v51, %v11226_v15 }
0x17c5   :  { %11746 = vrot.lane.b32.xlu0 %v11228_v57, %s16361_s20 }
0x17f0   :  { %v11742_v58 = vpop.permute.xlu1 %11741 }
0x17f1   :  { %v17637_v60 = vmul.f32 %v16242_v5, %v11742_v58 }
0x17f3   :  { %v12236_v61 = vrot.slane %v17637_v60, 6 }
0x17f5   :  { %12237 = vrot.lane.b32.xlu1 %v12236_v61, %s16361_s20 }
0x1837   :  { %v11747_v28 = vpop.permute.xlu0 %11746 }
0x1838   :  { %v11748_v14 = vsel %vm581_vm3, %v11747_v28, 0 }
0x1839   :  { %v11819_v62 = vand.u32 4294901760, %v11748_v14 }
0x183b   :  { %v11820_v1 = vsub.f32 %v11748_v14, %v11819_v62 }
0x183d   :  { %v11821_v2 = vand.u32 4294901760, %v11820_v1 }
0x183f   :  { %v11822_v3 = vsub.f32 %v11820_v1, %v11821_v2 }
0x1841   :  { %v11823_v59 = vand.u32 4294901760, %v11822_v3 }
0x1843   :  { %15055 = vmatmul.mubr.f32.vlgmr.msra.gmra.mrb[126].mxu0 %v11823_v59 }
0x1844   :  { %15978 = vmatpush3.bf16.msra.mxu0 %v16589_v4  ;;  %15065 = vmatprep.mubr.msk.f32.mxu0 %vm16358_vm2, %v16359_v46 }
0x1845   :  { %15979 = vmatprep.subr.bf16.mxu0 %v16357_v24 }
0x1848   :  { %15981 = vmatpush3.bf16.msra.mxu0 %v16593_v6 }
0x1849   :  { %15982 = vmatprep.subr.bf16.mxu0 %v16357_v24 }
0x184b   :  { %15066 = vmatmul.mubr.f32.vlgmr.msra.gmra.mrb[128].mxu0 %v11819_v62 }
0x184c   :  { %15984 = vmatpush3.bf16.msra.mxu0 %v16585_v63  ;;  %15076 = vmatprep.mubr.msk.f32.mxu0 %vm16358_vm2, %v16359_v46 }
0x184d   :  { %15985 = vmatprep.subr.bf16.mxu0 %v16357_v24 }
0x1850   :  { %15987 = vmatpush3.bf16.msra.mxu0 %v16596_v8 }
0x1851   :  { %15988 = vmatprep.subr.bf16.mxu0 %v16357_v24 }
0x1853   :  { %15077 = vmatmul.mubr.f32.vlgmr.msra.gmra.mrb[130].mxu0 %v11820_v1 }
0x1854   :  { %15990 = vmatpush3.bf16.msra.mxu0 %v16578_v38  ;;  %15087 = vmatprep.mubr.msk.f32.mxu0 %vm16358_vm2, %v16359_v46 }
0x1855   :  { %15991 = vmatprep.subr.bf16.mxu0 %v16357_v24 }
0x1858   :  { %15993 = vmatpush3.bf16.msra.mxu0 %v16581_v48 }
0x1859   :  { %15994 = vmatprep.subr.bf16.mxu0 %v16357_v24 }
0x185b   :  { %15088 = vmatmul.mubr.f32.vlgmr.msra.gmra.mrb[132].mxu0 %v11821_v2 }
0x185c   :  { %15996 = vmatpush3.bf16.msra.mxu0 %v16610_v17  ;;  %15098 = vmatprep.mubr.msk.f32.mxu0 %vm16358_vm2, %v16359_v46 }
0x185d   :  { %15997 = vmatprep.subr.bf16.mxu0 %v16357_v24 }
0x1860   :  { %15999 = vmatpush3.bf16.msra.mxu0 %v16625_v23 }
0x1861   :  { %16000 = vmatprep.subr.bf16.mxu0 %v16357_v24 }
0x1863   :  { %15099 = vmatmul.mubr.f32.vlgmr.msra.gmra.mrb[134].mxu0 %v11819_v62 }
0x1864   :  { %16002 = vmatpush3.bf16.msra.mxu0 %v16578_v38  ;;  %15109 = vmatprep.mubr.msk.f32.mxu0 %vm16358_vm2, %v16359_v46 }
0x1865   :  { %16003 = vmatprep.subr.bf16.mxu0 %v16357_v24 }
0x1867   :  { %v12238_v63 = vpop.permute.xlu1 %12237 }
0x1868   :  { %16005 = vmatpush3.bf16.msra.mxu0 %v16581_v48  ;;  %v12239_v4 = vsel %vm581_vm3, %v12238_v63, 0 }
0x1869   :  { %v12310_v6 = vand.u32 4294901760, %v12239_v4  ;;  %16012 = vmatprep.subr.bf16.mxu0 %v16357_v24 }
0x186b   :  { %v12311_v8 = vsub.f32 %v12239_v4, %v12310_v6  ;;  %15110 = vmatmul.mubr.f32.vlgmr.msra.gmra.mrb[136].mxu0 %v11819_v62 }
0x186c   :  { %16014 = vmatpush3.bf16.msra.mxu0 %v16663_v37  ;;  %15131 = vmatprep.mubr.msk.f32.mxu0 %vm16358_vm2, %v16359_v46 }
0x186d   :  { %v12312_v38 = vand.u32 4294901760, %v12311_v8  ;;  %16015 = vmatprep.subr.bf16.mxu0 %v16357_v24 }
0x186f   :  { %v12313_v17 = vsub.f32 %v12311_v8, %v12312_v38 }
0x1870   :  { %16017 = vmatpush3.bf16.msra.mxu0 %v16670_v42 }
0x1871   :  { %v12314_v23 = vand.u32 4294901760, %v12313_v17  ;;  %16024 = vmatprep.subr.bf16.mxu0 %v16357_v24 }
0x1873   :  { %15132 = vmatmul.mubr.f32.vlgmr.msra.gmra.mrb[138].mxu0 %v12310_v6  ;;  %15121 = vmatmul.mubr.f32.vlgmr.msra.gmra.mrb[82].mxu1 %v12314_v23 }
0x1874   :  { %16020 = vmatpush3.bf16.msra.mxu1 %v16693_v31  ;;  %16026 = vmatpush3.bf16.msra.mxu0 %v16641_v30 }
0x1875   :  { %16021 = vmatprep.subr.bf16.mxu1 %v16357_v24  ;;  %16027 = vmatprep.subr.bf16.mxu0 %v16357_v24 }
0x1876   :  { %15142 = vmatprep.mubr.msk.f32.mxu1 %vm16358_vm2, %v16359_v46  ;;  %15153 = vmatprep.mubr.msk.f32.mxu0 %vm16358_vm2, %v16359_v46 }
0x1878   :  { %16023 = vmatpush3.bf16.msra.mxu1 %v16700_v33  ;;  %16029 = vmatpush3.bf16.msra.mxu0 %v16656_v35 }
0x1879   :  { %16030 = vmatprep.subr.bf16.mxu1 %v16357_v24  ;;  %16036 = vmatprep.subr.bf16.mxu0 %v16357_v24 }
0x187b   :  { %15143 = vmatmul.mubr.f32.vlgmr.msra.gmra.mrb[84].mxu1 %v12311_v8  ;;  %15154 = vmatmul.mubr.f32.vlgmr.msra.gmra.mrb[140].mxu0 %v12312_v38 }
0x187c   :  { %16032 = vmatpush3.bf16.msra.mxu1 %v16714_v34  ;;  %16038 = vmatpush3.bf16.msra.mxu0 %v16641_v30 }
0x187d   :  { %16033 = vmatprep.subr.bf16.mxu1 %v16357_v24  ;;  %16039 = vmatprep.subr.bf16.mxu0 %v16357_v24 }
0x187e   :  { %15164 = vmatprep.mubr.msk.f32.mxu1 %vm16358_vm2, %v16359_v46  ;;  %15175 = vmatprep.mubr.msk.f32.mxu0 %vm16358_vm2, %v16359_v46 }
0x1880   :  { %16035 = vmatpush3.bf16.msra.mxu1 %v16724_v39  ;;  %16041 = vmatpush3.bf16.msra.mxu0 %v16656_v35 }
0x1883   :  { %15165 = vmatmul.mubr.f32.vlgmr.msra.gmra.mrb[86].mxu1 %v12310_v6  ;;  %15176 = vmatmul.mubr.f32.vlgmr.msra.gmra.mrb[142].mxu0 %v12310_v6 }
0x1916   :  { %v11825_v48 = vpop.f32.mrb[126].mxu0 }
0x1917   :  { %v15056_v37 = vpop.f32.mrb[127].mxu0 }
0x191e   :  { %v11916_v42 = vpop.f32.mrb[128].mxu0 }
0x191f   :  { %v11917_v30 = vadd.f32 %v11916_v42, %v11825_v48  ;;  %v15067_v31 = vpop.f32.mrb[129].mxu0 }
0x1926   :  { %v11996_v33 = vpop.f32.mrb[130].mxu0 }
0x1927   :  { %v11997_v34 = vadd.f32 %v11996_v33, %v11917_v30  ;;  %v15078_v24 = vpop.f32.mrb[131].mxu0 }
0x192e   :  { %v12073_v29 = vpop.f32.mrb[132].mxu0 }
0x192f   :  { %v12074_v21 = vadd.f32 %v12073_v29, %v11997_v34  ;;  %v15089_v11 = vpop.f32.mrb[133].mxu0 }
0x1936   :  { %v12156_v12 = vpop.f32.mrb[134].mxu0 }
0x1937   :  { %v12157_v7 = vadd.f32 %v12156_v12, %v12074_v21  ;;  %v15100_v46 = vpop.f32.mrb[135].mxu0 }
0x193e   :  { %v12231_v26 = vpop.f32.mrb[136].mxu0 }
0x193f   :  { %v12232_v39 = vadd.f32 %v12231_v26, %v12157_v7  ;;  %v15111_v25 = vpop.f32.mrb[137].mxu0 }
0x1946   :  { %v12407_v35 = vpop.f32.mrb[138].mxu0  ;;  %v12316_v44 = vpop.f32.mrb[82].mxu1 }
0x1947   :  { %v12317_v32 = vadd.f32 %v12316_v44, %v12232_v39  ;;  %v15133_v13 = vpop.f32.mrb[139].mxu0  ;;  %v15122_v19 = vpop.f32.mrb[83].mxu1 }
0x1949   :  { %v12408_v18 = vadd.f32 %v12407_v35, %v12317_v32 }
0x194e   :  { %v12487_v36 = vpop.f32.mrb[84].mxu1  ;;  %v12564_v47 = vpop.f32.mrb[140].mxu0 }
0x194f   :  { %v12488_v50 = vadd.f32 %v12487_v36, %v12408_v18  ;;  %v15144_v51 = vpop.f32.mrb[85].mxu1  ;;  %v15155_v41 = vpop.f32.mrb[141].mxu0 }
0x1951   :  { %v12565_v52 = vadd.f32 %v12564_v47, %v12488_v50 }
0x1956   :  { %v12647_v53 = vpop.f32.mrb[86].mxu1  ;;  %v12722_v54 = vpop.f32.mrb[142].mxu0 }
0x1957   :  { %v12648_v20 = vadd.f32 %v12647_v53, %v12565_v52  ;;  %v15166_v5 = vpop.f32.mrb[87].mxu1  ;;  %v15177_v9 = vpop.f32.mrb[143].mxu0 }
0x1959   :  { %v12723_v0 = vadd.f32 %v12722_v54, %v12648_v20 }
0x195b   :  { %v12726_v27 = vadd.f32 %v17618_v16, %v12723_v0 }
0x195d   :  { %16247 = vtanh.f32 %v12726_v27  ;;  %v12825_v43 = vmul.f32 -1.442695, %v12726_v27 }
0x195f   :  { %16249 = vpow2.f32 %v12825_v43 }
0x1967   :  { %v16248_v40 = vpop.eup %16247 }
0x1968   :  { %12736 = vrot.lane.b32.xlu0 %v16248_v40, %s16360_s3 }
0x1969   :  { %v16250_v45 = vpop.eup %16249 }
0x196a   :  { %v12730_v22 = vadd.f32 1.0, %v16250_v45 }
0x196c   :  { %16251 = vrcp.f32 %v12730_v22 }
0x1976   :  { %v16252_v49 = vpop.eup %16251 }
0x1977   :  { %v12734_v57 = vmul.f32 %v16252_v49, %v17627_v10 }
0x19da   :  { %v12737_v56 = vpop.permute.xlu0 %12736 }
0x19db   :  { %v12739_v15 = vmul.f32 %v16252_v49, %v12737_v56 }
0x19dd   :  { %12741 = vrot.lane.b32.xlu1 %v12739_v15, %s16360_s3 }
0x19e1   :  { %12751 = vrot.lane.b32.xlu1 %v17637_v60, %s16361_s20 }
0x1a4f   :  { %v12742_v16 = vpop.permute.xlu1 %12741 }
0x1a50   :  { %v12744_v58 = vadd.f32 %v12742_v16, %v12734_v57 }
0x1a52   :  { %16253 = vtanh.f32 %v12744_v58 }
0x1a53   :  { %v12752_v61 = vpop.permute.xlu1 %12751 }
0x1a54   :  { %12755 = vst.msk [vmem:[#allocation7 - $0x6] sm:$0xc0] %vm12754_vm4, %v12752_v61 }
0x1a5c   :  { %v16254_v28 = vpop.eup %16253 }
0x1a5d   :  { %12747 = vrot.lane.b32.xlu0 %v16254_v28, %s16360_s3 }
0x1a61   :  { %12757 = vrot.lane.b32.xlu0 %v17632_v55, %s16362_s6 }
0x1a65   :  { %12769 = vrot.lane.b32.xlu0 %v12744_v58, %s16362_s6 }
0x1acf   :  { %v12748_v14 = vpop.permute.xlu0 %12747 }
0x1ad0   :  { %v12750_v62 = vmul.f32 %v16252_v49, %v12748_v14 }
0x1ad2   :  { %12762 = vrot.lane.b32.xlu1 %v12750_v62, %s16361_s20 }
0x1ad3   :  { %v12758_v60 = vpop.permute.xlu0 %12757 }
0x1ad4   :  { %12760 = vst.msk [vmem:[#allocation8 - $0x6] sm:$0xc0] %vm12754_vm4, %v12758_v60 }
0x1ad7   :  { %v12770_v10 = vpop.permute.xlu0 %12769 }
0x1ad8   :  { %12773 = vst.msk [vmem:[#allocation8 + $0x2] sm:$0x3] %vm12766_vm5, %v12770_v10 }
0x1ad9   :  { %16312 = shalt.err (!%p16309_p6)
}
0x1ada   :  { %s16313_s9 = scalar_lea.hbm %s17748_s8, 64 }
0x1adb   :  { %p16314_p7 = scmp.ne.s32.totalorder %s17748_s8, %s16313_s9  ;;  %p16317_p8 = scmp.lt.u32.totalorder %s16313_s9, %s17748_s8 }
0x1add   :  { %p16319_p9 = pnand %p16317_p8, %p16314_p7 }
0x1adf   :  { %16322 = shalt.err (!%p16319_p9)
}
0x1ae0   :  { %s16364_s5 = smov 2   ;;  %s16365_s16 = smov [#allocation7]  }
0x1ae1   :  { %12797 = dma.vmem_to_hbm [thread:$0]  %s12792_s29, 64, %s17748_s8, [#allocation9], %s16360_s3, %s16360_s3, %s16364_s5  }
0x1ae2   :  { %s12779_s1 = sshll.u32 %s16365_s16, 4  ;;  %s12780_s1 = int_to_ptr.vmem [resolvable:$true] %s12779_s1 }
0x1ae3   :  { %s16323_s17 = scalar_lea.vmem %s12780_s1, 64  ;;  %p16328_p11 = scmp.lt.s32.totalorder %s12780_s1, %s12780_s1 }
0x1ae4   :  { %p16324_p10 = scmp.ne.s32.totalorder %s12780_s1, %s16323_s17  ;;  %p16329_p12 = scmp.lt.s32.totalorder %s16323_s17, %s16323_s17 }
0x1ae6   :  { %p16330_p13 = por %p16329_p12, %p16328_p11 }
0x1ae8   :  { %p16331_p0 = pnand %p16330_p13, %p16324_p10 }
0x1b44   :  { %v12763_v55 = vpop.permute.xlu1 %12762 }
0x1b45   :  { %12767 = vst.msk [vmem:[#allocation7 + $0x2] sm:$0x3] %vm12766_vm5, %v12763_v55 }
0x1b46   :  { %16334 = shalt.err (!%p16331_p0)
}
0x1b47   :  { %s16335_s2 = scalar_lea.hbm %s17747_s7, 64 }
0x1b48   :  { %p16336_p1 = scmp.ne.s32.totalorder %s17747_s7, %s16335_s2  ;;  %p16339_p2 = scmp.lt.u32.totalorder %s16335_s2, %s17747_s7 }
0x1b4a   :  { %p16341_p3 = pnand %p16339_p2, %p16336_p1 }
0x1b4c   :  { %16344 = shalt.err (!%p16341_p3)
}
0x1b4d   :  { %12785 = dma.vmem_to_hbm [thread:$0]  %s12780_s1, 64, %s17747_s7, [#allocation4], %s16360_s3, %s16360_s3, %s16364_s5  }
0x1b4e   :  { %16349 = dma.done.wait [#allocation4], 64  }
0x1b4f   :  { %16350 = vsyncadd [#allocation4], 4294967232 }
0x1b50   :  { %16351 = dma.done.wait [#allocation9], 64  }
0x1b51   :  { %16352 = vsyncadd [#allocation9], 4294967232 }
0x1b52   :  { %12804 = vsyncpa [#allocation3], 1 }
0x1b53   :  { %12805 = vsyncpa [#allocation6], 1 }
0x1b54   :  { %12806 = vsyncpa [#allocation4], 1 }
0x1b55   :  { %12807 = vsyncpa [#allocation9], 1 }

</bundles_post_ra>
